<compile_context>
chip_gen: v7x
topology: tpu7x:2x2x1
jax: 0.10.0
libtpu: 0.0.40
codegen_flags: <defaults>
</compile_context>

<pallas_src>
import numpy as np
import jax
import jax.numpy as jnp
from jax import lax
from jax.experimental import pallas as pl
from jax.experimental.pallas import tpu as pltpu

LEAKY_SLOPE = 0.01            # PyTorch nn.LeakyReLU default negative_slope
BN_EPS = 1e-5                 # PyTorch BatchNorm2d default eps


def _tpu_vmem_capacity_bytes():
    try:
        return int(pltpu.get_tpu_info().vmem_capacity_bytes)
    except Exception:
        return 64 * 1024 * 1024      # conservative fallback (v7x per-TC VMEM)


_VMEM_CAP = _tpu_vmem_capacity_bytes()
_VMEM_LIMIT = max(32 * 1024 * 1024,
                  min(int(_VMEM_CAP * 0.8), _VMEM_CAP - (8 << 20)))
_PSIM_BUDGET = int(_VMEM_LIMIT * 0.55)   # live-set budget for the psim kernel
_SMALL_BUDGET = int(_VMEM_LIMIT * 0.35)  # budget for d2p / fusion kernels


def _leaky_relu(x):
    return jnp.where(x > 0, x, LEAKY_SLOPE * x)


def _divisors_mult8(n):
    return [t for t in range(8, n + 1, 8) if n % t == 0]


def _row_tile(n_rows, row_bytes, budget):
    """Largest multiple-of-8 divisor of n_rows whose live set fits `budget`."""
    if n_rows % 8 != 0:
        return n_rows
    best = 8
    for t in _divisors_mult8(n_rows):
        if t * row_bytes <= budget:
            best = max(best, t)
    return best


def _pick_psim_tiles(n, c, h1, h2, budget):
    """Pick (row_tile, col_tile) so the psim kernel's live intermediates fit.

    Per (i,j) pair the live set is ~10*C (diff + sim f32 + bf16 copy) plus
    ~6*H1 + ~6*H2 (f32 + bf16 hidden activations); weights and the full vp
    block are double-buffered and counted as fixed cost.
    """
    if n % 8 != 0:
        return n, n
    per_pair = 10 * c + 6 * h1 + 6 * h2 + 24
    fixed = 8 * n * c + 4 * (c * h1 + h1 * h2)

    def fits(t, tj):
        per_row = 3 * 8 * n            # ep/nsl2 outputs + ep_last input (dbl-buf f32)
        return fixed + t * per_row + t * tj * per_pair <= budget

    divs = _divisors_mult8(n)
    tj = n
    if not fits(8, n):
        cands = [d for d in divs if d % 128 == 0] or divs
        ok = [d for d in cands if fits(8, d)]
        tj = max(ok) if ok else min(cands)
    t = 8
    for d in divs:
        if fits(d, tj):
            t = max(t, d)
    return t, tj


# ----------------------------------------------------------------------------
# Kernel 1: PointSimilarity / PointSimilarity_Pre.
# Per (batch, row-tile), looping over static column chunks:
#   sim[i,j,:]  = (vp[i]-vp[j])**2  (or abs for 'l1')
#   nsl2[i,j]   = -sum_c sim[i,j,c]
#   ep_sig[i,j] = sigmoid(MLP_1x1conv(sim[i,j,:]))
#   ep[i,j]     = ep_sig * diag-masked ep_last   (+ full edge post-proc if fused)
# ----------------------------------------------------------------------------
def _make_psim_kernel(tile_i, tile_j, n, c, metric, fuse_edge_post):
    n_j = n // tile_j

    def kernel(vp_ref, ep_last_ref, w1_ref, s1_ref, sh1_ref,
               w2_ref, s2_ref, sh2_ref, w3_ref, b3_ref, ep_ref, nsl2_ref):
        i = pl.program_id(1)
        r0 = pl.multiple_of(i * tile_i, tile_i)
        vp_i = vp_ref[0, pl.ds(r0, tile_i), :]              # [T, C] f32
        w1 = w1_ref[...]
        w2 = w2_ref[...]
        row = lax.broadcasted_iota(jnp.int32, (tile_i, tile_j), 0) + r0

        ep_single = None
        abs_acc = None
        last_acc = None
        for jc in range(n_j):                                # static column chunks
            c0 = jc * tile_j
            vp_j = vp_ref[0, pl.ds(c0, tile_j), :]           # [TJ, C]
            diff = vp_i[:, None, :] - vp_j[None, :, :]       # [T, TJ, C]
            sim = jnp.abs(diff) if metric == "l1" else diff * diff
            nsl2 = -jnp.sum(sim, axis=-1)                    # [T, TJ] lane-dense

            x = sim.reshape(tile_i * tile_j, c).astype(jnp.bfloat16)
            h1 = jnp.dot(x, w1, preferred_element_type=jnp.float32)
            h1 = _leaky_relu(h1 * s1_ref[...] + sh1_ref[...])
            h2 = jnp.dot(h1.astype(jnp.bfloat16), w2,
                         preferred_element_type=jnp.float32)
            h2 = _leaky_relu(h2 * s2_ref[...] + sh2_ref[...])
            h2 = h2.reshape(tile_i, tile_j, h2.shape[-1])
            logit = jnp.sum(h2 * w3_ref[...], axis=-1) + b3_ref[0, 0]
            ep_sig = jax.nn.sigmoid(logit)                   # [T, TJ]

            col = lax.broadcasted_iota(jnp.int32, (tile_i, tile_j), 1) + c0
            is_diag = row == col
            if n_j == 1:
                ep_last_blk = ep_last_ref[0]
            else:
                ep_last_blk = ep_last_ref[0, :, pl.ds(c0, tile_j)]
            ep_last_m = jnp.where(is_diag, 0.0, ep_last_blk)
            ep = ep_sig * ep_last_m

            if fuse_edge_post:
                a = jnp.sum(jnp.abs(ep), axis=-1, keepdims=True)
                s = jnp.sum(ep_last_m, axis=-1, keepdims=True)
                abs_acc = a if abs_acc is None else abs_acc + a
                last_acc = s if last_acc is None else last_acc + s

            if n_j == 1:
                nsl2_ref[0] = nsl2
                ep_single = ep
            else:
                nsl2_ref[0, :, pl.ds(c0, tile_j)] = nsl2
                ep_ref[0, :, pl.ds(c0, tile_j)] = ep

        if fuse_edge_post:
            # PointSimilarity_Pre epilogue (per-row, uses whole-row reductions).
            ep_full = ep_single if n_j == 1 else ep_ref[0]   # [T, N]
            inv = pl.reciprocal(jnp.maximum(abs_acc, 1e-12), approx=True)
            ep_full = ep_full * inv * last_acc
            row_f = lax.broadcasted_iota(jnp.int32, (tile_i, n), 0) + r0
            col_f = lax.broadcasted_iota(jnp.int32, (tile_i, n), 1)
            ep_full = ep_full + jnp.where(row_f == col_f, 1.0, 0.0) + 1e-6
            # exact division for the final renormalize (rows must sum to 1)
            ep_full = ep_full / jnp.sum(ep_full, axis=-1, keepdims=True)
            ep_ref[0] = ep_full
        elif n_j == 1:
            ep_ref[0] = ep_single

    return kernel


def psim_pallas(vp, ep_last, params, metric="l2", fuse_edge_post=False):
    B, N, C = vp.shape
    w1, w2 = params["w1"], params["w2"]                      # bf16
    s1, sh1, s2, sh2 = params["s1"], params["sh1"], params["s2"], params["sh2"]
    w3, b3 = params["w3"], params["b3"]
    H1, H2 = w1.shape[1], w2.shape[1]
    T, TJ = _pick_psim_tiles(N, C, H1, H2, _PSIM_BUDGET)

    cost = pl.CostEstimate(
        flops=int(2 * B * N * N * (C * H1 + H1 * H2 + H2)),
        transcendentals=int(B * N * N),
        bytes_accessed=int(vp.size * 4 + ep_last.size * 4 + 2 * B * N * N * 4
                           + (w1.size + w2.size) * 2))

    ep, nsl2 = pl.pallas_call(
        _make_psim_kernel(T, TJ, N, C, metric, fuse_edge_post),
        out_shape=(jax.ShapeDtypeStruct((B, N, N), jnp.float32),
                   jax.ShapeDtypeStruct((B, N, N), jnp.float32)),
        grid=(B, N // T),
        in_specs=[
            pl.BlockSpec((1, N, C), lambda b, i: (b, 0, 0)),   # vp (f32: feeds nsl2)
            pl.BlockSpec((1, T, N), lambda b, i: (b, i, 0)),
            pl.BlockSpec((C, H1), lambda b, i: (0, 0)),
            pl.BlockSpec((1, H1), lambda b, i: (0, 0)),
            pl.BlockSpec((1, H1), lambda b, i: (0, 0)),
            pl.BlockSpec((H1, H2), lambda b, i: (0, 0)),
            pl.BlockSpec((1, H2), lambda b, i: (0, 0)),
            pl.BlockSpec((1, H2), lambda b, i: (0, 0)),
            pl.BlockSpec((1, H2), lambda b, i: (0, 0)),
            pl.BlockSpec(memory_space=pltpu.MemorySpace.SMEM),  # b3 scalar
        ],
        out_specs=(pl.BlockSpec((1, T, N), lambda b, i: (b, i, 0)),
                   pl.BlockSpec((1, T, N), lambda b, i: (b, i, 0))),
        compiler_params=pltpu.CompilerParams(
            dimension_semantics=("parallel", "parallel"),
            vmem_limit_bytes=_VMEM_LIMIT),
        cost_estimate=cost,
    )(vp, ep_last, w1, s1, sh1, w2, s2, sh2, w3, b3)
    # MLP output is symmetric in (i,j) -> the reference's transpose(1,3) is a no-op.
    return ep, nsl2


# ----------------------------------------------------------------------------
# Kernel 2: D2PAgg. Per (batch, row-tile):
#   e    = L1-normalize(edge * (1-eye))
#   h1   = node_i@W1a + e@nb        (nb = node@W1b precomputed once per batch)
#   out  = LeakyReLU(BN(.@W2)) of LeakyReLU(BN(h1))
# ----------------------------------------------------------------------------
def _make_d2p_kernel(tile_i):
    def kernel(edge_ref, node_ref, nb_ref, w1a_ref, s1_ref, sh1_ref,
               w2_ref, s2_ref, sh2_ref, out_ref):
        i = pl.program_id(1)
        r0 = pl.multiple_of(i * tile_i, tile_i)
        e = edge_ref[0]                                      # [T, N] f32
        n = e.shape[-1]
        row = lax.broadcasted_iota(jnp.int32, (tile_i, n), 0) + r0
        col = lax.broadcasted_iota(jnp.int32, (tile_i, n), 1)
        e = jnp.where(row == col, 0.0, e)
        inv = pl.reciprocal(
            jnp.maximum(jnp.sum(jnp.abs(e), axis=-1, keepdims=True), 1e-12),
            approx=True)
        e = e * inv

        # node_i is only a row tile (nb was hoisted); cast of the small tile is cheap.
        h1 = (jnp.dot(node_ref[0].astype(jnp.bfloat16), w1a_ref[...],
                      preferred_element_type=jnp.float32)
              + jnp.dot(e.astype(jnp.bfloat16), nb_ref[0],
                        preferred_element_type=jnp.float32))        # [T, H1]
        h1 = _leaky_relu(h1 * s1_ref[...] + sh1_ref[...])
        h2 = jnp.dot(h1.astype(jnp.bfloat16), w2_ref[...],
                     preferred_element_type=jnp.float32)
        out_ref[0] = _leaky_relu(h2 * s2_ref[...] + sh2_ref[...])
    return kernel


def d2p_pallas(edge, node, nb, params):
    B, N, _ = edge.shape
    D = node.shape[2]
    w1a = params["w1a"]
    s1, sh1 = params["s1"], params["sh1"]
    w2, s2, sh2 = params["w2"], params["s2"], params["sh2"]
    H1, H2 = w1a.shape[1], w2.shape[1]

    row_bytes = 12 * N + 6 * D + 10 * H1 + 10 * H2
    T = _row_tile(N, row_bytes, _SMALL_BUDGET)

    return pl.pallas_call(
        _make_d2p_kernel(T),
        out_shape=jax.ShapeDtypeStruct((B, N, H2), jnp.float32),
        grid=(B, N // T),
        in_specs=[
            pl.BlockSpec((1, T, N), lambda b, i: (b, i, 0)),
            pl.BlockSpec((1, T, D), lambda b, i: (b, i, 0)),   # row tile only
            pl.BlockSpec((1, N, H1), lambda b, i: (b, 0, 0)),  # hoisted node@W1b
            pl.BlockSpec((D, H1), lambda b, i: (0, 0)),
            pl.BlockSpec((1, H1), lambda b, i: (0, 0)),
            pl.BlockSpec((1, H1), lambda b, i: (0, 0)),
            pl.BlockSpec((H1, H2), lambda b, i: (0, 0)),
            pl.BlockSpec((1, H2), lambda b, i: (0, 0)),
            pl.BlockSpec((1, H2), lambda b, i: (0, 0)),
        ],
        out_specs=pl.BlockSpec((1, T, H2), lambda b, i: (b, i, 0)),
        compiler_params=pltpu.CompilerParams(
            dimension_semantics=("parallel", "parallel"),
            vmem_limit_bytes=_VMEM_LIMIT),
    )(edge, node, nb, w1a, s1, sh1, w2, s2, sh2)


# ----------------------------------------------------------------------------
# Kernel 3: self-attention softmax + label attention + fusion 1x1 conv + the
# two mask bmms + residual, producing the new point_node = [mask@pn,
# 0.5*mask@lab + 0.5*lab] as one wide lane-dense block.  Q (pre-scaled by
# 1/temp), K^T, att_l = lab@lab^T and the bf16 [pn | 0.5*lab] slab are
# precomputed once per forward (loop-invariant hoisting).
# ----------------------------------------------------------------------------
def _make_fusion_kernel(tile_i, emb):
    def kernel(q_ref, kt_ref, attl_ref, pnlab_ref, mix_ref,
               fw0_ref, fw1_ref, fb_ref, out_ref):
        logits = jnp.dot(q_ref[0], kt_ref[0],
                         preferred_element_type=jnp.float32)         # [T, N]
        m = jnp.max(logits, axis=-1, keepdims=True)
        ex = jnp.exp(logits - m)
        att = ex * pl.reciprocal(jnp.sum(ex, axis=-1, keepdims=True), approx=True)
        new_mask = fw0_ref[0, 0] * att + fw1_ref[0, 0] * attl_ref[0] + fb_ref[0, 0]

        # out[:, :E] = mask @ pn ;  out[:, E:] = 0.5*mask@lab + 0.5*lab
        mixed = jnp.dot(new_mask.astype(jnp.bfloat16), mix_ref[0],
                        preferred_element_type=jnp.float32)          # [T, W]
        pnlab_i = pnlab_ref[0]                                       # [T, W] f32
        col = lax.broadcasted_iota(jnp.int32, pnlab_i.shape, 1)
        out_ref[0] = mixed + jnp.where(col >= emb, 0.5, 0.0) * pnlab_i
    return kernel


def fusion_pallas(q_bf, kt_bf, att_l, pnlab, pnlab_mix_bf, fw0, fw1, fb, emb_size):
    B, N, W = pnlab.shape
    E = emb_size
    row_bytes = 16 * N + 2 * E + 24 * W
    T = _row_tile(N, row_bytes, _SMALL_BUDGET)

    return pl.pallas_call(
        _make_fusion_kernel(T, E),
        out_shape=jax.ShapeDtypeStruct((B, N, W), jnp.float32),
        grid=(B, N // T),
        in_specs=[
            pl.BlockSpec((1, T, E), lambda b, i: (b, i, 0)),   # Q / temp   (bf16)
            pl.BlockSpec((1, E, N), lambda b, i: (b, 0, 0)),   # K^T        (bf16)
            pl.BlockSpec((1, T, N), lambda b, i: (b, i, 0)),   # lab@lab^T  (f32)
            pl.BlockSpec((1, T, W), lambda b, i: (b, i, 0)),   # residual   (f32)
            pl.BlockSpec((1, N, W), lambda b, i: (b, 0, 0)),   # [pn|0.5lab](bf16)
            pl.BlockSpec(memory_space=pltpu.MemorySpace.SMEM),
            pl.BlockSpec(memory_space=pltpu.MemorySpace.SMEM),
            pl.BlockSpec(memory_space=pltpu.MemorySpace.SMEM),
        ],
        out_specs=pl.BlockSpec((1, T, W), lambda b, i: (b, i, 0)),
        compiler_params=pltpu.CompilerParams(
            dimension_semantics=("parallel", "parallel"),
            vmem_limit_bytes=_VMEM_LIMIT),
    )(q_bf, kt_bf, att_l, pnlab, pnlab_mix_bf, fw0, fw1, fb)


# ----------------------------------------------------------------------------
# JAX glue: per-generation edge post-processing (top-k + dim-1 scatter mask +
# renormalisation) and label one-hot construction.
# ----------------------------------------------------------------------------
def _edge_post_gen(ep_masked, ep_last, layer):
    """ep_masked = sigmoid(MLP) * diag-masked ep_last (from the kernel)."""
    B, N, _ = ep_last.shape
    diag = jnp.eye(N, dtype=ep_last.dtype)[None]
    ep_sum = jnp.sum(ep_last * (1.0 - diag), axis=-1, keepdims=True)
    kval = int(N * (1.0 - 0.1 * layer))
    # TODO(synk): top-k + dim-1 scatter mask kept in plain JAX; the reference's
    # scatter(dim=1) couples rows, so it has no clean per-row-tile kernel form.
    _, idx = lax.top_k(ep_masked, kval)                      # [B, N, kval]
    b_idx = jnp.broadcast_to(jnp.arange(B)[:, None, None], idx.shape)
    j_idx = jnp.broadcast_to(jnp.arange(kval)[None, None, :], idx.shape)
    # reference: mask.scatter(dim=1, indices, 1) -> mask[b, idx[b,i,j], j] = 1
    mask = jnp.zeros((B, N, N), ep_masked.dtype).at[b_idx, idx, j_idx].set(1.0)
    ep = ep_masked * mask
    ep = ep / jnp.maximum(jnp.sum(jnp.abs(ep), axis=-1, keepdims=True), 1e-12)
    ep = ep * ep_sum + diag + 1e-6
    ep = ep / jnp.sum(ep, axis=2, keepdims=True)
    return ep


def agnn_forward(params, middle_node, point_node, lab_vec, point_edge, tr_label,
                 point_metric="l2"):
    del lab_vec  # unused by the reference forward
    B, N, E = point_node.shape
    num_generations = len(params["psim"])

    # Initial point-graph edge (PointSimilarity_Pre, edge post fused in-kernel).
    point_edge, _ = psim_pallas(middle_node, point_edge, params["initial_edge"],
                                metric=point_metric, fuse_edge_post=True)

    # Label one-hot (reference hardcodes 320 == num_sample; parameterised as N).
    # torch: one_hot.scatter_(-2, tr_label, -2)  ->  one_hot[label_value, 0] = -2.
    b, nk, _ = tr_label.shape
    flat = tr_label.reshape(-1).astype(jnp.int32)
    one_hot = jnp.zeros((b * nk, N), jnp.float32).at[flat, 0].set(-2.0)
    one_hot_fin = one_hot.reshape(b, nk, N)
    zero_pad = jnp.full((b, N, N), 1.0 / N, jnp.float32)
    lab_new = jnp.concatenate([one_hot_fin, zero_pad], axis=2)       # [B, N, 2N]

    # Hoisted once-per-forward prep for the fusion kernel (loop-invariant wrt
    # row tiles): Q (pre-scaled by 1/temp), K^T, lab@lab^T, bf16 mix slab.
    inv_temp = 1.0 / float(np.power(E, 0.5))
    q_bf = (jnp.einsum("bne,ef->bnf", point_node, params["wq"]) * inv_temp
            ).astype(jnp.bfloat16)
    kt_bf = jnp.einsum("bne,ef->bfn", point_node, params["wk"]).astype(jnp.bfloat16)
    att_l = jnp.einsum("bnd,bmd->bnm", lab_new, lab_new)             # [B, N, N]
    pnlab = jnp.concatenate([point_node, lab_new], axis=2)           # [B, N, E+2N]
    pnlab_mix_bf = jnp.concatenate([point_node, 0.5 * lab_new],
                                   axis=2).astype(jnp.bfloat16)
    point_node = fusion_pallas(q_bf, kt_bf, att_l, pnlab, pnlab_mix_bf,
                               params["fw0"], params["fw1"], params["fb"], E)

    point_similarities, node_similarities_l2, point_nodes = [], [], []
    for l in range(num_generations):
        ep_masked, nsl2 = psim_pallas(point_node, point_edge, params["psim"][l],
                                      metric=point_metric, fuse_edge_post=False)
        point_edge = _edge_post_gen(ep_masked, point_edge, l)
        # Hoisted: nb = point_node @ W1b (loop-invariant wrt d2p's row tiles).
        nb = jnp.einsum("bnd,dh->bnh", point_node.astype(jnp.bfloat16),
                        params["d2p"][l]["w1b"],
                        preferred_element_type=jnp.float32).astype(jnp.bfloat16)
        pn_out = d2p_pallas(point_edge, point_node, nb, params["d2p"][l])
        # Concat kept in JAX: point_nodes[l] must be materialised at each width
        # anyway, so an aliased in-place slab would not save HBM traffic here.
        point_node = jnp.concatenate([point_node, pn_out], axis=2)
        point_similarities.append(point_edge)
        node_similarities_l2.append(nsl2)
        point_nodes.append(point_node)
    return point_similarities, node_similarities_l2, point_nodes, point_edge


# ----------------------------------------------------------------------------
# Deterministic parameter initialisation (shapes follow the module's __init__).
# Matmul weights stored in bf16 (MXU operands); BN scale/shift & biases in f32.
# ----------------------------------------------------------------------------
def _bn_eval_scale_shift(n):
    # eval-mode BatchNorm with default init (gamma=1, beta=0, mean=0, var=1)
    scale = jnp.full((1, n), 1.0 / np.sqrt(1.0 + BN_EPS), dtype=jnp.float32)
    shift = jnp.zeros((1, n), dtype=jnp.float32)
    return scale, shift


def init_psim_params(key, in_c, base_c):
    k1, k2, k3, k4 = jax.random.split(key, 4)
    h1, h2 = 2 * base_c, base_c
    s1, sh1 = _bn_eval_scale_shift(h1)
    s2, sh2 = _bn_eval_scale_shift(h2)
    return {
        "w1": (jax.random.normal(k1, (in_c, h1)) * np.sqrt(2.0 / in_c)).astype(jnp.bfloat16),
        "s1": s1, "sh1": sh1,
        "w2": (jax.random.normal(k2, (h1, h2)) * np.sqrt(2.0 / h1)).astype(jnp.bfloat16),
        "s2": s2, "sh2": sh2,
        "w3": (jax.random.normal(k3, (1, h2)) * np.sqrt(2.0 / h2)).astype(jnp.float32),
        "b3": (jax.random.normal(k4, (1, 1)) * 0.1).astype(jnp.float32),
    }


def init_d2p_params(key, node_dim, base_c=16):
    k1, k2, k3 = jax.random.split(key, 3)
    h1, h2 = 2 * base_c, base_c
    s1, sh1 = _bn_eval_scale_shift(h1)
    s2, sh2 = _bn_eval_scale_shift(h2)
    fan_in = 2 * node_dim
    return {
        "w1a": (jax.random.normal(k1, (node_dim, h1)) * np.sqrt(2.0 / fan_in)).astype(jnp.bfloat16),
        "w1b": (jax.random.normal(k2, (node_dim, h1)) * np.sqrt(2.0 / fan_in)).astype(jnp.bfloat16),
        "s1": s1, "sh1": sh1,
        "w2": (jax.random.normal(k3, (h1, h2)) * np.sqrt(2.0 / h1)).astype(jnp.bfloat16),
        "s2": s2, "sh2": sh2,
    }


def init_agnn_params(key, emb_size, num_sample, num_generations, add_dim=16):
    keys = jax.random.split(key, 5 + 2 * num_generations)
    std_qk = np.sqrt(2.0 / (emb_size + emb_size))
    params = {
        "initial_edge": init_psim_params(keys[0], emb_size, emb_size),
        "wq": (jax.random.normal(keys[1], (emb_size, emb_size)) * std_qk).astype(jnp.float32),
        "wk": (jax.random.normal(keys[2], (emb_size, emb_size)) * std_qk).astype(jnp.float32),
        "fw0": (jax.random.normal(keys[3], (1, 1)) * 0.5).astype(jnp.float32),
        "fw1": (jax.random.normal(keys[4], (1, 1)) * 0.5).astype(jnp.float32),
        "fb": jnp.zeros((1, 1), jnp.float32),
        "psim": [],
        "d2p": [],
    }
    dim = emb_size + 2 * num_sample      # reference: emb_size + 640 (= emb + 2*320)
    for l in range(num_generations):
        params["psim"].append(init_psim_params(keys[5 + 2 * l], dim, dim))
        params["d2p"].append(init_d2p_params(keys[6 + 2 * l], dim, add_dim))
        dim += add_dim
    return params


if __name__ == "__main__":
    B, N, E, G = 2, 16, 32, 2   # batch, num_sample, emb_size, num_generations
    NUM_CLASSES = 5
    key = jax.random.PRNGKey(0)
    kp, kd = jax.random.split(key)
    params = init_agnn_params(kp, emb_size=E, num_sample=N, num_generations=G)

    k1, k2, k3, k4, k5 = jax.random.split(kd, 5)
    middle_node = jax.random.normal(k1, (B, N, E), jnp.float32)
    point_node = jax.random.normal(k2, (B, N, E), jnp.float32)
    lab_vec = jax.random.normal(k3, (B, N, NUM_CLASSES), jnp.float32)  # unused (matches reference)
    point_edge = jax.random.uniform(k4, (B, N, N), jnp.float32, minval=0.1, maxval=1.0)
    tr_label = jax.random.randint(k5, (B, N, 1), 0, NUM_CLASSES, dtype=jnp.int32)

    outs = agnn_forward(params, middle_node, point_node, lab_vec, point_edge,
                        tr_label, point_metric="l2")
    jax.block_until_ready(outs)
    print("KERNEL_OK")
</pallas_src>

<mosaic_0001>
module attributes {stable_mosaic.version = 11 : i64} {
  func.func @kernel(%arg0: i32, %arg1: i32, %arg2: memref<1x16x32xf32, #tpu.memory_space<vmem>>, %arg3: memref<1x16x16xf32, #tpu.memory_space<vmem>>, %arg4: memref<32x64xbf16, #tpu.memory_space<vmem>>, %arg5: memref<1x64xf32, #tpu.memory_space<vmem>>, %arg6: memref<1x64xf32, #tpu.memory_space<vmem>>, %arg7: memref<64x32xbf16, #tpu.memory_space<vmem>>, %arg8: memref<1x32xf32, #tpu.memory_space<vmem>>, %arg9: memref<1x32xf32, #tpu.memory_space<vmem>>, %arg10: memref<1x32xf32, #tpu.memory_space<vmem>>, %arg11: memref<1x1xf32, #tpu.memory_space<smem>>, %arg12: memref<1x16x16xf32, #tpu.memory_space<vmem>>, %arg13: memref<1x16x16xf32, #tpu.memory_space<vmem>>) attributes {dimension_semantics = [#tpu.dimension_semantics<parallel>, #tpu.dimension_semantics<parallel>], iteration_bounds = array<i64: 2, 1>, scalar_prefetch = 0 : i64, scratch_operands = 0 : i64, tpu.core_type = #tpu.core_type<tc>, window_params = [{transform_indices = @transform_0, window_bounds = array<i64: 1, 16, 32>}, {transform_indices = @transform_1, window_bounds = array<i64: 1, 16, 16>}, {pipeline_mode = #tpu.pipeline_mode<synchronous>, transform_indices = @transform_2, window_bounds = array<i64: 32, 64>}, {pipeline_mode = #tpu.pipeline_mode<synchronous>, transform_indices = @transform_3, window_bounds = array<i64: 1, 64>}, {pipeline_mode = #tpu.pipeline_mode<synchronous>, transform_indices = @transform_4, window_bounds = array<i64: 1, 64>}, {pipeline_mode = #tpu.pipeline_mode<synchronous>, transform_indices = @transform_5, window_bounds = array<i64: 64, 32>}, {pipeline_mode = #tpu.pipeline_mode<synchronous>, transform_indices = @transform_6, window_bounds = array<i64: 1, 32>}, {pipeline_mode = #tpu.pipeline_mode<synchronous>, transform_indices = @transform_7, window_bounds = array<i64: 1, 32>}, {pipeline_mode = #tpu.pipeline_mode<synchronous>, transform_indices = @transform_8, window_bounds = array<i64: 1, 32>}, {transform_indices = @transform_9, window_bounds = array<i64: 1, 1>}, {transform_indices = @transform_10, window_bounds = array<i64: 1, 16, 16>}, {transform_indices = @transform_11, window_bounds = array<i64: 1, 16, 16>}]} {
    %c16_i32 = arith.constant 16 : i32
    %0 = arith.muli %arg1, %c16_i32 : i32
    %1 = tpu.assume_multiple %0, 16 : i32
    %c0 = arith.constant 0 : index
    %2 = arith.index_cast %1 : i32 to index
    %c0_0 = arith.constant 0 : index
    %3 = vector.load %arg2[%c0, %2, %c0_0] : memref<1x16x32xf32, #tpu.memory_space<vmem>>, vector<1x16x32xf32>
    %4 = vector.shape_cast %3 : vector<1x16x32xf32> to vector<16x32xf32>
    %c0_1 = arith.constant 0 : index
    %c0_2 = arith.constant 0 : index
    %5 = vector.load %arg4[%c0_1, %c0_2] : memref<32x64xbf16, #tpu.memory_space<vmem>>, vector<32x64xbf16>
    %c0_3 = arith.constant 0 : index
    %c0_4 = arith.constant 0 : index
    %6 = vector.load %arg7[%c0_3, %c0_4] : memref<64x32xbf16, #tpu.memory_space<vmem>>, vector<64x32xbf16>
    %7 = tpu.iota {dimensions = array<i32: 0>} : vector<16x16xi32>
    %8 = vector.broadcast %1 : i32 to vector<16x16xi32>
    %9 = arith.addi %7, %8 : vector<16x16xi32>
    %c0_5 = arith.constant 0 : index
    %c0_6 = arith.constant 0 : index
    %c0_7 = arith.constant 0 : index
    %10 = vector.load %arg2[%c0_5, %c0_6, %c0_7] : memref<1x16x32xf32, #tpu.memory_space<vmem>>, vector<1x16x32xf32>
    %11 = vector.shape_cast %10 : vector<1x16x32xf32> to vector<16x32xf32>
    %12 = vector.shape_cast %4 : vector<16x32xf32> to vector<16x1x32xf32>
    %13 = vector.shape_cast %11 : vector<16x32xf32> to vector<1x16x32xf32>
    %14 = vector.broadcast %12 : vector<16x1x32xf32> to vector<16x16x32xf32>
    %15 = vector.broadcast %13 : vector<1x16x32xf32> to vector<16x16x32xf32>
    %16 = arith.subf %14, %15 : vector<16x16x32xf32>
    %17 = arith.mulf %16, %16 : vector<16x16x32xf32>
    %cst = arith.constant dense<0.000000e+00> : vector<16x16xf32>
    %18 = vector.multi_reduction <add>, %17, %cst [2] : vector<16x16x32xf32> to vector<16x16xf32>
    %cst_8 = arith.constant 0.000000e+00 : f32
    %19 = vector.broadcast %cst_8 : f32 to vector<16x16xf32>
    %20 = arith.subf %19, %18 : vector<16x16xf32>
    %21 = vector.shape_cast %17 : vector<16x16x32xf32> to vector<256x32xf32>
    %22 = arith.truncf %21 : vector<256x32xf32> to vector<256x32xbf16>
    %cst_9 = arith.constant dense<0.000000e+00> : vector<256x64xf32>
    %23 = tpu.matmul %22, %5, %cst_9 {dimension_numbers = #tpu.dot_dimension_numbers<[1], [0], [0], [1], [0, 0, 1, 1], [], []>} : vector<256x32xbf16>, vector<32x64xbf16>, vector<256x64xf32> -> vector<256x64xf32>
    %c0_10 = arith.constant 0 : index
    %c0_11 = arith.constant 0 : index
    %24 = vector.load %arg5[%c0_10, %c0_11] : memref<1x64xf32, #tpu.memory_space<vmem>>, vector<1x64xf32>
    %25 = vector.broadcast %24 : vector<1x64xf32> to vector<256x64xf32>
    %26 = arith.mulf %23, %25 : vector<256x64xf32>
    %c0_12 = arith.constant 0 : index
    %c0_13 = arith.constant 0 : index
    %27 = vector.load %arg6[%c0_12, %c0_13] : memref<1x64xf32, #tpu.memory_space<vmem>>, vector<1x64xf32>
    %28 = vector.broadcast %27 : vector<1x64xf32> to vector<256x64xf32>
    %29 = arith.addf %26, %28 : vector<256x64xf32>
    %cst_14 = arith.constant 0.000000e+00 : f32
    %30 = vector.broadcast %cst_14 : f32 to vector<256x64xf32>
    %31 = arith.cmpf ogt, %29, %30 : vector<256x64xf32>
    %cst_15 = arith.constant 0.00999999977 : f32
    %32 = vector.broadcast %cst_15 : f32 to vector<256x64xf32>
    %33 = arith.mulf %32, %29 : vector<256x64xf32>
    %34 = arith.select %31, %29, %33 : vector<256x64xi1>, vector<256x64xf32>
    %35 = arith.truncf %34 : vector<256x64xf32> to vector<256x64xbf16>
    %cst_16 = arith.constant dense<0.000000e+00> : vector<256x32xf32>
    %36 = tpu.matmul %35, %6, %cst_16 {dimension_numbers = #tpu.dot_dimension_numbers<[1], [0], [0], [1], [0, 0, 1, 1], [], []>} : vector<256x64xbf16>, vector<64x32xbf16>, vector<256x32xf32> -> vector<256x32xf32>
    %c0_17 = arith.constant 0 : index
    %c0_18 = arith.constant 0 : index
    %37 = vector.load %arg8[%c0_17, %c0_18] : memref<1x32xf32, #tpu.memory_space<vmem>>, vector<1x32xf32>
    %38 = vector.broadcast %37 : vector<1x32xf32> to vector<256x32xf32>
    %39 = arith.mulf %36, %38 : vector<256x32xf32>
    %c0_19 = arith.constant 0 : index
    %c0_20 = arith.constant 0 : index
    %40 = vector.load %arg9[%c0_19, %c0_20] : memref<1x32xf32, #tpu.memory_space<vmem>>, vector<1x32xf32>
    %41 = vector.broadcast %40 : vector<1x32xf32> to vector<256x32xf32>
    %42 = arith.addf %39, %41 : vector<256x32xf32>
    %cst_21 = arith.constant 0.000000e+00 : f32
    %43 = vector.broadcast %cst_21 : f32 to vector<256x32xf32>
    %44 = arith.cmpf ogt, %42, %43 : vector<256x32xf32>
    %cst_22 = arith.constant 0.00999999977 : f32
    %45 = vector.broadcast %cst_22 : f32 to vector<256x32xf32>
    %46 = arith.mulf %45, %42 : vector<256x32xf32>
    %47 = arith.select %44, %42, %46 : vector<256x32xi1>, vector<256x32xf32>
    %48 = vector.shape_cast %47 : vector<256x32xf32> to vector<16x16x32xf32>
    %c0_23 = arith.constant 0 : index
    %c0_24 = arith.constant 0 : index
    %49 = vector.load %arg10[%c0_23, %c0_24] : memref<1x32xf32, #tpu.memory_space<vmem>>, vector<1x32xf32>
    %50 = vector.shape_cast %49 : vector<1x32xf32> to vector<1x1x32xf32>
    %51 = vector.broadcast %50 : vector<1x1x32xf32> to vector<16x16x32xf32>
    %52 = arith.mulf %48, %51 : vector<16x16x32xf32>
    %cst_25 = arith.constant dense<0.000000e+00> : vector<16x16xf32>
    %53 = vector.multi_reduction <add>, %52, %cst_25 [2] : vector<16x16x32xf32> to vector<16x16xf32>
    %c0_26 = arith.constant 0 : index
    %c0_27 = arith.constant 0 : index
    %54 = memref.load %arg11[%c0_26, %c0_27] : memref<1x1xf32, #tpu.memory_space<smem>>
    %55 = vector.broadcast %54 : f32 to vector<16x16xf32>
    %56 = arith.addf %53, %55 : vector<16x16xf32>
    %57 = arith.negf %56 : vector<16x16xf32>
    %58 = math.exp %57 : vector<16x16xf32>
    %cst_28 = arith.constant 1.000000e+00 : f32
    %59 = vector.broadcast %cst_28 : f32 to vector<16x16xf32>
    %60 = arith.addf %59, %58 : vector<16x16xf32>
    %61 = arith.divf %59, %60 : vector<16x16xf32>
    %62 = tpu.iota {dimensions = array<i32: 1>} : vector<16x16xi32>
    %c0_i32 = arith.constant 0 : i32
    %63 = vector.broadcast %c0_i32 : i32 to vector<16x16xi32>
    %64 = arith.addi %62, %63 : vector<16x16xi32>
    %65 = arith.cmpi eq, %9, %64 : vector<16x16xi32>
    %c0_29 = arith.constant 0 : index
    %c0_30 = arith.constant 0 : index
    %c0_31 = arith.constant 0 : index
    %66 = vector.load %arg3[%c0_29, %c0_30, %c0_31] : memref<1x16x16xf32, #tpu.memory_space<vmem>>, vector<1x16x16xf32>
    %67 = vector.shape_cast %66 : vector<1x16x16xf32> to vector<16x16xf32>
    %cst_32 = arith.constant 0.000000e+00 : f32
    %68 = vector.broadcast %cst_32 : f32 to vector<16x16xf32>
    %69 = arith.select %65, %68, %67 : vector<16x16xi1>, vector<16x16xf32>
    %70 = arith.mulf %61, %69 : vector<16x16xf32>
    %71 = math.absf %70 : vector<16x16xf32>
    %cst_33 = arith.constant dense<0.000000e+00> : vector<16xf32>
    %72 = vector.multi_reduction <add>, %71, %cst_33 [1] : vector<16x16xf32> to vector<16xf32>
    %73 = vector.shape_cast %72 : vector<16xf32> to vector<16x1xf32>
    %cst_34 = arith.constant dense<0.000000e+00> : vector<16xf32>
    %74 = vector.multi_reduction <add>, %69, %cst_34 [1] : vector<16x16xf32> to vector<16xf32>
    %75 = vector.shape_cast %74 : vector<16xf32> to vector<16x1xf32>
    %c0_35 = arith.constant 0 : index
    %c0_36 = arith.constant 0 : index
    %c0_37 = arith.constant 0 : index
    %76 = vector.load %arg13[%c0_35, %c0_36, %c0_37] : memref<1x16x16xf32, #tpu.memory_space<vmem>>, vector<1x16x16xf32>
    %77 = vector.shape_cast %76 : vector<1x16x16xf32> to vector<16x16xf32>
    %78 = vector.shape_cast %20 : vector<16x16xf32> to vector<1x16x16xf32>
    tpu.vector_store %arg13[%c0_35, %c0_36, %c0_37], %78 {strides = array<i32>} : memref<1x16x16xf32, #tpu.memory_space<vmem>>, vector<1x16x16xf32>,
    %cst_38 = arith.constant 9.99999996E-13 : f32
    %79 = vector.broadcast %cst_38 : f32 to vector<16x1xf32>
    %80 = arith.maximumf %73, %79 : vector<16x1xf32>
    %81 = tpu.reciprocal %80 {approx = true} : vector<16x1xf32> -> vector<16x1xf32>
    %82 = vector.broadcast %81 : vector<16x1xf32> to vector<16x16xf32>
    %83 = arith.mulf %70, %82 : vector<16x16xf32>
    %84 = vector.broadcast %75 : vector<16x1xf32> to vector<16x16xf32>
    %85 = arith.mulf %83, %84 : vector<16x16xf32>
    %86 = tpu.iota {dimensions = array<i32: 0>} : vector<16x16xi32>
    %87 = vector.broadcast %1 : i32 to vector<16x16xi32>
    %88 = arith.addi %86, %87 : vector<16x16xi32>
    %89 = tpu.iota {dimensions = array<i32: 1>} : vector<16x16xi32>
    %90 = arith.cmpi eq, %88, %89 : vector<16x16xi32>
    %cst_39 = arith.constant 1.000000e+00 : f32
    %cst_40 = arith.constant 0.000000e+00 : f32
    %91 = vector.broadcast %cst_39 : f32 to vector<16x16xf32>
    %92 = vector.broadcast %cst_40 : f32 to vector<16x16xf32>
    %93 = arith.select %90, %91, %92 : vector<16x16xi1>, vector<16x16xf32>
    %94 = arith.addf %85, %93 : vector<16x16xf32>
    %cst_41 = arith.constant 9.99999997E-7 : f32
    %95 = vector.broadcast %cst_41 : f32 to vector<16x16xf32>
    %96 = arith.addf %94, %95 : vector<16x16xf32>
    %cst_42 = arith.constant dense<0.000000e+00> : vector<16xf32>
    %97 = vector.multi_reduction <add>, %96, %cst_42 [1] : vector<16x16xf32> to vector<16xf32>
    %98 = vector.shape_cast %97 : vector<16xf32> to vector<16x1xf32>
    %99 = vector.broadcast %98 : vector<16x1xf32> to vector<16x16xf32>
    %100 = arith.divf %96, %99 : vector<16x16xf32>
    %c0_43 = arith.constant 0 : index
    %c0_44 = arith.constant 0 : index
    %c0_45 = arith.constant 0 : index
    %101 = vector.load %arg12[%c0_43, %c0_44, %c0_45] : memref<1x16x16xf32, #tpu.memory_space<vmem>>, vector<1x16x16xf32>
    %102 = vector.shape_cast %101 : vector<1x16x16xf32> to vector<16x16xf32>
    %103 = vector.shape_cast %100 : vector<16x16xf32> to vector<1x16x16xf32>
    tpu.vector_store %arg12[%c0_43, %c0_44, %c0_45], %103 {strides = array<i32>} : memref<1x16x16xf32, #tpu.memory_space<vmem>>, vector<1x16x16xf32>,
    return
  }
  func.func @transform_0(%arg0: i32, %arg1: i32) -> (i32, i32, i32) {
    %c0_i32 = arith.constant 0 : i32
    %c0_i32_0 = arith.constant 0 : i32
    %c0_i32_1 = arith.constant 0 : i32
    return %arg0, %c0_i32, %c0_i32_0 : i32, i32, i32
  }
  func.func @transform_1(%arg0: i32, %arg1: i32) -> (i32, i32, i32) {
    %c0_i32 = arith.constant 0 : i32
    %c0_i32_0 = arith.constant 0 : i32
    return %arg0, %arg1, %c0_i32 : i32, i32, i32
  }
  func.func @transform_2(%arg0: i32, %arg1: i32) -> (i32, i32) {
    %c0_i32 = arith.constant 0 : i32
    %c0_i32_0 = arith.constant 0 : i32
    %c0_i32_1 = arith.constant 0 : i32
    return %c0_i32, %c0_i32_0 : i32, i32
  }
  func.func @transform_3(%arg0: i32, %arg1: i32) -> (i32, i32) {
    %c0_i32 = arith.constant 0 : i32
    %c0_i32_0 = arith.constant 0 : i32
    %c0_i32_1 = arith.constant 0 : i32
    return %c0_i32, %c0_i32_0 : i32, i32
  }
  func.func @transform_4(%arg0: i32, %arg1: i32) -> (i32, i32) {
    %c0_i32 = arith.constant 0 : i32
    %c0_i32_0 = arith.constant 0 : i32
    %c0_i32_1 = arith.constant 0 : i32
    return %c0_i32, %c0_i32_0 : i32, i32
  }
  func.func @transform_5(%arg0: i32, %arg1: i32) -> (i32, i32) {
    %c0_i32 = arith.constant 0 : i32
    %c0_i32_0 = arith.constant 0 : i32
    %c0_i32_1 = arith.constant 0 : i32
    return %c0_i32, %c0_i32_0 : i32, i32
  }
  func.func @transform_6(%arg0: i32, %arg1: i32) -> (i32, i32) {
    %c0_i32 = arith.constant 0 : i32
    %c0_i32_0 = arith.constant 0 : i32
    %c0_i32_1 = arith.constant 0 : i32
    return %c0_i32, %c0_i32_0 : i32, i32
  }
  func.func @transform_7(%arg0: i32, %arg1: i32) -> (i32, i32) {
    %c0_i32 = arith.constant 0 : i32
    %c0_i32_0 = arith.constant 0 : i32
    %c0_i32_1 = arith.constant 0 : i32
    return %c0_i32, %c0_i32_0 : i32, i32
  }
  func.func @transform_8(%arg0: i32, %arg1: i32) -> (i32, i32) {
    %c0_i32 = arith.constant 0 : i32
    %c0_i32_0 = arith.constant 0 : i32
    %c0_i32_1 = arith.constant 0 : i32
    return %c0_i32, %c0_i32_0 : i32, i32
  }
  func.func @transform_9(%arg0: i32, %arg1: i32) -> (i32, i32) {
    %c0_i32 = arith.constant 0 : i32
    %c0_i32_0 = arith.constant 0 : i32
    %c0_i32_1 = arith.constant 0 : i32
    return %c0_i32, %c0_i32_0 : i32, i32
  }
  func.func @transform_10(%arg0: i32, %arg1: i32) -> (i32, i32, i32) {
    %c0_i32 = arith.constant 0 : i32
    %c0_i32_0 = arith.constant 0 : i32
    return %arg0, %arg1, %c0_i32 : i32, i32, i32
  }
  func.func @transform_11(%arg0: i32, %arg1: i32) -> (i32, i32, i32) {
    %c0_i32 = arith.constant 0 : i32
    %c0_i32_0 = arith.constant 0 : i32
    return %arg0, %arg1, %c0_i32 : i32, i32, i32
  }
}

</mosaic_0001>

<bundles_post_ra>
// kernel: tpu_custom_call.1
= control target key start
LH: loop header
LB: loop body
LE: loop exit
PB: predicated region body
PF: predicated region fallthrough
CT: control target
= control target key end

     0   :  { %s6553_s0 = inlined_call_operand.vmem [shape: f32[2,16,32], index: 0, kind: input, shape index: {}]   ;;  %s6554_s1 = inlined_call_operand.hbm [shape: f32[2,16,16], index: 1, kind: input, shape index: {}]   ;;  %s6555_s2 = inlined_call_operand.vmem [shape: bf16[32,64], index: 2, kind: input, shape index: {}]   ;;  %s6556_s3 = inlined_call_operand.vmem [shape: f32[1,64], index: 3, kind: input, shape index: {}]   ;;  %s6557_s4 = inlined_call_operand.vmem [shape: f32[1,64], index: 4, kind: input, shape index: {}]   ;;  %s6558_s5 = inlined_call_operand.vmem [shape: bf16[64,32], index: 5, kind: input, shape index: {}]   ;;  %s6559_s6 = inlined_call_operand.vmem [shape: f32[1,32], index: 6, kind: input, shape index: {}]   ;;  %s6560_s7 = inlined_call_operand.vmem [shape: f32[1,32], index: 7, kind: input, shape index: {}]   ;;  %s6561_s8 = inlined_call_operand.vmem [shape: f32[1,32], index: 8, kind: input, shape index: {}]   ;;  %s6562_s9 = inlined_call_operand.<no memory space> [shape: f32[1,1], index: 9, kind: input, shape index: {}]   ;;  %s6563_s10 = inlined_call_operand.hbm [shape: f32[2,16,16], index: 10, kind: output, shape index: {0}]   ;;  %s6564_s11 = inlined_call_operand.hbm [shape: f32[2,16,16], index: 11, kind: output, shape index: {1}]  }
   0x1   :  { %6585 = sst [smem:[#allocation31_spill]] %s6553_s0 }
   0x2   :  { %17 = sst [smem:[#allocation2]] %s6562_s9 }
   0x3   :  { %18 = vsyncpa [#allocation4], 0 }
   0x4   :  { %20 = vsyncpa [#allocation4 + $0x1], 0 }
   0x5   :  { %21 = vsyncpa [#allocation5], 0 }
   0x6   :  { %23 = vsyncpa [#allocation5 + $0x1], 0 }
   0x7   :  { %24 = vsyncpa [#allocation8], 0 }
   0x8   :  { %26 = vsyncpa [#allocation8 + $0x1], 0  ;;  %s4918_s19 = smov 0   ;;  %s4920_s20 = smov 0  }
   0x9   :  { %s4922_s21 = smov 0   ;;  %s4924_s22 = smov 0  }
   0xa   :  { %s4926_s23 = smov 0   ;;  %s4928_s24 = smov 0  }
   0xb LB: > { %6586 = sst [smem:[#allocation12_spill]] %s4839_s23  ;;  %s4237_s9 = sadd.s32 4294967295, %s4843_s24   ;;  %s4843_s24 = sphi %s4928_s24, %s32_s24   ;;  %s4839_s23 = sphi %s4926_s23, %s6638_s23   ;;  %s4835_s22 = sphi %s4924_s22, %s6637_s22   ;;  %s4831_s21 = sphi %s4922_s21, %s6641_s21   ;;  %s4827_s20 = sphi %s4920_s20, %s6640_s20   ;;  %s4823_s19 = sphi %s4918_s19, %s6639_s19  }
   0xc   : > { %s4238_s25 = sadd.s32 4294967294, %s4843_s24   ;;  %s44_s26 = sadd.s32 1, %s4839_s23 }
   0xd   : > { %s79_s27 = sadd.s32 1, %s4831_s21  ;;  %p46_p0 = scmp.ge.s32.totalorder %s44_s26, 2 }
   0xe   : > { %p86_p1 = scmp.ne.s32.totalorder %s4831_s21, %s4827_s20  ;;  %p87_p2 = scmp.eq.s32.totalorder %s4843_s24, 0 }
   0xf   : > { %p92_p3 = scmp.ne.s32.totalorder %s4827_s20, %s4823_s19  ;;  %s6643_s26 = smov (%p46_p0, %s44_s26), 0 }
  0x10   : > { %6587 = sst [smem:[#allocation13_spill]] %s6643_s26  ;;  %p4959_p4 = por %p87_p2, %p86_p1 }
  0x11   : > { %p93_p5 = scmp.eq.s32.totalorder %s4237_s9, 0  ;;  %s74_s29 = ssub.s32 %s4839_s23, %s6643_s26 }
  0x12   : > { %p286_p6 = scmp.eq.s32.totalorder %s4237_s9, 1  ;;  %p77_p7 = scmp.eq.s32.totalorder %s74_s29, 0 }
  0x13   : > { %p4965_p8 = por %p93_p5, %p92_p3  ;;  %p292_p10 = scmp.eq.s32.totalorder %s4238_s25, 1 }
  0x14   : > { %p4969_p9 = por %p286_p6, %p86_p1  ;;  %p4468_p13 = scmp.lt.s32.totalorder %s4843_s24, 2 }
  0x15   : > { %s4974_s13 = scalar_select %p77_p7, %s4831_s21, %s79_s27  }
  0x16   : > { %s6590_s12 = scalar_select %p4969_p9, 1, 0 }
  0x17   : > { %p4976_p11 = por %p292_p10, %p92_p3  ;;  %s372_s15 = sand.u32 1, %s4831_s21  }
  0x18   : > { %s4241_s16 = sshll.u32 %s372_s15, 4  ;;  %s4333_s17 = sshll.u32 %s4839_s23, 8 }
  0x19   : > { %s6591_s14 = scalar_select %p4976_p11, 1, 0 }
  0x1a   : > { %s4987_s29 = scalar_lea.hbm %s6554_s1, %s4333_s17  ;;  %s376_s25 = scalar_lea.vmem [#allocation3], %s4241_s16 }
  0x1b   : > { %s385_s27 = sshll.u32 %s376_s25, 4  ;;  %p4993_p0 = pnand %p4468_p13, %p4959_p4  ;;  %s4989_s27 = int_to_ptr.vmem [resolvable:$true] %s385_s27 }
  0x1c   : > { %s4998_s23 = scalar_lea.sflag [#allocation4], %s372_s15  ;;  %s4699_s17 = scalar_lea.hbm %s4987_s29, 256 }
  0x1d   : > { %p4700_p2 = scmp.ne.s32.totalorder %s4987_s29, %s4699_s17  ;;  %p4701_p3 = pneg %p4993_p0 }
  0x1e   : > { %s4704_s28 = scalar_lea.hbm %s6554_s1, 512  ;;  %p4705_p4 = scmp.lt.u32.totalorder %s4987_s29, %s6554_s1 }
  0x1f   : > { %p4702_p5 = pnand %p4701_p3, %p4700_p2  ;;  %p4706_p7 = scmp.lt.u32.totalorder %s4704_s28, %s4699_s17 }
  0x20   : > { %p4708_p13 = scmp.lt.u32.totalorder %s4699_s17, %s4987_s29 }
  0x21   : > { %p4703_p6 = pneg %p4702_p5  ;;  %p4707_p10 = por %p4706_p7, %p4705_p4 }
  0x23   : > { %p4709_p12 = por %p4708_p13, %p4707_p10 }
  0x25   : > { %p4710_p1 = pnand %p4709_p12, %p4703_p6 }
  0x27   : > { %4713 = shalt.err (!%p4710_p1)
}
  0x28   : > { %s4714_s15 = scalar_lea.vmem %s4989_s27, 256  ;;  %s4845_s16 = smov [#allocation3]  }
  0x29   : > { %p4715_p2 = scmp.ne.s32.totalorder %s4989_s27, %s4714_s15  ;;  %s4719_s18 = sshll.u32 %s4845_s16, 4  ;;  %s4720_s18 = int_to_ptr.vmem [resolvable:$false] %s4719_s18 }
  0x2a   : > { %s4721_s9 = scalar_lea.vmem %s4720_s18, 512  ;;  %p4722_p9 = scmp.lt.s32.totalorder %s4989_s27, %s4720_s18 }
  0x2b   : > { %p4717_p5 = pnand %p4715_p2, %p4701_p3  ;;  %p4723_p4 = scmp.lt.s32.totalorder %s4721_s9, %s4714_s15 }
  0x2d   : > { %p4718_p11 = pneg %p4717_p5  ;;  %p4724_p7 = por %p4723_p4, %p4722_p9 }
  0x2f   : > { %p4725_p10 = pnand %p4724_p7, %p4718_p11 }
  0x31   : > { %4728 = shalt.err (!%p4725_p10)
}
  0x32   : > { %s4846_s17 = smov 128   ;;  %s4847_s28 = smov 8  }
  0x33   : > { %4460 = dma.hbm_to_vmem [thread:$0]  (!%p4993_p0), %s4987_s29, 256, %s4989_s27, %s4998_s23, %s4846_s17, %s4846_s17, %s4847_s28  }
  0x34   : > { %p393_p12 = scmp.lt.s32.totalorder %s4843_s24, 3  ;;  %p6593_p1 = scmp.ge.s32.totalorder %s4843_s24, 1 }
  0x36   : > { %p394_p3 = pnand %p6593_p1, %p393_p12 }
  0x38   : > { %397 = sbr.rel (%p394_p3) target bundleno = 1612 (0x64c), region = 60 }
  0x3f   : > { %s5030_s25 = sand.u32 1, %s4827_s20  }
  0x40   : > { %s5033_s15 = sshll.u32 %s5030_s25, 4  ;;  %s400_s16 = scalar_lea.sflag [#allocation4], %s5030_s25 }
  0x41   : > { %s403_s18 = scalar_lea.vmem [#allocation3], %s5033_s15 }
  0x42   : > { %4810 = dma.done.wait (%p4965_p8), %s400_s16, 256  }
  0x43   : > { %4812 = vsyncadd (%p4965_p8), %s400_s16, 4294967040  ;;  %p452_p9 = scmp.lt.s32.totalorder %s4835_s22, 1  ;;  %v477_v0 = vlaneseq  ;;  %v4848_v1 = vmov 1966171168   ;;  %s6594_s0 = sld [smem:[#allocation31_spill]]  ;;  %v4527_v6 = vld [vmem:[%s6555_s2] sm:$0xff]  }
  0x44   : > { %v489_v2 = vunpack.c.l.s4 %v4848_v1  ;;  %v4528_v7 = vld [vmem:[%s6555_s2 + $0x8] sm:$0xff]   ;;  %4375 = vmatprep.subr.bf16.mxu0 %v4527_v6  ;;  %v4531_v12 = vld [vmem:[%s6558_s5] sm:$0xff]   ;;  %vm729_vm0 = vcmask 261120   ;;  %vm1309_vm6 = vcmask 523264   ;;  %s4068_s17 = scalar_lea.sflag [#allocation8], %s5030_s25  ;;  %p6633_p11 = scmp.ne.s32.totalorder %s6590_s12, 0 }
  0x45   : > { %s453_s23 = scalar_select %p452_p9, %s4835_s22, 1  ;;  %v5044_v3 = vshrl.u32 %v477_v0, 7  ;;  %4376 = vmatpush3.bf16.msra.mxu0 %v4527_v6  ;;  %4411 = vmatprep.subr.bf16.mxu1 %v4531_v12 }
  0x46   : > { %v490_v4 = vunpack.c.0.s8 %v489_v2  ;;  %4377 = vmatprep.subr.bf16.mxu0 %v4528_v7  ;;  %4412 = vmatpush3.bf16.msra.mxu1 %v4531_v12  ;;  %s4851_s16 = smov [#allocation7]  }
  0x47   : > { %s4334_s26 = sshll.u32 %s453_s23, 4  ;;  %v5065_v11 = vsub.s32 0, %v5044_v3  ;;  %s1828_s23 = sld [smem:[#allocation2]] }
  0x48   : > { %v5050_v5 = vsub.s32 %v490_v4, %v5044_v3 }
  0x49   : > { %s456_s9 = scalar_lea.vmem %s6594_s0, %s4334_s26  ;;  %4378 = vmatpush3.bf16.msra.mxu0 %v4528_v7  ;;  %s6584_s26 = sshll.u32 %s4835_s22, 8 }
  0x4a   : > { %v5058_v8 = vld [vmem:[%s456_s9] sm:$0xff]  ;;  %v5072_v16 = vld [vmem:[%s456_s9 + $0x8] sm:$0xff]  ;;  %s6392_s9 = scalar_lea.hbm %s6564_s11, %s6584_s26 }
  0x4b   : > { %v487_v9 = vcombine.high %v5058_v8, %v5058_v8  ;;  %v494_v10 = vrot.slane %v5058_v8, %v5050_v5  ;;  %v543_v54 = vrot.slane %v5072_v16, %v5050_v5 }
  0x4d   : > { %v501_v13 = vrot.slane %v487_v9, %v5050_v5  ;;  %v502_v14 = vcombine.high %v494_v10, %v494_v10  ;;  %v510_v15 = vrot.slane %v494_v10, %v5050_v5  ;;  %v559_v62 = vrot.slane %v543_v54, %v5050_v5 }
  0x4e   : > { %v551_v4 = vcombine.high %v543_v54, %v543_v54  ;;  %v536_v10 = vcombine.high %v5072_v16, %v5072_v16 }
  0x4f   : > { %v532_v17 = vcombine.high %v510_v15, %v510_v15  ;;  %v588_v18 = vrot.slane %v510_v15, %v5065_v11  ;;  %v524_v19 = vrot.slane %v502_v14, %v5050_v5  ;;  %v517_v20 = vrot.slane %v501_v13, %v5050_v5 }
  0x50   : > { %v503_v21 = vcombine.high %v501_v13, %v501_v13  ;;  %v620_v9 = vrot.slane %v559_v62, %v5065_v11  ;;  %v573_v15 = vrot.slane %v551_v4, %v5050_v5 }
  0x51   : > { %v665_v22 = vsub.f32 %v588_v18, %v5058_v8  ;;  %v666_v23 = vsub.f32 %v588_v18, %v5072_v16  ;;  %v592_v24 = vrot.slane %v524_v19, %v5065_v11  ;;  %v596_v25 = vrot.slane %v532_v17, %v5065_v11 }
  0x52   : > { %v534_v26 = vcombine.high %v524_v19, %v524_v19  ;;  %v604_v27 = vrot.slane %v517_v20, %v5065_v11  ;;  %v531_v28 = vrot.slane %v503_v21, %v5050_v5  ;;  %v533_v29 = vcombine.high %v517_v20, %v517_v20 }
  0x53   : > { %v5083_v30 = vmul.f32 %v665_v22, %v665_v22  ;;  %v5085_v31 = vmul.f32 %v666_v23, %v666_v23  ;;  %v667_v32 = vsub.f32 %v592_v24, %v5058_v8  ;;  %v668_v33 = vsub.f32 %v592_v24, %v5072_v16 }
  0x54   : > { %v669_v34 = vsub.f32 %v596_v25, %v5058_v8  ;;  %v670_v35 = vsub.f32 %v596_v25, %v5072_v16  ;;  %v600_v36 = vrot.slane %v534_v26, %v5065_v11  ;;  %v673_v37 = vsub.f32 %v604_v27, %v5058_v8 }
  0x55   : > { %v858_v38 = vpack.c.bf16 %v5085_v31, %v5083_v30  ;;  %v5095_v39 = vmul.f32 %v667_v32, %v667_v32  ;;  %v5097_v40 = vmul.f32 %v668_v33, %v668_v33  ;;  %v674_v41 = vsub.f32 %v604_v27, %v5072_v16 }
  0x56   : > { %v5100_v42 = vmul.f32 %v669_v34, %v669_v34  ;;  %v5102_v43 = vmul.f32 %v670_v35, %v670_v35  ;;  %v671_v44 = vsub.f32 %v600_v36, %v5058_v8  ;;  %v672_v45 = vsub.f32 %v600_v36, %v5072_v16 }
  0x57   : > { %4379 = vmatprep.mubr.msk.bf16.mxu0 %vm729_vm0, %v858_v38  ;;  %v859_v46 = vpack.c.bf16 %v5097_v40, %v5095_v39  ;;  %v608_v50 = vrot.slane %v531_v28, %v5065_v11  ;;  %v5118_v51 = vmul.f32 %v673_v37, %v673_v37  ;;  %v5120_v52 = vmul.f32 %v674_v41, %v674_v41 }
  0x58   : > { %v860_v47 = vpack.c.bf16 %v5102_v43, %v5100_v42  ;;  %v5112_v48 = vmul.f32 %v671_v44, %v671_v44  ;;  %v5114_v49 = vmul.f32 %v672_v45, %v672_v45  ;;  %v612_v53 = vrot.slane %v533_v29, %v5065_v11 }
  0x59   : > { %4380 = vmatmul.mubr.msk.bf16.vlgmr.msra.gmra.mrb[0].mxu0 %vm729_vm0, %v859_v46  ;;  %v675_v56 = vsub.f32 %v608_v50, %v5058_v8  ;;  %v676_v57 = vsub.f32 %v608_v50, %v5072_v16  ;;  %v535_v58 = vcombine.high %v531_v28, %v531_v28  ;;  %v862_v59 = vpack.c.bf16 %v5120_v52, %v5118_v51 }
  0x5a   : > { %4383 = vmatprep.mubr.msk.bf16.mxu0 %vm729_vm0, %v860_v47  ;;  %v861_v55 = vpack.c.bf16 %v5114_v49, %v5112_v48  ;;  %v677_v60 = vsub.f32 %v612_v53, %v5058_v8  ;;  %v678_v61 = vsub.f32 %v612_v53, %v5072_v16  ;;  %v681_v18 = vsub.f32 %v620_v9, %v5058_v8 }
  0x5b   : > { %v5135_v63 = vmul.f32 %v675_v56, %v675_v56  ;;  %v5137_v1 = vmul.f32 %v676_v57, %v676_v57  ;;  %v616_v2 = vrot.slane %v535_v58, %v5065_v11  ;;  %v682_v19 = vsub.f32 %v620_v9, %v5072_v16 }
  0x5c   : > { %v5141_v6 = vmul.f32 %v677_v60, %v677_v60  ;;  %v5143_v7 = vmul.f32 %v678_v61, %v678_v61  ;;  %v581_v20 = vcombine.high %v559_v62, %v559_v62  ;;  %v624_v23 = vrot.slane %v573_v15, %v5065_v11 }
  0x5d   : > { %v863_v12 = vpack.c.bf16 %v5137_v1, %v5135_v63  ;;  %v679_v13 = vsub.f32 %v616_v2, %v5058_v8  ;;  %v680_v14 = vsub.f32 %v616_v2, %v5072_v16  ;;  %v5164_v24 = vmul.f32 %v681_v18, %v681_v18 }
  0x5e   : > { %v864_v17 = vpack.c.bf16 %v5143_v7, %v5141_v6  ;;  %v5166_v25 = vmul.f32 %v682_v19, %v682_v19  ;;  %v628_v26 = vrot.slane %v581_v20, %v5065_v11  ;;  %v550_v27 = vrot.slane %v536_v10, %v5050_v5 }
  0x5f   : > { %v5158_v21 = vmul.f32 %v679_v13, %v679_v13  ;;  %v5160_v22 = vmul.f32 %v680_v14, %v680_v14  ;;  %v683_v29 = vsub.f32 %v624_v23, %v5058_v8  ;;  %v684_v32 = vsub.f32 %v624_v23, %v5072_v16 }
  0x60   : > { %v583_v33 = vcombine.high %v573_v15, %v573_v15  ;;  %v866_v34 = vpack.c.bf16 %v5166_v25, %v5164_v24  ;;  %v685_v35 = vsub.f32 %v628_v26, %v5058_v8  ;;  %v686_v36 = vsub.f32 %v628_v26, %v5072_v16 }
  0x61   : > { %4384 = vmatmul.mubr.msk.bf16.gmra.mrb[4].mxu0 %vm729_vm0, %v861_v55  ;;  %v865_v28 = vpack.c.bf16 %v5160_v22, %v5158_v21  ;;  %v566_v37 = vrot.slane %v550_v27, %v5050_v5  ;;  %v5180_v38 = vmul.f32 %v683_v29, %v683_v29  ;;  %v5182_v41 = vmul.f32 %v684_v32, %v684_v32 }
  0x62   : > { %4387 = vmatprep.mubr.msk.bf16.mxu0 %vm729_vm0, %v862_v59  ;;  %v632_v44 = vrot.slane %v583_v33, %v5065_v11  ;;  %v552_v45 = vcombine.high %v550_v27, %v550_v27  ;;  %v5186_v46 = vmul.f32 %v685_v35, %v685_v35  ;;  %v5188_v47 = vmul.f32 %v686_v36, %v686_v36 }
  0x63   : > { %v636_v50 = vrot.slane %v566_v37, %v5065_v11  ;;  %v867_v53 = vpack.c.bf16 %v5182_v41, %v5180_v38  ;;  %v582_v60 = vcombine.high %v566_v37, %v566_v37  ;;  %v4534_v37 = vld [vmem:[%s6558_s5 + $0x18] sm:$0xff]  }
  0x64   : > { %v687_v54 = vsub.f32 %v632_v44, %v5058_v8  ;;  %v688_v55 = vsub.f32 %v632_v44, %v5072_v16  ;;  %v580_v56 = vrot.slane %v552_v45, %v5050_v5  ;;  %v868_v57 = vpack.c.bf16 %v5188_v47, %v5186_v46 }
  0x65   : > { %v689_v58 = vsub.f32 %v636_v50, %v5058_v8  ;;  %v690_v59 = vsub.f32 %v636_v50, %v5072_v16  ;;  %v644_v9 = vrot.slane %v582_v60, %v5065_v11  ;;  %v730_v44 = vsel %vm729_vm0, %v5083_v30, 0.0 }
  0x66   : > { %v5201_v61 = vmul.f32 %v687_v54, %v687_v54  ;;  %v5203_v62 = vmul.f32 %v688_v55, %v688_v55  ;;  %v640_v2 = vrot.slane %v580_v56, %v5065_v11  ;;  %v584_v14 = vcombine.high %v580_v56, %v580_v56  ;;  %731 = vadd.xlane.f32.xlu0 %v730_v44 }
  0x67   : > { %v5207_v4 = vmul.f32 %v689_v58, %v689_v58  ;;  %v5209_v5 = vmul.f32 %v690_v59, %v690_v59  ;;  %v694_v18 = vsub.f32 %v644_v9, %v5072_v16  ;;  %v736_v45 = vsel %vm729_vm0, %v5095_v39, 0.0 }
  0x68   : > { %v869_v10 = vpack.c.bf16 %v5203_v62, %v5201_v61  ;;  %v692_v13 = vsub.f32 %v640_v2, %v5072_v16  ;;  %v648_v23 = vrot.slane %v584_v14, %v5065_v11  ;;  %737 = vadd.xlane.f32.xlu1 %v736_v45  ;;  %v733_v50 = vsel %vm729_vm0, %v5085_v31, 0.0  ;;  %v5354_v14 = vld [vmem:[%s6557_s4] ss:$0 sm:$0xff] }
  0x69   : > { %4388 = vmatmul.mubr.msk.bf16.gmra.mrb[8].mxu0 %vm729_vm0, %v863_v12  ;;  %v691_v12 = vsub.f32 %v640_v2, %v5058_v8  ;;  %v870_v15 = vpack.c.bf16 %v5209_v5, %v5207_v4  ;;  %v5229_v27 = vmul.f32 %v694_v18, %v694_v18  ;;  %v742_v54 = vsel %vm729_vm0, %v5100_v42, 0.0 }
  0x6a   : > { %4391 = vmatprep.mubr.msk.bf16.mxu0 %vm729_vm0, %v864_v17  ;;  %v693_v17 = vsub.f32 %v644_v9, %v5058_v8  ;;  %v5223_v20 = vmul.f32 %v692_v13, %v692_v13  ;;  %v695_v29 = vsub.f32 %v648_v23, %v5058_v8  ;;  %v696_v32 = vsub.f32 %v648_v23, %v5072_v16  ;;  %v4532_v8 = vld [vmem:[%s6558_s5 + $0x8] sm:$0xff]   ;;  %v4533_v16 = vld [vmem:[%s6558_s5 + $0x10] sm:$0xff]   ;;  %v5344_v9 = vld [vmem:[%s6556_s3] ss:$0 sm:$0xff] }
  0x6b   : > { %v5221_v19 = vmul.f32 %v691_v12, %v691_v12  ;;  %4413 = vmatprep.subr.bf16.mxu1 %v4532_v8  ;;  %734 = vadd.xlane.f32.xlu0 %v733_v50  ;;  %v745_v55 = vsel %vm729_vm0, %v5102_v43, 0.0  ;;  %v757_v30 = vsel %vm729_vm0, %v5120_v52, 0.0  ;;  %v754_v39 = vsel %vm729_vm0, %v5118_v51, 0.0 }
  0x6c   : > { %v5227_v26 = vmul.f32 %v693_v17, %v693_v17  ;;  %v5240_v35 = vmul.f32 %v696_v32, %v696_v32  ;;  %4414 = vmatpush3.bf16.msra.mxu1 %v4532_v8  ;;  %v751_v31 = vsel %vm729_vm0, %v5114_v49, 0.0  ;;  %v763_v42 = vsel %vm729_vm0, %v5137_v1, 0.0 }
  0x6d   : > { %4415 = vmatprep.subr.bf16.mxu1 %v4533_v16  ;;  %v760_v43 = vsel %vm729_vm0, %v5135_v63, 0.0  ;;  %v769_v51 = vsel %vm729_vm0, %v5143_v7, 0.0  ;;  %v766_v52 = vsel %vm729_vm0, %v5141_v6, 0.0  ;;  %v772_v49 = vsel %vm729_vm0, %v5158_v21, 0.0 }
  0x6e   : > { %v872_v33 = vpack.c.bf16 %v5229_v27, %v5227_v26  ;;  %v781_v63 = vsel %vm729_vm0, %v5166_v25, 0.0  ;;  %v778_v1 = vsel %vm729_vm0, %v5164_v24, 0.0  ;;  %v787_v6 = vsel %vm729_vm0, %v5182_v41, 0.0 }
  0x6f   : > { %743 = vadd.xlane.f32.xlu0 %v742_v54  ;;  %v784_v7 = vsel %vm729_vm0, %v5180_v38, 0.0  ;;  %v793_v21 = vsel %vm729_vm0, %v5188_v47, 0.0  ;;  %v799_v24 = vsel %vm729_vm0, %v5203_v62, 0.0  ;;  %v796_v25 = vsel %vm729_vm0, %v5201_v61, 0.0  ;;  %v2058_v61 = vld [vmem:[%s403_s18] sm:$0xff] }
  0x70   : > { %4416 = vmatpush3.bf16.msra.mxu1 %v4533_v16  ;;  %v805_v38 = vsel %vm729_vm0, %v5209_v5, 0.0  ;;  %v802_v41 = vsel %vm729_vm0, %v5207_v4, 0.0  ;;  %v808_v47 = vsel %vm729_vm0, %v5221_v19, 0.0  ;;  %v817_v56 = vsel %vm729_vm0, %v5229_v27, 0.0 }
  0x71   : > { %4392 = vmatmul.mubr.msk.bf16.gmra.mrb[12].mxu0 %vm729_vm0, %v865_v28  ;;  %v871_v28 = vpack.c.bf16 %v5223_v20, %v5221_v19  ;;  %4417 = vmatprep.subr.bf16.mxu1 %v4534_v37  ;;  %v823_v58 = vsel %vm729_vm0, %v5240_v35, 0.0  ;;  %v5320_v60 = vand.u32 127, %v477_v0  ;;  %v5334_v4 = vsub.s32 1, %v5044_v3 }
  0x72   : > { %4395 = vmatprep.mubr.msk.bf16.mxu0 %vm729_vm0, %v866_v34  ;;  %v5238_v34 = vmul.f32 %v695_v29, %v695_v29  ;;  %v5339_v5 = vsub.s32 2, %v5044_v3  ;;  %v5349_v12 = vsub.s32 3, %v5044_v3  ;;  %v5370_v8 = vsub.s32 5, %v5044_v3 }
  0x73   : > { %755 = vadd.xlane.f32.xlu0 %v754_v39  ;;  %vm2056_vm1 = vcmp.eq.s32.totalorder %v5044_v3, %v5320_v60 }
  0x74   : > { %v873_v36 = vpack.c.bf16 %v5240_v35, %v5238_v34  ;;  %4418 = vmatpush3.bf16.msra.mxu1 %v4534_v37  ;;  %v820_v59 = vsel %vm729_vm0, %v5238_v34, 0.0  ;;  %v5329_v62 = vsel %vm2056_vm1, 0.0, %v2058_v61 }
  0x75   : > { %v2067_v2 = vrot.slane %v5329_v62, %v5065_v11  ;;  %v2078_v0 = vrot.slane %v5329_v62, %v5334_v4  ;;  %v2100_v27 = vrot.slane %v5329_v62, %v5349_v12 }
  0x79   : > { %4396 = vmatmul.mubr.msk.bf16.gmra.mrb[16].mxu0 %vm729_vm0, %v867_v53  ;;  %v739_v53 = vsel %vm729_vm0, %v5097_v40, 0.0  ;;  %v748_v40 = vsel %vm729_vm0, %v5112_v48, 0.0  ;;  %v775_v48 = vsel %vm729_vm0, %v5160_v22, 0.0  ;;  %v790_v22 = vsel %vm729_vm0, %v5186_v46, 0.0 }
  0x7a   : > { %4399 = vmatprep.mubr.msk.bf16.mxu0 %vm729_vm0, %v868_v57  ;;  %740 = vadd.xlane.f32.xlu1 %v739_v53  ;;  %v811_v46 = vsel %vm729_vm0, %v5223_v20, 0.0  ;;  %v814_v57 = vsel %vm729_vm0, %v5227_v26, 0.0 }
  0x7b   : > { %749 = vadd.xlane.f32.xlu0 %v748_v40 }
  0x7e   : > { %746 = vadd.xlane.f32.xlu1 %v745_v55 }
  0x7f   : > { %761 = vadd.xlane.f32.xlu0 %v760_v43 }
  0x81   : > { %4400 = vmatmul.mubr.msk.bf16.gmra.mrb[20].mxu0 %vm729_vm0, %v869_v10  ;;  %v2089_v10 = vrot.slane %v5329_v62, %v5339_v5 }
  0x82   : > { %4403 = vmatprep.mubr.msk.bf16.mxu0 %vm729_vm0, %v870_v15  ;;  %758 = vadd.xlane.f32.xlu1 %v757_v30  ;;  %v5376_v30 = vsub.s32 6, %v5044_v3 }
  0x83   : > { %767 = vadd.xlane.f32.xlu0 %v766_v52 }
  0x86   : > { %752 = vadd.xlane.f32.xlu1 %v751_v31 }
  0x87   : > { %773 = vadd.xlane.f32.xlu0 %v772_v49 }
  0x89   : > { %4404 = vmatmul.mubr.msk.bf16.gmra.mrb[24].mxu0 %vm729_vm0, %v871_v28  ;;  %v5363_v28 = vsub.s32 4, %v5044_v3 }
  0x8a   : > { %4407 = vmatprep.mubr.msk.bf16.mxu0 %vm729_vm0, %v872_v33  ;;  %764 = vadd.xlane.f32.xlu1 %v763_v42 }
  0x8b   : > { %779 = vadd.xlane.f32.xlu0 %v778_v1  ;;  %v2111_v37 = vrot.slane %v5329_v62, %v5363_v28 }
  0x8e   : > { %770 = vadd.xlane.f32.xlu1 %v769_v51 }
  0x8f   : > { %785 = vadd.xlane.f32.xlu0 %v784_v7 }
  0x91   : > { %4408 = vmatmul.mubr.msk.bf16.gmra.mrb[28].mxu0 %vm729_vm0, %v873_v36 }
  0x92   : > { %776 = vadd.xlane.f32.xlu1 %v775_v48 }
  0x93   : > { %791 = vadd.xlane.f32.xlu0 %v790_v22  ;;  %v5388_v22 = vadd.s32 8, %v5044_v3 }
  0x95   : > { %vm2057_vm11 = vcmp.eq.s32.totalorder %v5388_v22, %v5320_v60 }
  0x96   : > { %782 = vadd.xlane.f32.xlu1 %v781_v63  ;;  %v2122_v63 = vrot.slane %v5329_v62, %v5370_v8 }
  0x97   : > { %797 = vadd.xlane.f32.xlu0 %v796_v25 }
  0x9a   : > { %788 = vadd.xlane.f32.xlu1 %v787_v6 }
  0x9b   : > { %803 = vadd.xlane.f32.xlu0 %v802_v41 }
  0x9e   : > { %794 = vadd.xlane.f32.xlu1 %v793_v21 }
  0x9f   : > { %809 = vadd.xlane.f32.xlu0 %v808_v47 }
  0xa2   : > { %800 = vadd.xlane.f32.xlu1 %v799_v24 }
  0xa3   : > { %815 = vadd.xlane.f32.xlu0 %v814_v57 }
  0xa6   : > { %806 = vadd.xlane.f32.xlu1 %v805_v38  ;;  %v5393_v38 = vsub.s32 7, %v5044_v3 }
  0xa7   : > { %821 = vadd.xlane.f32.xlu0 %v820_v59 }
  0xaa   : > { %812 = vadd.xlane.f32.xlu1 %v811_v46  ;;  %v2133_v46 = vrot.slane %v5329_v62, %v5376_v30 }
  0xae   : > { %818 = vadd.xlane.f32.xlu1 %v817_v56 }
  0xb2   : > { %824 = vadd.xlane.f32.xlu1 %v823_v58 }
  0xbd   : > { %2069 = vbcast.lane.b32.xlu0 %v2067_v2, 256 }
  0xc1   : > { %2091 = vbcast.lane.b32.xlu0 %v2089_v10, 256 }
  0xc3   : > { %2073 = vbcast.lane.b32.xlu1 %v2067_v2, 264  ;;  %v2059_v2 = vld [vmem:[%s403_s18 + $0x8] sm:$0xff]  ;;  %s5524_s18 = scalar_lea.vmem [#allocation7], %s5033_s15 }
  0xc4   : > { %s4101_s30 = sshll.u32 %s5524_s18, 4  ;;  %s6395_s30 = int_to_ptr.vmem [resolvable:$true] %s4101_s30 }
  0xc5   : > { %2102 = vbcast.lane.b32.xlu0 %v2100_v27, 256  ;;  %s4729_s28 = scalar_lea.vmem %s6395_s30, 256 }
  0xc6   : > { %p4730_p8 = scmp.ne.s32.totalorder %s6395_s30, %s4729_s28 }
  0xc7   : > { %2080 = vbcast.lane.b32.xlu1 %v2078_v0, 256 }
  0xc8   : > { %p4731_p0 = pnand %p4730_p8, %p6633_p11 }
  0xc9   : > { %2113 = vbcast.lane.b32.xlu0 %v2111_v37, 256 }
  0xca   : > { %p4732_p6 = pneg %p4731_p0 }
  0xcb   : > { %2084 = vbcast.lane.b32.xlu1 %v2078_v0, 264 }
  0xcd   : > { %2124 = vbcast.lane.b32.xlu0 %v2122_v63, 256 }
  0xcf   : > { %2095 = vbcast.lane.b32.xlu1 %v2089_v10, 264 }
  0xd1   : > { %2135 = vbcast.lane.b32.xlu0 %v2133_v46, 256 }
  0xd3   : > { %2106 = vbcast.lane.b32.xlu1 %v2100_v27, 264 }
  0xd7   : > { %2117 = vbcast.lane.b32.xlu1 %v2111_v37, 264 }
  0xdb   : > { %2128 = vbcast.lane.b32.xlu1 %v2122_v63, 264 }
  0xdf   : > { %2139 = vbcast.lane.b32.xlu1 %v2133_v46, 264 }
 0x12c   : > { %v4381_v13 = vpop.f32.mrb[0].mxu0 }
 0x12d   : > { %v1104_v15 = vmul.f32 %v4381_v13, %v5344_v9  ;;  %v968_v17 = vpop.f32.mrb[1].mxu0 }
 0x12e   : > { %v1102_v18 = vmul.f32 %v5344_v9, %v968_v17  ;;  %v4382_v19 = vpop.f32.mrb[2].mxu0 }
 0x12f   : > { %v1143_v20 = vadd.f32 %v5354_v14, %v1104_v15  ;;  %v1105_v23 = vmul.f32 %v4382_v19, %v5344_v9  ;;  %v971_v26 = vpop.f32.mrb[3].mxu0 }
 0x130   : > { %v1141_v29 = vadd.f32 %v5354_v14, %v1102_v18  ;;  %v1103_v32 = vmul.f32 %v5344_v9, %v971_v26  ;;  %v2144_v26 = vrot.slane %v5329_v62, %v5393_v38 }
 0x131   : > { %v1207_v33 = vmul.f32 0.01, %v1143_v20  ;;  %v1144_v34 = vadd.f32 %v5354_v14, %v1105_v23  ;;  %vm1175_vm2 = vcmp.gt.f32.partialorder %v1143_v20, 0.0 }
 0x132   : > { %v1142_v35 = vadd.f32 %v5354_v14, %v1103_v32  ;;  %v1205_v36 = vmul.f32 0.01, %v1141_v29  ;;  %vm1173_vm4 = vcmp.gt.f32.partialorder %v1141_v29, 0.0  ;;  %v5412_v32 = vsel %vm2057_vm11, 0.0, %v2059_v2  ;;  %2146 = vbcast.lane.b32.xlu0 %v2144_v26, 256  ;;  %2150 = vbcast.lane.b32.xlu1 %v2144_v26, 264 }
 0x133   : > { %vm1176_vm3 = vcmp.gt.f32.partialorder %v1144_v34, 0.0  ;;  %v1208_v16 = vmul.f32 0.01, %v1144_v34  ;;  %v1239_v50 = vsel %vm1175_vm2, %v1143_v20, %v1207_v33  ;;  %v2155_v37 = vrot.slane %v5412_v32, %v5065_v11 }
 0x134   : > { %v4385_v44 = vpop.f32.mrb[4].mxu0  ;;  %vm1174_vm5 = vcmp.gt.f32.partialorder %v1142_v35, 0.0  ;;  %v1206_v45 = vmul.f32 0.01, %v1142_v35  ;;  %v1237_v40 = vsel %vm1173_vm4, %v1141_v29, %v1205_v36  ;;  %v2166_v63 = vrot.slane %v5412_v32, %v5334_v4 }
 0x135   : > { %v1240_v53 = vsel %vm1176_vm3, %v1144_v34, %v1208_v16  ;;  %v1108_v54 = vmul.f32 %v4385_v44, %v5344_v9  ;;  %v984_v55 = vpop.f32.mrb[5].mxu0  ;;  %v2177_v46 = vrot.slane %v5412_v32, %v5339_v5 }
 0x136   : > { %v1106_v39 = vmul.f32 %v5344_v9, %v984_v55  ;;  %v4386_v31 = vpop.f32.mrb[6].mxu0  ;;  %v1238_v42 = vsel %vm1174_vm5, %v1142_v35, %v1206_v45  ;;  %v1270_v43 = vpack.c.bf16 %v1240_v53, %v1239_v50  ;;  %2157 = vbcast.lane.b32.xlu0 %v2155_v37, 256  ;;  %2161 = vbcast.lane.b32.xlu1 %v2155_v37, 264 }
 0x137   : > { %v1147_v51 = vadd.f32 %v5354_v14, %v1108_v54  ;;  %v1109_v52 = vmul.f32 %v4386_v31, %v5344_v9  ;;  %v987_v48 = vpop.f32.mrb[7].mxu0  ;;  %v1269_v49 = vpack.c.bf16 %v1238_v42, %v1237_v40 }
 0x138   : > { %v1145_v1 = vadd.f32 %v5354_v14, %v1106_v39  ;;  %v1107_v6 = vmul.f32 %v5344_v9, %v987_v48 }
 0x139   : > { %v1211_v7 = vmul.f32 0.01, %v1147_v51  ;;  %v1148_v21 = vadd.f32 %v5354_v14, %v1109_v52  ;;  %4419 = vmatprep.mubr.msk.bf16.mxu1 %vm1309_vm6, %v1269_v49  ;;  %vm1179_vm7 = vcmp.gt.f32.partialorder %v1147_v51, 0.0 }
 0x13a   : > { %v1209_v24 = vmul.f32 0.01, %v1145_v1  ;;  %v1146_v25 = vadd.f32 %v5354_v14, %v1107_v6  ;;  %4420 = vmatmul.mubr.msk.bf16.vlgmr.msra.gmra.mrb[0].mxu1 %vm1309_vm6, %v1270_v43  ;;  %vm1177_vm8 = vcmp.gt.f32.partialorder %v1145_v1, 0.0  ;;  %2168 = vbcast.lane.b32.xlu0 %v2166_v63, 256 }
 0x13b   : > { %vm1180_vm9 = vcmp.gt.f32.partialorder %v1148_v21, 0.0  ;;  %v1212_v41 = vmul.f32 0.01, %v1148_v21  ;;  %v1243_v57 = vsel %vm1179_vm7, %v1147_v51, %v1211_v7  ;;  %2172 = vbcast.lane.b32.xlu1 %v2166_v63, 264 }
 0x13c   : > { %vm1178_vm10 = vcmp.gt.f32.partialorder %v1146_v25, 0.0  ;;  %v1210_v47 = vmul.f32 0.01, %v1146_v25  ;;  %v4389_v56 = vpop.f32.mrb[8].mxu0  ;;  %v1241_v0 = vsel %vm1177_vm8, %v1145_v1, %v1209_v24 }
 0x13d   : > { %v1244_v58 = vsel %vm1180_vm9, %v1148_v21, %v1212_v41  ;;  %v1112_v59 = vmul.f32 %v4389_v56, %v5344_v9  ;;  %v1000_v61 = vpop.f32.mrb[9].mxu0 }
 0x13e   : > { %v1242_v10 = vsel %vm1178_vm10, %v1146_v25, %v1210_v47  ;;  %v1110_v13 = vmul.f32 %v5344_v9, %v1000_v61  ;;  %v4390_v15 = vpop.f32.mrb[10].mxu0  ;;  %v1272_v17 = vpack.c.bf16 %v1244_v58, %v1243_v57  ;;  %2179 = vbcast.lane.b32.xlu0 %v2177_v46, 256 }
 0x13f   : > { %v1151_v18 = vadd.f32 %v5354_v14, %v1112_v59  ;;  %v1113_v19 = vmul.f32 %v4390_v15, %v5344_v9  ;;  %v1003_v20 = vpop.f32.mrb[11].mxu0  ;;  %v1271_v23 = vpack.c.bf16 %v1242_v10, %v1241_v0  ;;  %2183 = vbcast.lane.b32.xlu1 %v2177_v46, 264 }
 0x140   : > { %v1149_v27 = vadd.f32 %v5354_v14, %v1110_v13  ;;  %v1111_v29 = vmul.f32 %v5344_v9, %v1003_v20 }
 0x141   : > { %v1215_v33 = vmul.f32 0.01, %v1151_v18  ;;  %v1152_v34 = vadd.f32 %v5354_v14, %v1113_v19  ;;  %4423 = vmatprep.mubr.msk.bf16.mxu1 %vm1309_vm6, %v1271_v23  ;;  %vm1183_vm12 = vcmp.gt.f32.partialorder %v1151_v18, 0.0  ;;  %v2188_v23 = vrot.slane %v5412_v32, %v5349_v12 }
 0x142   : > { %v1213_v35 = vmul.f32 0.01, %v1149_v27  ;;  %v1150_v36 = vadd.f32 %v5354_v14, %v1111_v29  ;;  %4424 = vmatmul.mubr.msk.bf16.gmra.mrb[4].mxu1 %vm1309_vm6, %v1272_v17  ;;  %vm1181_vm13 = vcmp.gt.f32.partialorder %v1149_v27, 0.0 }
 0x143   : > { %vm1184_vm14 = vcmp.gt.f32.partialorder %v1152_v34, 0.0  ;;  %v1216_v16 = vmul.f32 0.01, %v1152_v34  ;;  %v1247_v50 = vsel %vm1183_vm12, %v1151_v18, %v1215_v33  ;;  %2190 = vbcast.lane.b32.xlu0 %v2188_v23, 256  ;;  %2194 = vbcast.lane.b32.xlu1 %v2188_v23, 264 }
 0x144   : > { %vm1182_vm15 = vcmp.gt.f32.partialorder %v1150_v36, 0.0  ;;  %v1214_v44 = vmul.f32 0.01, %v1150_v36  ;;  %v4393_v45 = vpop.f32.mrb[12].mxu0  ;;  %v1245_v39 = vsel %vm1181_vm13, %v1149_v27, %v1213_v35 }
 0x145   : > { %v1248_v53 = vsel %vm1184_vm14, %v1152_v34, %v1216_v16  ;;  %v1116_v54 = vmul.f32 %v4393_v45, %v5344_v9  ;;  %v1016_v55 = vpop.f32.mrb[13].mxu0  ;;  %v2199_v16 = vrot.slane %v5412_v32, %v5363_v28 }
 0x146   : > { %v1246_v31 = vsel %vm1182_vm15, %v1150_v36, %v1214_v44  ;;  %v1114_v40 = vmul.f32 %v5344_v9, %v1016_v55  ;;  %v4394_v42 = vpop.f32.mrb[14].mxu0  ;;  %v1274_v43 = vpack.c.bf16 %v1248_v53, %v1247_v50 }
 0x147   : > { %v1155_v51 = vadd.f32 %v5354_v14, %v1116_v54  ;;  %v1117_v52 = vmul.f32 %v4394_v42, %v5344_v9  ;;  %v1019_v48 = vpop.f32.mrb[15].mxu0  ;;  %v1273_v49 = vpack.c.bf16 %v1246_v31, %v1245_v39  ;;  %2201 = vbcast.lane.b32.xlu0 %v2199_v16, 256  ;;  %2205 = vbcast.lane.b32.xlu1 %v2199_v16, 264 }
 0x148   : > { %v1153_v1 = vadd.f32 %v5354_v14, %v1114_v40  ;;  %v1115_v6 = vmul.f32 %v5344_v9, %v1019_v48 }
 0x149   : > { %v1219_v7 = vmul.f32 0.01, %v1155_v51  ;;  %v1156_v21 = vadd.f32 %v5354_v14, %v1117_v52  ;;  %4427 = vmatprep.mubr.msk.bf16.mxu1 %vm1309_vm6, %v1273_v49  ;;  %vm1187_vm2 = vcmp.gt.f32.partialorder %v1155_v51, 0.0  ;;  %v2210_v49 = vrot.slane %v5412_v32, %v5370_v8 }
 0x14a   : > { %v1217_v24 = vmul.f32 0.01, %v1153_v1  ;;  %v1154_v25 = vadd.f32 %v5354_v14, %v1115_v6  ;;  %4428 = vmatmul.mubr.msk.bf16.gmra.mrb[8].mxu1 %vm1309_vm6, %v1274_v43  ;;  %vm1185_vm3 = vcmp.gt.f32.partialorder %v1153_v1, 0.0 }
 0x14b   : > { %vm1188_vm4 = vcmp.gt.f32.partialorder %v1156_v21, 0.0  ;;  %v1220_v41 = vmul.f32 0.01, %v1156_v21  ;;  %v1251_v57 = vsel %vm1187_vm2, %v1155_v51, %v1219_v7  ;;  %2212 = vbcast.lane.b32.xlu0 %v2210_v49, 256  ;;  %2216 = vbcast.lane.b32.xlu1 %v2210_v49, 264 }
 0x14c   : > { %vm1186_vm5 = vcmp.gt.f32.partialorder %v1154_v25, 0.0  ;;  %v1218_v47 = vmul.f32 0.01, %v1154_v25  ;;  %v4397_v56 = vpop.f32.mrb[16].mxu0  ;;  %v1249_v2 = vsel %vm1185_vm3, %v1153_v1, %v1217_v24 }
 0x14d   : > { %v1252_v58 = vsel %vm1188_vm4, %v1156_v21, %v1220_v41  ;;  %v1120_v59 = vmul.f32 %v4397_v56, %v5344_v9  ;;  %v1032_v61 = vpop.f32.mrb[17].mxu0  ;;  %v2221_v41 = vrot.slane %v5412_v32, %v5376_v30 }
 0x14e   : > { %v1250_v0 = vsel %vm1186_vm5, %v1154_v25, %v1218_v47  ;;  %v1118_v10 = vmul.f32 %v5344_v9, %v1032_v61  ;;  %v4398_v13 = vpop.f32.mrb[18].mxu0  ;;  %v1276_v15 = vpack.c.bf16 %v1252_v58, %v1251_v57 }
 0x14f   : > { %v1159_v17 = vadd.f32 %v5354_v14, %v1120_v59  ;;  %v1121_v18 = vmul.f32 %v4398_v13, %v5344_v9  ;;  %v1035_v19 = vpop.f32.mrb[19].mxu0  ;;  %v1275_v20 = vpack.c.bf16 %v1250_v0, %v1249_v2  ;;  %2223 = vbcast.lane.b32.xlu0 %v2221_v41, 256  ;;  %2227 = vbcast.lane.b32.xlu1 %v2221_v41, 264 }
 0x150   : > { %v1157_v26 = vadd.f32 %v5354_v14, %v1118_v10  ;;  %v1119_v27 = vmul.f32 %v5344_v9, %v1035_v19 }
 0x151   : > { %v1223_v29 = vmul.f32 0.01, %v1159_v17  ;;  %v1160_v33 = vadd.f32 %v5354_v14, %v1121_v18  ;;  %4431 = vmatprep.mubr.msk.bf16.mxu1 %vm1309_vm6, %v1275_v20  ;;  %vm1191_vm7 = vcmp.gt.f32.partialorder %v1159_v17, 0.0 }
 0x152   : > { %v1221_v34 = vmul.f32 0.01, %v1157_v26  ;;  %v1158_v35 = vadd.f32 %v5354_v14, %v1119_v27  ;;  %4432 = vmatmul.mubr.msk.bf16.gmra.mrb[12].mxu1 %vm1309_vm6, %v1276_v15  ;;  %vm1189_vm8 = vcmp.gt.f32.partialorder %v1157_v26, 0.0 }
 0x153   : > { %vm1192_vm9 = vcmp.gt.f32.partialorder %v1160_v33, 0.0  ;;  %v1224_v36 = vmul.f32 0.01, %v1160_v33  ;;  %v1255_v45 = vsel %vm1191_vm7, %v1159_v17, %v1223_v29 }
 0x154   : > { %vm1190_vm10 = vcmp.gt.f32.partialorder %v1158_v35, 0.0  ;;  %v1222_v37 = vmul.f32 0.01, %v1158_v35  ;;  %v4401_v44 = vpop.f32.mrb[20].mxu0  ;;  %v1253_v55 = vsel %vm1189_vm8, %v1157_v26, %v1221_v34 }
 0x155   : > { %v1256_v50 = vsel %vm1192_vm9, %v1160_v33, %v1224_v36  ;;  %v1124_v53 = vmul.f32 %v4401_v44, %v5344_v9  ;;  %v1048_v54 = vpop.f32.mrb[21].mxu0 }
 0x156   : > { %v1254_v39 = vsel %vm1190_vm10, %v1158_v35, %v1222_v37  ;;  %v1122_v31 = vmul.f32 %v5344_v9, %v1048_v54  ;;  %v4402_v40 = vpop.f32.mrb[22].mxu0  ;;  %v1278_v42 = vpack.c.bf16 %v1256_v50, %v1255_v45  ;;  %v2468_v35 = vadd.s32 4294967288, %v5320_v60  ;;  %v732_v37 = vpop.xlane.xlu0 %731 }
 0x157   : > { %v1163_v43 = vadd.f32 %v5354_v14, %v1124_v53  ;;  %v1125_v51 = vmul.f32 %v4402_v40, %v5344_v9  ;;  %v1051_v52 = vpop.f32.mrb[23].mxu0  ;;  %v1277_v48 = vpack.c.bf16 %v1254_v39, %v1253_v55  ;;  %v5476_v54 = vsub.s32 %v5320_v60, %v5044_v3  ;;  %v738_v55 = vpop.xlane.xlu1 %737 }
 0x158   : > { %v1161_v63 = vadd.f32 %v5354_v14, %v1122_v31  ;;  %v1123_v1 = vmul.f32 %v5344_v9, %v1051_v52 }
 0x159   : > { %v1227_v6 = vmul.f32 0.01, %v1163_v43  ;;  %v1164_v7 = vadd.f32 %v5354_v14, %v1125_v51  ;;  %4435 = vmatprep.mubr.msk.bf16.mxu1 %vm1309_vm6, %v1277_v48  ;;  %vm1195_vm12 = vcmp.gt.f32.partialorder %v1163_v43, 0.0  ;;  %6595 = vst [vmem:[#allocation14_spill] sm:$0xff] %v5476_v54 }
 0x15a   : > { %v1225_v21 = vmul.f32 0.01, %v1161_v63  ;;  %v1162_v24 = vadd.f32 %v5354_v14, %v1123_v1  ;;  %4436 = vmatmul.mubr.msk.bf16.gmra.mrb[16].mxu1 %vm1309_vm6, %v1278_v42  ;;  %vm1193_vm13 = vcmp.gt.f32.partialorder %v1161_v63, 0.0 }
 0x15b   : > { %vm1196_vm14 = vcmp.gt.f32.partialorder %v1164_v7, 0.0  ;;  %v1228_v25 = vmul.f32 0.01, %v1164_v7  ;;  %v1259_v56 = vsel %vm1195_vm12, %v1163_v43, %v1227_v6  ;;  %vm2473_vm12 = vcmask 130112  }
 0x15c   : > { %vm1194_vm15 = vcmp.gt.f32.partialorder %v1162_v24, 0.0  ;;  %v1226_v46 = vmul.f32 0.01, %v1162_v24  ;;  %v4405_v47 = vpop.f32.mrb[24].mxu0  ;;  %v1257_v61 = vsel %vm1193_vm13, %v1161_v63, %v1225_v21  ;;  %v5482_v63 = vsub.s32 %v2468_v35, %v5044_v3 }
 0x15d   : > { %v1260_v57 = vsel %vm1196_vm14, %v1164_v7, %v1228_v25  ;;  %v1128_v58 = vmul.f32 %v4405_v47, %v5344_v9  ;;  %v1064_v59 = vpop.f32.mrb[25].mxu0  ;;  %v826_v7 = vsub.f32 0.0, %v732_v37  ;;  %v828_v21 = vsub.f32 0.0, %v738_v55  ;;  %v741_v47 = vpop.xlane.xlu1 %740 }
 0x15e   : > { %v1258_v2 = vsel %vm1194_vm15, %v1162_v24, %v1226_v46  ;;  %v1126_v0 = vmul.f32 %v5344_v9, %v1064_v59  ;;  %v4406_v10 = vpop.f32.mrb[26].mxu0  ;;  %v1280_v13 = vpack.c.bf16 %v1260_v57, %v1259_v56  ;;  %6596 = vst [vmem:[#allocation15_spill] sm:$0xff] %v5482_v63  ;;  %v735_v24 = vpop.xlane.xlu0 %734  ;;  %vm2610_vm13 = vcmask 1041409  }
 0x15f   : > { %v1167_v15 = vadd.f32 %v5354_v14, %v1128_v58  ;;  %v1129_v17 = vmul.f32 %v4406_v10, %v5344_v9  ;;  %v1067_v18 = vpop.f32.mrb[27].mxu0  ;;  %v1279_v19 = vpack.c.bf16 %v1258_v2, %v1257_v61  ;;  %v827_v46 = vsub.f32 0.0, %v735_v24 }
 0x160   : > { %v1165_v20 = vadd.f32 %v5354_v14, %v1126_v0  ;;  %v1127_v23 = vmul.f32 %v5344_v9, %v1067_v18  ;;  %v829_v58 = vsub.f32 0.0, %v741_v47  ;;  %v2681_v0 = vrot.slane %v826_v7, %v5476_v54 }
 0x161   : > { %v1231_v26 = vmul.f32 0.01, %v1167_v15  ;;  %v1168_v27 = vadd.f32 %v5354_v14, %v1129_v17  ;;  %4439 = vmatprep.mubr.msk.bf16.mxu1 %vm1309_vm6, %v1279_v19  ;;  %vm1199_vm2 = vcmp.gt.f32.partialorder %v1167_v15, 0.0  ;;  %v2685_v17 = vrot.slane %v827_v46, %v5482_v63  ;;  %v747_v19 = vpop.xlane.xlu1 %746 }
 0x162   : > { %v1229_v29 = vmul.f32 0.01, %v1165_v20  ;;  %v1166_v33 = vadd.f32 %v5354_v14, %v1127_v23  ;;  %4440 = vmatmul.mubr.msk.bf16.gmra.mrb[20].mxu1 %vm1309_vm6, %v1280_v13  ;;  %vm1197_vm3 = vcmp.gt.f32.partialorder %v1165_v20, 0.0  ;;  %v744_v10 = vpop.xlane.xlu0 %743  ;;  %v2694_v23 = vrot.slane %v829_v58, %v5482_v63 }
 0x163   : > { %vm1200_vm4 = vcmp.gt.f32.partialorder %v1168_v27, 0.0  ;;  %v1232_v34 = vmul.f32 0.01, %v1168_v27  ;;  %v1263_v44 = vsel %vm1199_vm2, %v1167_v15, %v1231_v26  ;;  %v2690_v15 = vrot.slane %v828_v21, %v5476_v54 }
 0x164   : > { %vm1198_vm5 = vcmp.gt.f32.partialorder %v1166_v33, 0.0  ;;  %v1230_v36 = vmul.f32 0.01, %v1166_v33  ;;  %v4409_v16 = vpop.f32.mrb[28].mxu0  ;;  %v1261_v39 = vsel %vm1197_vm3, %v1165_v20, %v1229_v29  ;;  %v830_v18 = vsub.f32 0.0, %v744_v10 }
 0x165   : > { %v1264_v45 = vsel %vm1200_vm4, %v1168_v27, %v1232_v34  ;;  %v1132_v50 = vmul.f32 %v4409_v16, %v5344_v9  ;;  %v1080_v53 = vpop.f32.mrb[29].mxu0  ;;  %v831_v26 = vsub.f32 0.0, %v747_v19  ;;  %v759_v35 = vpop.xlane.xlu1 %758  ;;  %v2695_v16 = vsel %vm2473_vm12, %v2694_v23, %v2690_v15 }
 0x166   : > { %v1262_v31 = vsel %vm1198_vm5, %v1166_v33, %v1230_v36  ;;  %v1130_v40 = vmul.f32 %v5344_v9, %v1080_v53  ;;  %v4410_v42 = vpop.f32.mrb[30].mxu0  ;;  %v1282_v43 = vpack.c.bf16 %v1264_v45, %v1263_v44  ;;  %v756_v29 = vpop.xlane.xlu0 %755  ;;  %v2699_v33 = vrot.slane %v830_v18, %v5476_v54 }
 0x167   : > { %v1171_v51 = vadd.f32 %v5354_v14, %v1132_v50  ;;  %v1133_v52 = vmul.f32 %v4410_v42, %v5344_v9  ;;  %v1083_v48 = vpop.f32.mrb[31].mxu0  ;;  %v1281_v49 = vpack.c.bf16 %v1262_v31, %v1261_v39  ;;  %v2703_v34 = vrot.slane %v831_v26, %v5482_v63 }
 0x168   : > { %v1169_v1 = vadd.f32 %v5354_v14, %v1130_v40  ;;  %v1131_v6 = vmul.f32 %v5344_v9, %v1083_v48  ;;  %v2686_v36 = vsel %vm2473_vm12, %v2685_v17, %v2681_v0  ;;  %v835_v37 = vsub.f32 0.0, %v759_v35 }
 0x169   : > { %vm1203_vm7 = vcmp.gt.f32.partialorder %v1171_v51, 0.0  ;;  %v1235_v25 = vmul.f32 0.01, %v1171_v51  ;;  %v1172_v41 = vadd.f32 %v5354_v14, %v1133_v52  ;;  %4443 = vmatprep.mubr.msk.bf16.mxu1 %vm1309_vm6, %v1281_v49  ;;  %v834_v44 = vsub.f32 0.0, %v756_v29  ;;  %v753_v55 = vpop.xlane.xlu1 %752 }
 0x16a   : > { %vm1201_vm8 = vcmp.gt.f32.partialorder %v1169_v1, 0.0  ;;  %v1233_v56 = vmul.f32 0.01, %v1169_v1  ;;  %v1170_v57 = vadd.f32 %v5354_v14, %v1131_v6  ;;  %4444 = vmatmul.mubr.msk.bf16.gmra.mrb[24].mxu1 %vm1309_vm6, %v1282_v43  ;;  %v750_v45 = vpop.xlane.xlu0 %749  ;;  %v2822_v50 = vsel %vm2610_vm13, %v2695_v16, %v2686_v36 }
 0x16b   : > { %v1267_v59 = vsel %vm1203_vm7, %v1171_v51, %v1235_v25  ;;  %vm1204_vm9 = vcmp.gt.f32.partialorder %v1172_v41, 0.0  ;;  %v1236_v9 = vmul.f32 0.01, %v1172_v41  ;;  %vm2612_vm14 = vcmask 1042434  }
 0x16c   : > { %v1265_v61 = vsel %vm1201_vm8, %v1169_v1, %v1233_v56  ;;  %vm1202_vm10 = vcmp.gt.f32.partialorder %v1170_v57, 0.0  ;;  %v1234_v2 = vmul.f32 0.01, %v1170_v57  ;;  %v2704_v53 = vsel %vm2473_vm12, %v2703_v34, %v2699_v33 }
 0x16d   : > { %v1268_v13 = vsel %vm1204_vm9, %v1172_v41, %v1236_v9  ;;  %v832_v39 = vsub.f32 0.0, %v750_v45  ;;  %v833_v31 = vsub.f32 0.0, %v753_v55  ;;  %v2721_v40 = vrot.slane %v835_v37, %v5482_v63  ;;  %v765_v49 = vpop.xlane.xlu1 %764 }
 0x16e   : > { %v1266_v14 = vsel %vm1202_vm10, %v1170_v57, %v1234_v2  ;;  %v1284_v20 = vpack.c.bf16 %v1268_v13, %v1267_v59  ;;  %v2717_v42 = vrot.slane %v834_v44, %v5476_v54  ;;  %v2823_v51 = vsel %vm2612_vm14, %v2704_v53, %v2822_v50  ;;  %v762_v48 = vpop.xlane.xlu0 %761 }
 0x16f   : > { %v1283_v27 = vpack.c.bf16 %v1266_v14, %v1265_v61  ;;  %v2708_v43 = vrot.slane %v832_v39, %v5476_v54  ;;  %v2712_v52 = vrot.slane %v833_v31, %v5482_v63  ;;  %v836_v1 = vsub.f32 0.0, %v762_v48 }
 0x170   : > { %v837_v7 = vsub.f32 0.0, %v765_v49  ;;  %v2722_v21 = vsel %vm2473_vm12, %v2721_v40, %v2717_v42  ;;  %vm2616_vm15 = vcmask 1044484   ;;  %vm2618_vm2 = vcmask 1045509  }
 0x171   : > { %4447 = vmatprep.mubr.msk.bf16.mxu1 %vm1309_vm6, %v1283_v27  ;;  %v2713_v6 = vsel %vm2473_vm12, %v2712_v52, %v2708_v43  ;;  %v2726_v25 = vrot.slane %v836_v1, %v5476_v54  ;;  %v771_v47 = vpop.xlane.xlu1 %770  ;;  %vm2620_vm3 = vcmask 1046534   ;;  %vm2622_vm4 = vcmask 1047559  }
 0x172   : > { %4448 = vmatmul.mubr.msk.bf16.gmra.mrb[28].mxu1 %vm1309_vm6, %v1284_v20  ;;  %vm2614_vm6 = vcmask 1043459   ;;  %v2730_v41 = vrot.slane %v837_v7, %v5482_v63  ;;  %v768_v46 = vpop.xlane.xlu0 %767  ;;  %v839_v59 = vsub.f32 0.0, %v771_v47  ;;  %vm2633_vm5 = vcmask 130048  }
 0x173   : > { %v2824_v24 = vsel %vm2614_vm6, %v2713_v6, %v2823_v51  ;;  %v838_v56 = vsub.f32 0.0, %v768_v46  ;;  %v5779_v3 = vstv %s1828_s23  ;;  %s4733_s23 = sshll.u32 %s4851_s16, 4  ;;  %s4734_s23 = int_to_ptr.vmem [resolvable:$false] %s4733_s23 }
 0x174   : > { %v2825_v57 = vsel %vm2616_vm15, %v2722_v21, %v2824_v24  ;;  %v2731_v58 = vsel %vm2473_vm12, %v2730_v41, %v2726_v25  ;;  %v2739_v61 = vrot.slane %v839_v59, %v5482_v63  ;;  %s4735_s0 = scalar_lea.vmem %s4734_s23, 512  ;;  %p4736_p13 = scmp.lt.s32.totalorder %s6395_s30, %s4734_s23 }
 0x175   : > { %v2735_v9 = vrot.slane %v838_v56, %v5476_v54  ;;  %v2826_v0 = vsel %vm2618_vm2, %v2731_v58, %v2825_v57  ;;  %v777_v10 = vpop.xlane.xlu1 %776  ;;  %p4737_p2 = scmp.lt.s32.totalorder %s4735_s0, %s4729_s28 }
 0x176   : > { %v774_v2 = vpop.xlane.xlu0 %773  ;;  %v841_v17 = vsub.f32 0.0, %v777_v10 }
 0x177   : > { %v840_v13 = vsub.f32 0.0, %v774_v2  ;;  %v2740_v15 = vsel %vm2473_vm12, %v2739_v61, %v2735_v9  ;;  %p4738_p5 = por %p4737_p2, %p4736_p13 }
 0x178   : > { %v2827_v19 = vsel %vm2620_vm3, %v2740_v15, %v2826_v0  ;;  %v2748_v14 = vrot.slane %v841_v17, %v5482_v63 }
 0x179   : > { %v2744_v18 = vrot.slane %v840_v13, %v5476_v54  ;;  %v783_v23 = vpop.xlane.xlu1 %782  ;;  %p4739_p4 = pnand %p4738_p5, %p4732_p6 }
 0x17a   : > { %v780_v20 = vpop.xlane.xlu0 %779  ;;  %v843_v34 = vsub.f32 0.0, %v783_v23 }
 0x17b   : > { %v2749_v26 = vsel %vm2473_vm12, %v2748_v14, %v2744_v18  ;;  %v842_v35 = vsub.f32 0.0, %v780_v20 }
 0x17c   : > { %v2828_v27 = vsel %vm2622_vm4, %v2749_v26, %v2827_v19  ;;  %v2757_v53 = vrot.slane %v843_v34, %v5482_v63 }
 0x17d   : > { %2838 = vst.msk [vmem:[%s5524_s18] sm:$0xff] %vm2633_vm5, %v2828_v27  ;;  %v789_v33 = vpop.xlane.xlu1 %788  ;;  %v2753_v55 = vrot.slane %v842_v35, %v5476_v54 }
 0x17e   : > { %v786_v29 = vpop.xlane.xlu0 %785  ;;  %v845_v36 = vsub.f32 0.0, %v789_v33 }
 0x17f   : > { %v844_v16 = vsub.f32 0.0, %v786_v29  ;;  %v2758_v52 = vsel %vm2473_vm12, %v2757_v53, %v2753_v55 }
 0x180   : > { %v2766_v39 = vrot.slane %v845_v36, %v5482_v63 }
 0x181   : > { %v795_v44 = vpop.xlane.xlu1 %794  ;;  %v2762_v31 = vrot.slane %v844_v16, %v5476_v54 }
 0x182   : > { %v792_v37 = vpop.xlane.xlu0 %791  ;;  %v847_v45 = vsub.f32 0.0, %v795_v44 }
 0x183   : > { %v846_v50 = vsub.f32 0.0, %v792_v37  ;;  %v2767_v48 = vsel %vm2473_vm12, %v2766_v39, %v2762_v31  ;;  %v5564_v39 = vld [vmem:[%s6559_s6] ss:$0 sm:$0xff] }
 0x184   : > { %v2775_v43 = vrot.slane %v847_v45, %v5482_v63  ;;  %v2829_v24 = vsel %vm2610_vm13, %v2767_v48, %v2758_v52 }
 0x185   : > { %v801_v42 = vpop.xlane.xlu1 %800  ;;  %v2771_v51 = vrot.slane %v846_v50, %v5476_v54 }
 0x186   : > { %v798_v40 = vpop.xlane.xlu0 %797  ;;  %v849_v1 = vsub.f32 0.0, %v801_v42 }
 0x187   : > { %v848_v6 = vsub.f32 0.0, %v798_v40  ;;  %v2776_v25 = vsel %vm2473_vm12, %v2775_v43, %v2771_v51  ;;  %v5569_v40 = vld [vmem:[%s6560_s7] ss:$0 sm:$0xff] }
 0x188   : > { %v2784_v46 = vrot.slane %v849_v1, %v5482_v63  ;;  %v2830_v59 = vsel %vm2612_vm14, %v2776_v25, %v2829_v24  ;;  %v5581_v25 = vld [vmem:[%s6561_s8] ss:$0 sm:$0xff] }
 0x189   : > { %v807_v7 = vpop.xlane.xlu1 %806  ;;  %v2780_v47 = vrot.slane %v848_v6, %v5476_v54 }
 0x18a   : > { %v804_v49 = vpop.xlane.xlu0 %803  ;;  %v851_v41 = vsub.f32 0.0, %v807_v7 }
 0x18b   : > { %v850_v21 = vsub.f32 0.0, %v804_v49  ;;  %v2785_v9 = vsel %vm2473_vm12, %v2784_v46, %v2780_v47 }
 0x18c   : > { %v2793_v56 = vrot.slane %v851_v41, %v5482_v63  ;;  %v2831_v2 = vsel %vm2614_vm6, %v2785_v9, %v2830_v59 }
 0x18d   : > { %v2789_v57 = vrot.slane %v850_v21, %v5476_v54  ;;  %v813_v61 = vpop.xlane.xlu1 %812 }
 0x18e   : > { %v810_v58 = vpop.xlane.xlu0 %809  ;;  %v853_v13 = vsub.f32 0.0, %v813_v61 }
 0x18f   : > { %v2794_v0 = vsel %vm2473_vm12, %v2793_v56, %v2789_v57  ;;  %v852_v15 = vsub.f32 0.0, %v810_v58 }
 0x190   : > { %v2832_v14 = vsel %vm2616_vm15, %v2794_v0, %v2831_v2  ;;  %v2802_v20 = vrot.slane %v853_v13, %v5482_v63 }
 0x191   : > { %v819_v17 = vpop.xlane.xlu1 %818  ;;  %v2798_v23 = vrot.slane %v852_v15, %v5476_v54 }
 0x192   : > { %v816_v10 = vpop.xlane.xlu0 %815  ;;  %v855_v19 = vsub.f32 0.0, %v819_v17 }
 0x193   : > { %v854_v18 = vsub.f32 0.0, %v816_v10  ;;  %v2803_v33 = vsel %vm2473_vm12, %v2802_v20, %v2798_v23 }
 0x194   : > { %v2811_v27 = vrot.slane %v855_v19, %v5482_v63  ;;  %v2833_v36 = vsel %vm2618_vm2, %v2803_v33, %v2832_v14 }
 0x195   : > { %v2807_v26 = vrot.slane %v854_v18, %v5476_v54  ;;  %v825_v34 = vpop.xlane.xlu1 %824 }
 0x196   : > { %v822_v29 = vpop.xlane.xlu0 %821  ;;  %v857_v37 = vsub.f32 0.0, %v825_v34 }
 0x197   : > { %v856_v35 = vsub.f32 0.0, %v822_v29  ;;  %v2812_v16 = vsel %vm2473_vm12, %v2811_v27, %v2807_v26 }
 0x198   : > { %v2834_v45 = vsel %vm2620_vm3, %v2812_v16, %v2833_v36  ;;  %v2820_v50 = vrot.slane %v857_v37, %v5482_v63 }
 0x199   : > { %v2816_v44 = vrot.slane %v856_v35, %v5476_v54 }
 0x19b   : > { %v2821_v53 = vsel %vm2473_vm12, %v2820_v50, %v2816_v44 }
 0x19c   : > { %v2835_v55 = vsel %vm2622_vm4, %v2821_v53, %v2834_v45 }
 0x19d   : > { %2839 = vst.msk [vmem:[%s5524_s18 + $0x8] sm:$0xff] %vm2633_vm5, %v2835_v55 }
 0x20d   : > { %v4421_v31 = vpop.f32.mrb[0].mxu1 }
 0x20e   : > { %v1528_v42 = vmul.f32 %v4421_v31, %v5564_v39  ;;  %v1392_v43 = vpop.f32.mrb[1].mxu1 }
 0x20f   : > { %v1526_v51 = vmul.f32 %v5564_v39, %v1392_v43  ;;  %v4422_v52 = vpop.f32.mrb[2].mxu1 }
 0x210   : > { %v1567_v48 = vadd.f32 %v5569_v40, %v1528_v42  ;;  %v1529_v49 = vmul.f32 %v4422_v52, %v5564_v39  ;;  %v1395_v1 = vpop.f32.mrb[3].mxu1 }
 0x211   : > { %v1565_v6 = vadd.f32 %v5569_v40, %v1526_v51  ;;  %v1527_v7 = vmul.f32 %v5564_v39, %v1395_v1 }
 0x212   : > { %v1631_v21 = vmul.f32 0.01, %v1567_v48  ;;  %v1568_v24 = vadd.f32 %v5569_v40, %v1529_v49  ;;  %vm1599_vm7 = vcmp.gt.f32.partialorder %v1567_v48, 0.0 }
 0x213   : > { %v1629_v41 = vmul.f32 0.01, %v1565_v6  ;;  %v1566_v46 = vadd.f32 %v5569_v40, %v1527_v7  ;;  %vm1597_vm8 = vcmp.gt.f32.partialorder %v1565_v6, 0.0 }
 0x214   : > { %v1632_v47 = vmul.f32 0.01, %v1568_v24  ;;  %v1663_v56 = vsel %vm1599_vm7, %v1567_v48, %v1631_v21  ;;  %vm1600_vm9 = vcmp.gt.f32.partialorder %v1568_v24, 0.0 }
 0x215   : > { %v1630_v57 = vmul.f32 0.01, %v1566_v46  ;;  %v4425_v58 = vpop.f32.mrb[4].mxu1  ;;  %v1702_v59 = vmul.f32 %v5581_v25, %v1663_v56  ;;  %v1661_v9 = vsel %vm1597_vm8, %v1565_v6, %v1629_v41  ;;  %vm1598_vm10 = vcmp.gt.f32.partialorder %v1566_v46, 0.0 }
 0x216   : > { %v1532_v61 = vmul.f32 %v4425_v58, %v5564_v39  ;;  %v1408_v2 = vpop.f32.mrb[5].mxu1  ;;  %v1664_v0 = vsel %vm1600_vm9, %v1568_v24, %v1632_v47  ;;  %v1700_v10 = vmul.f32 %v5581_v25, %v1661_v9 }
 0x217   : > { %v1530_v13 = vmul.f32 %v5564_v39, %v1408_v2  ;;  %v4426_v15 = vpop.f32.mrb[6].mxu1  ;;  %v1738_v17 = vsel %vm729_vm0, %v1702_v59, 0.0  ;;  %v1703_v18 = vmul.f32 %v5581_v25, %v1664_v0  ;;  %v1662_v19 = vsel %vm1598_vm10, %v1566_v46, %v1630_v57 }
 0x218   : > { %v1571_v14 = vadd.f32 %v5569_v40, %v1532_v61  ;;  %v1533_v20 = vmul.f32 %v4426_v15, %v5564_v39  ;;  %v1411_v23 = vpop.f32.mrb[7].mxu1  ;;  %1739 = vadd.xlane.f32.xlu0 %v1738_v17  ;;  %v1701_v26 = vmul.f32 %v5581_v25, %v1662_v19  ;;  %v1732_v37 = vsel %vm729_vm0, %v1700_v10, 0.0 }
 0x219   : > { %v1569_v27 = vadd.f32 %v5569_v40, %v1530_v13  ;;  %v1531_v29 = vmul.f32 %v5564_v39, %v1411_v23  ;;  %v1741_v33 = vsel %vm729_vm0, %v1703_v18, 0.0 }
 0x21a   : > { %v1635_v34 = vmul.f32 0.01, %v1571_v14  ;;  %v1572_v35 = vadd.f32 %v5569_v40, %v1533_v20  ;;  %1742 = vadd.xlane.f32.xlu1 %v1741_v33  ;;  %vm1603_vm7 = vcmp.gt.f32.partialorder %v1571_v14, 0.0  ;;  %v1735_v45 = vsel %vm729_vm0, %v1701_v26, 0.0 }
 0x21b   : > { %v1633_v36 = vmul.f32 0.01, %v1569_v27  ;;  %v1570_v16 = vadd.f32 %v5569_v40, %v1531_v29  ;;  %vm1601_vm8 = vcmp.gt.f32.partialorder %v1569_v27, 0.0 }
 0x21c   : > { %v1636_v44 = vmul.f32 0.01, %v1572_v35  ;;  %1733 = vadd.xlane.f32.xlu0 %v1732_v37  ;;  %v1667_v50 = vsel %vm1603_vm7, %v1571_v14, %v1635_v34  ;;  %vm1604_vm9 = vcmp.gt.f32.partialorder %v1572_v35, 0.0 }
 0x21d   : > { %v1634_v53 = vmul.f32 0.01, %v1570_v16  ;;  %v4429_v55 = vpop.f32.mrb[8].mxu1  ;;  %v1706_v31 = vmul.f32 %v5581_v25, %v1667_v50  ;;  %v1665_v42 = vsel %vm1601_vm8, %v1569_v27, %v1633_v36  ;;  %vm1602_vm10 = vcmp.gt.f32.partialorder %v1570_v16, 0.0 }
 0x21e   : > { %v1536_v43 = vmul.f32 %v4429_v55, %v5564_v39  ;;  %v1424_v51 = vpop.f32.mrb[9].mxu1  ;;  %1736 = vadd.xlane.f32.xlu1 %v1735_v45  ;;  %v1668_v52 = vsel %vm1604_vm9, %v1572_v35, %v1636_v44  ;;  %v1704_v48 = vmul.f32 %v5581_v25, %v1665_v42 }
 0x21f   : > { %v1534_v49 = vmul.f32 %v5564_v39, %v1424_v51  ;;  %v4430_v1 = vpop.f32.mrb[10].mxu1  ;;  %v1750_v6 = vsel %vm729_vm0, %v1706_v31, 0.0  ;;  %v1707_v7 = vmul.f32 %v5581_v25, %v1668_v52  ;;  %v1666_v21 = vsel %vm1602_vm10, %v1570_v16, %v1634_v53 }
 0x220   : > { %v1575_v24 = vadd.f32 %v5569_v40, %v1536_v43  ;;  %v1537_v41 = vmul.f32 %v4430_v1, %v5564_v39  ;;  %v1427_v46 = vpop.f32.mrb[11].mxu1  ;;  %1751 = vadd.xlane.f32.xlu0 %v1750_v6  ;;  %v1705_v47 = vmul.f32 %v5581_v25, %v1666_v21  ;;  %v1744_v0 = vsel %vm729_vm0, %v1704_v48, 0.0 }
 0x221   : > { %v1573_v56 = vadd.f32 %v5569_v40, %v1534_v49  ;;  %v1535_v57 = vmul.f32 %v5564_v39, %v1427_v46  ;;  %v1753_v58 = vsel %vm729_vm0, %v1707_v7, 0.0 }
 0x222   : > { %v1639_v59 = vmul.f32 0.01, %v1575_v24  ;;  %v1576_v9 = vadd.f32 %v5569_v40, %v1537_v41  ;;  %1754 = vadd.xlane.f32.xlu1 %v1753_v58  ;;  %vm1607_vm7 = vcmp.gt.f32.partialorder %v1575_v24, 0.0  ;;  %v1747_v13 = vsel %vm729_vm0, %v1705_v47, 0.0 }
 0x223   : > { %v1637_v61 = vmul.f32 0.01, %v1573_v56  ;;  %v1574_v2 = vadd.f32 %v5569_v40, %v1535_v57  ;;  %vm1605_vm8 = vcmp.gt.f32.partialorder %v1573_v56, 0.0 }
 0x224   : > { %v1640_v10 = vmul.f32 0.01, %v1576_v9  ;;  %1745 = vadd.xlane.f32.xlu0 %v1744_v0  ;;  %v1671_v15 = vsel %vm1607_vm7, %v1575_v24, %v1639_v59  ;;  %vm1608_vm9 = vcmp.gt.f32.partialorder %v1576_v9, 0.0 }
 0x225   : > { %v1638_v17 = vmul.f32 0.01, %v1574_v2  ;;  %v4433_v18 = vpop.f32.mrb[12].mxu1  ;;  %v1710_v19 = vmul.f32 %v5581_v25, %v1671_v15  ;;  %v1669_v14 = vsel %vm1605_vm8, %v1573_v56, %v1637_v61  ;;  %vm1606_vm10 = vcmp.gt.f32.partialorder %v1574_v2, 0.0 }
 0x226   : > { %v1540_v20 = vmul.f32 %v4433_v18, %v5564_v39  ;;  %1748 = vadd.xlane.f32.xlu1 %v1747_v13  ;;  %v1440_v23 = vpop.f32.mrb[13].mxu1  ;;  %v1672_v26 = vsel %vm1608_vm9, %v1576_v9, %v1640_v10  ;;  %v1708_v27 = vmul.f32 %v5581_v25, %v1669_v14 }
 0x227   : > { %v1538_v29 = vmul.f32 %v5564_v39, %v1440_v23  ;;  %v4434_v33 = vpop.f32.mrb[14].mxu1  ;;  %v1762_v34 = vsel %vm729_vm0, %v1710_v19, 0.0  ;;  %v1711_v35 = vmul.f32 %v5581_v25, %v1672_v26  ;;  %v1670_v36 = vsel %vm1606_vm10, %v1574_v2, %v1638_v17 }
 0x228   : > { %v1579_v16 = vadd.f32 %v5569_v40, %v1540_v20  ;;  %v1541_v37 = vmul.f32 %v4434_v33, %v5564_v39  ;;  %v1443_v44 = vpop.f32.mrb[15].mxu1  ;;  %1763 = vadd.xlane.f32.xlu0 %v1762_v34  ;;  %v1709_v45 = vmul.f32 %v5581_v25, %v1670_v36  ;;  %v1756_v52 = vsel %vm729_vm0, %v1708_v27, 0.0 }
 0x229   : > { %v1577_v50 = vadd.f32 %v5569_v40, %v1538_v29  ;;  %v1539_v53 = vmul.f32 %v5564_v39, %v1443_v44  ;;  %v1765_v55 = vsel %vm729_vm0, %v1711_v35, 0.0 }
 0x22a   : > { %v1643_v31 = vmul.f32 0.01, %v1579_v16  ;;  %v1580_v42 = vadd.f32 %v5569_v40, %v1541_v37  ;;  %1766 = vadd.xlane.f32.xlu1 %v1765_v55  ;;  %vm1611_vm7 = vcmp.gt.f32.partialorder %v1579_v16, 0.0  ;;  %v1759_v49 = vsel %vm729_vm0, %v1709_v45, 0.0 }
 0x22b   : > { %v1641_v43 = vmul.f32 0.01, %v1577_v50  ;;  %v1578_v51 = vadd.f32 %v5569_v40, %v1539_v53  ;;  %vm1609_vm8 = vcmp.gt.f32.partialorder %v1577_v50, 0.0 }
 0x22c   : > { %v1644_v48 = vmul.f32 0.01, %v1580_v42  ;;  %1757 = vadd.xlane.f32.xlu0 %v1756_v52  ;;  %v1675_v1 = vsel %vm1611_vm7, %v1579_v16, %v1643_v31  ;;  %vm1612_vm9 = vcmp.gt.f32.partialorder %v1580_v42, 0.0 }
 0x22d   : > { %v1642_v6 = vmul.f32 0.01, %v1578_v51  ;;  %v4437_v7 = vpop.f32.mrb[16].mxu1  ;;  %v1714_v21 = vmul.f32 %v5581_v25, %v1675_v1  ;;  %v1673_v24 = vsel %vm1609_vm8, %v1577_v50, %v1641_v43  ;;  %vm1610_vm10 = vcmp.gt.f32.partialorder %v1578_v51, 0.0 }
 0x22e   : > { %v1544_v41 = vmul.f32 %v4437_v7, %v5564_v39  ;;  %1760 = vadd.xlane.f32.xlu1 %v1759_v49  ;;  %v1456_v46 = vpop.f32.mrb[17].mxu1  ;;  %v1676_v47 = vsel %vm1612_vm9, %v1580_v42, %v1644_v48  ;;  %v1712_v56 = vmul.f32 %v5581_v25, %v1673_v24 }
 0x22f   : > { %v1542_v57 = vmul.f32 %v5564_v39, %v1456_v46  ;;  %v4438_v58 = vpop.f32.mrb[18].mxu1  ;;  %v1774_v59 = vsel %vm729_vm0, %v1714_v21, 0.0  ;;  %v1715_v9 = vmul.f32 %v5581_v25, %v1676_v47  ;;  %v1674_v61 = vsel %vm1610_vm10, %v1578_v51, %v1642_v6 }
 0x230   : > { %v1583_v2 = vadd.f32 %v5569_v40, %v1544_v41  ;;  %v1545_v0 = vmul.f32 %v4438_v58, %v5564_v39  ;;  %v1459_v10 = vpop.f32.mrb[19].mxu1  ;;  %1775 = vadd.xlane.f32.xlu0 %v1774_v59  ;;  %v1713_v13 = vmul.f32 %v5581_v25, %v1674_v61  ;;  %v1768_v26 = vsel %vm729_vm0, %v1712_v56, 0.0 }
 0x231   : > { %v1581_v15 = vadd.f32 %v5569_v40, %v1542_v57  ;;  %v1543_v17 = vmul.f32 %v5564_v39, %v1459_v10  ;;  %v1777_v18 = vsel %vm729_vm0, %v1715_v9, 0.0 }
 0x232   : > { %v1647_v19 = vmul.f32 0.01, %v1583_v2  ;;  %v1584_v14 = vadd.f32 %v5569_v40, %v1545_v0  ;;  %1778 = vadd.xlane.f32.xlu1 %v1777_v18  ;;  %vm1615_vm7 = vcmp.gt.f32.partialorder %v1583_v2, 0.0  ;;  %v1771_v29 = vsel %vm729_vm0, %v1713_v13, 0.0 }
 0x233   : > { %v1645_v20 = vmul.f32 0.01, %v1581_v15  ;;  %v1582_v23 = vadd.f32 %v5569_v40, %v1543_v17  ;;  %vm1613_vm8 = vcmp.gt.f32.partialorder %v1581_v15, 0.0 }
 0x234   : > { %v1648_v27 = vmul.f32 0.01, %v1584_v14  ;;  %1769 = vadd.xlane.f32.xlu0 %v1768_v26  ;;  %v1679_v33 = vsel %vm1615_vm7, %v1583_v2, %v1647_v19  ;;  %vm1616_vm9 = vcmp.gt.f32.partialorder %v1584_v14, 0.0 }
 0x235   : > { %v1646_v34 = vmul.f32 0.01, %v1582_v23  ;;  %v4441_v35 = vpop.f32.mrb[20].mxu1  ;;  %v1718_v36 = vmul.f32 %v5581_v25, %v1679_v33  ;;  %v1677_v16 = vsel %vm1613_vm8, %v1581_v15, %v1645_v20  ;;  %vm1614_vm10 = vcmp.gt.f32.partialorder %v1582_v23, 0.0 }
 0x236   : > { %v1548_v37 = vmul.f32 %v4441_v35, %v5564_v39  ;;  %1772 = vadd.xlane.f32.xlu1 %v1771_v29  ;;  %v1472_v44 = vpop.f32.mrb[21].mxu1  ;;  %v1680_v45 = vsel %vm1616_vm9, %v1584_v14, %v1648_v27  ;;  %v1716_v50 = vmul.f32 %v5581_v25, %v1677_v16 }
 0x237   : > { %v1546_v53 = vmul.f32 %v5564_v39, %v1472_v44  ;;  %v4442_v55 = vpop.f32.mrb[22].mxu1  ;;  %v1786_v31 = vsel %vm729_vm0, %v1718_v36, 0.0  ;;  %v1719_v42 = vmul.f32 %v5581_v25, %v1680_v45  ;;  %v1678_v43 = vsel %vm1614_vm10, %v1582_v23, %v1646_v34 }
 0x238   : > { %v1587_v51 = vadd.f32 %v5569_v40, %v1548_v37  ;;  %v1549_v52 = vmul.f32 %v4442_v55, %v5564_v39  ;;  %v1475_v48 = vpop.f32.mrb[23].mxu1  ;;  %1787 = vadd.xlane.f32.xlu0 %v1786_v31  ;;  %v1717_v49 = vmul.f32 %v5581_v25, %v1678_v43  ;;  %v1780_v47 = vsel %vm729_vm0, %v1716_v50, 0.0 }
 0x239   : > { %v1585_v1 = vadd.f32 %v5569_v40, %v1546_v53  ;;  %v1547_v6 = vmul.f32 %v5564_v39, %v1475_v48  ;;  %v1789_v7 = vsel %vm729_vm0, %v1719_v42, 0.0 }
 0x23a   : > { %v1651_v21 = vmul.f32 0.01, %v1587_v51  ;;  %v1588_v24 = vadd.f32 %v5569_v40, %v1549_v52  ;;  %1790 = vadd.xlane.f32.xlu1 %v1789_v7  ;;  %vm1619_vm7 = vcmp.gt.f32.partialorder %v1587_v51, 0.0  ;;  %v1783_v57 = vsel %vm729_vm0, %v1717_v49, 0.0 }
 0x23b   : > { %v1649_v41 = vmul.f32 0.01, %v1585_v1  ;;  %v1586_v46 = vadd.f32 %v5569_v40, %v1547_v6  ;;  %vm1617_vm8 = vcmp.gt.f32.partialorder %v1585_v1, 0.0  ;;  %v4849_v52 = vmov 0  }
 0x23c   : > { %v1652_v56 = vmul.f32 0.01, %v1588_v24  ;;  %1781 = vadd.xlane.f32.xlu0 %v1780_v47  ;;  %v1683_v58 = vsel %vm1619_vm7, %v1587_v51, %v1651_v21  ;;  %vm1620_vm9 = vcmp.gt.f32.partialorder %v1588_v24, 0.0  ;;  %4525 = vset.pattern.permute.xlu1 %v4849_v52 }
 0x23d   : > { %v1650_v59 = vmul.f32 0.01, %v1586_v46  ;;  %v4445_v9 = vpop.f32.mrb[24].mxu1  ;;  %v1722_v61 = vmul.f32 %v5581_v25, %v1683_v58  ;;  %v1681_v2 = vsel %vm1617_vm8, %v1585_v1, %v1649_v41  ;;  %vm1618_vm10 = vcmp.gt.f32.partialorder %v1586_v46, 0.0  ;;  %4526 = vset.pattern.permute.xlu0 %v4849_v52 }
 0x23e   : > { %v1552_v0 = vmul.f32 %v4445_v9, %v5564_v39  ;;  %1784 = vadd.xlane.f32.xlu1 %v1783_v57  ;;  %v1488_v10 = vpop.f32.mrb[25].mxu1  ;;  %v1684_v13 = vsel %vm1620_vm9, %v1588_v24, %v1652_v56  ;;  %v1720_v15 = vmul.f32 %v5581_v25, %v1681_v2 }
 0x23f   : > { %v1550_v17 = vmul.f32 %v5564_v39, %v1488_v10  ;;  %v4446_v18 = vpop.f32.mrb[26].mxu1  ;;  %v1798_v19 = vsel %vm729_vm0, %v1722_v61, 0.0  ;;  %v1723_v14 = vmul.f32 %v5581_v25, %v1684_v13  ;;  %v1682_v20 = vsel %vm1618_vm10, %v1586_v46, %v1650_v59  ;;  %v5689_v59 = vpop.permute.xlu1 %2073 }
 0x240   : > { %v1591_v23 = vadd.f32 %v5569_v40, %v1552_v0  ;;  %v1553_v26 = vmul.f32 %v4446_v18, %v5564_v39  ;;  %v1491_v27 = vpop.f32.mrb[27].mxu1  ;;  %1799 = vadd.xlane.f32.xlu0 %v1798_v19  ;;  %v1721_v29 = vmul.f32 %v5581_v25, %v1682_v20  ;;  %v1792_v37 = vsel %vm729_vm0, %v1720_v15, 0.0 }
 0x241   : > { %v1589_v33 = vadd.f32 %v5569_v40, %v1550_v17  ;;  %v1551_v34 = vmul.f32 %v5564_v39, %v1491_v27  ;;  %v1801_v35 = vsel %vm729_vm0, %v1723_v14, 0.0 }
 0x242   : > { %v1655_v36 = vmul.f32 0.01, %v1591_v23  ;;  %v1592_v16 = vadd.f32 %v5569_v40, %v1553_v26  ;;  %1802 = vadd.xlane.f32.xlu1 %v1801_v35  ;;  %vm1623_vm7 = vcmp.gt.f32.partialorder %v1591_v23, 0.0  ;;  %v1795_v50 = vsel %vm729_vm0, %v1721_v29, 0.0 }
 0x243   : > { %v1653_v44 = vmul.f32 0.01, %v1589_v33  ;;  %v1590_v45 = vadd.f32 %v5569_v40, %v1551_v34  ;;  %vm1621_vm8 = vcmp.gt.f32.partialorder %v1589_v33, 0.0  ;;  %v5700_v29 = vpop.permute.xlu1 %2080 }
 0x244   : > { %v1656_v53 = vmul.f32 0.01, %v1592_v16  ;;  %1793 = vadd.xlane.f32.xlu0 %v1792_v37  ;;  %v1687_v55 = vsel %vm1623_vm7, %v1591_v23, %v1655_v36  ;;  %vm1624_vm9 = vcmp.gt.f32.partialorder %v1592_v16, 0.0 }
 0x245   : > { %v1654_v31 = vmul.f32 0.01, %v1590_v45  ;;  %v4449_v42 = vpop.f32.mrb[28].mxu1  ;;  %v1726_v43 = vmul.f32 %v5581_v25, %v1687_v55  ;;  %v1685_v51 = vsel %vm1621_vm8, %v1589_v33, %v1653_v44  ;;  %vm1622_vm10 = vcmp.gt.f32.partialorder %v1590_v45, 0.0 }
 0x246   : > { %v1556_v48 = vmul.f32 %v4449_v42, %v5564_v39  ;;  %1796 = vadd.xlane.f32.xlu1 %v1795_v50  ;;  %v1504_v49 = vpop.f32.mrb[29].mxu1  ;;  %v1688_v1 = vsel %vm1624_vm9, %v1592_v16, %v1656_v53  ;;  %v1724_v6 = vmul.f32 %v5581_v25, %v1685_v51  ;;  %v5706_v16 = vpop.permute.xlu0 %2069  ;;  %v2232_v50 = vrot.slane %v5412_v32, %v5393_v38 }
 0x247   : > { %v1810_v7 = vsel %vm729_vm0, %v1726_v43, 0.0  ;;  %v1554_v21 = vmul.f32 %v5564_v39, %v1504_v49  ;;  %v1727_v24 = vmul.f32 %v5581_v25, %v1688_v1  ;;  %v1686_v41 = vsel %vm1622_vm10, %v1590_v45, %v1654_v31  ;;  %v4450_v46 = vpop.f32.mrb[30].mxu1  ;;  %v5708_v37 = vpop.permute.xlu1 %2084 }
 0x248   : > { %v1595_v47 = vadd.f32 %v5569_v40, %v1556_v48  ;;  %1811 = vadd.xlane.f32.xlu0 %v1810_v7  ;;  %v1725_v56 = vmul.f32 %v5581_v25, %v1686_v41  ;;  %v1557_v57 = vmul.f32 %v4450_v46, %v5564_v39  ;;  %v1507_v58 = vpop.f32.mrb[31].mxu1  ;;  %v1804_v15 = vsel %vm729_vm0, %v1724_v6, 0.0 }
 0x249   : > { %v1593_v9 = vadd.f32 %v5569_v40, %v1554_v21  ;;  %v1813_v61 = vsel %vm729_vm0, %v1727_v24, 0.0  ;;  %v1555_v2 = vmul.f32 %v5564_v39, %v1507_v58  ;;  %v2640_v46 = vsel %vm2633_vm5, %v5329_v62, 0.0 }
 0x24a   : > { %v1659_v0 = vmul.f32 0.01, %v1595_v47  ;;  %1814 = vadd.xlane.f32.xlu1 %v1813_v61  ;;  %vm1627_vm7 = vcmp.gt.f32.partialorder %v1595_v47, 0.0  ;;  %v1596_v10 = vadd.f32 %v5569_v40, %v1557_v57  ;;  %v1807_v18 = vsel %vm729_vm0, %v1725_v56, 0.0  ;;  %v5710_v44 = vpop.permute.xlu0 %2091 }
 0x24b   : > { %v1657_v13 = vmul.f32 0.01, %v1593_v9  ;;  %vm1625_vm8 = vcmp.gt.f32.partialorder %v1593_v9, 0.0  ;;  %v1594_v17 = vadd.f32 %v5569_v40, %v1555_v2  ;;  %v5712_v45 = vpop.permute.xlu1 %2095  ;;  %v2643_v56 = vsel %vm2633_vm5, %v5412_v32, 0.0 }
 0x24c   : > { %1805 = vadd.xlane.f32.xlu0 %v1804_v15  ;;  %v1691_v19 = vsel %vm1627_vm7, %v1595_v47, %v1659_v0  ;;  %v1660_v14 = vmul.f32 0.01, %v1596_v10  ;;  %vm1628_vm9 = vcmp.gt.f32.partialorder %v1596_v10, 0.0  ;;  %v4850_v61 = vmov 0.0  }
 0x24d   : > { %v1730_v20 = vmul.f32 %v5581_v25, %v1691_v19  ;;  %v1689_v39 = vsel %vm1625_vm8, %v1593_v9, %v1657_v13  ;;  %v1658_v23 = vmul.f32 0.01, %v1594_v17  ;;  %vm1626_vm10 = vcmp.gt.f32.partialorder %v1594_v17, 0.0 }
 0x24e   : > { %1808 = vadd.xlane.f32.xlu1 %v1807_v18  ;;  %v1728_v26 = vmul.f32 %v5581_v25, %v1689_v39  ;;  %v1692_v27 = vsel %vm1628_vm9, %v1596_v10, %v1660_v14  ;;  %v5716_v53 = vpop.permute.xlu0 %2102  ;;  %v5762_v62 = vsel %vm2056_vm1, 1.0, %v4850_v61 }
 0x24f   : > { %v1822_v33 = vsel %vm729_vm0, %v1730_v20, 0.0  ;;  %v1731_v40 = vmul.f32 %v5581_v25, %v1692_v27  ;;  %v1690_v34 = vsel %vm1626_vm10, %v1594_v17, %v1658_v23  ;;  %v5718_v55 = vpop.permute.xlu1 %2106  ;;  %v5766_v2 = vrot.slane %v5762_v62, %v5065_v11 }
 0x250   : > { %1823 = vadd.xlane.f32.xlu0 %v1822_v33  ;;  %v1729_v35 = vmul.f32 %v5581_v25, %v1690_v34  ;;  %v1816_v36 = vsel %vm729_vm0, %v1728_v26, 0.0 }
 0x251   : > { %v1825_v7 = vsel %vm729_vm0, %v1731_v40, 0.0 }
 0x252   : > { %v5720_v25 = vpop.permute.xlu0 %2113  ;;  %v1819_v41 = vsel %vm729_vm0, %v1729_v35, 0.0 }
 0x253   : > { %v5722_v31 = vpop.permute.xlu1 %2117 }
 0x254   : > { %1817 = vadd.xlane.f32.xlu0 %v1816_v36 }
 0x256   : > { %v5724_v42 = vpop.permute.xlu0 %2124 }
 0x257   : > { %v5726_v43 = vpop.permute.xlu1 %2128 }
 0x25a   : > { %v5728_v51 = vpop.permute.xlu0 %2135 }
 0x25b   : > { %v5730_v52 = vpop.permute.xlu1 %2139 }
 0x25e   : > { %v5732_v48 = vpop.permute.xlu0 %2146 }
 0x25f   : > { %2238 = vbcast.lane.b32.xlu1 %v2232_v50, 264  ;;  %v5734_v49 = vpop.permute.xlu1 %2150 }
 0x262   : > { %v5736_v1 = vpop.permute.xlu0 %2157 }
 0x263   : > { %v5738_v6 = vpop.permute.xlu1 %2161 }
 0x266   : > { %v5741_v21 = vpop.permute.xlu0 %2168 }
 0x267   : > { %v5743_v24 = vpop.permute.xlu1 %2172 }
 0x26a   : > { %2234 = vbcast.lane.b32.xlu0 %v2232_v50, 256  ;;  %v5748_v47 = vpop.permute.xlu0 %2179 }
 0x26b   : > { %v5752_v57 = vpop.permute.xlu1 %2183 }
 0x26e   : > { %v5754_v58 = vpop.permute.xlu0 %2190 }
 0x26f   : > { %v5756_v9 = vpop.permute.xlu1 %2194 }
 0x272   : > { %v5768_v0 = vpop.permute.xlu0 %2201 }
 0x273   : > { %v5770_v32 = vpop.permute.xlu1 %2205 }
 0x276   : > { %v5773_v10 = vpop.permute.xlu0 %2212 }
 0x277   : > { %v5775_v13 = vpop.permute.xlu1 %2216 }
 0x27a   : > { %v5777_v15 = vpop.permute.xlu0 %2223 }
 0x27b   : > { %v5781_v17 = vpop.permute.xlu1 %2227 }
 0x283   : > { %1826 = vadd.xlane.f32.xlu1 %v1825_v7 }
 0x287   : > { %1820 = vadd.xlane.f32.xlu1 %v1819_v41 }
 0x289   : > { %2641 = vadd.xlane.f32.xlu0 %v2640_v46 }
 0x28d   : > { %2644 = vadd.xlane.f32.xlu0 %v2643_v56 }
 0x298   : > { %3081 = vbcast.lane.b32.xlu1 %v5766_v2, 256 }
 0x2a5   : > { %v1740_v18 = vpop.xlane.xlu0 %1739 }
 0x2a6   : > { %v1832_v19 = vadd.f32 %v5779_v3, %v1740_v18 }
 0x2a7   : > { %v1743_v14 = vpop.xlane.xlu1 %1742 }
 0x2a8   : > { %v4295_v20 = vmul.f32 -1.442695, %v1832_v19  ;;  %v1833_v39 = vadd.f32 %v5779_v3, %v1743_v14 }
 0x2a9   : > { %v1734_v23 = vpop.xlane.xlu0 %1733 }
 0x2aa   : > { %4535 = vpow2.f32 %v4295_v20  ;;  %v4296_v26 = vmul.f32 -1.442695, %v1833_v39  ;;  %v1830_v27 = vadd.f32 %v5779_v3, %v1734_v23 }
 0x2ab   : > { %v1737_v33 = vpop.xlane.xlu1 %1736 }
 0x2ac   : > { %4537 = vpow2.f32 %v4296_v26  ;;  %v4293_v40 = vmul.f32 -1.442695, %v1830_v27  ;;  %v1831_v34 = vadd.f32 %v5779_v3, %v1737_v33 }
 0x2ad   : > { %v1752_v35 = vpop.xlane.xlu0 %1751 }
 0x2ae   : > { %4539 = vpow2.f32 %v4293_v40  ;;  %v4294_v36 = vmul.f32 -1.442695, %v1831_v34  ;;  %v1836_v50 = vadd.f32 %v5779_v3, %v1752_v35 }
 0x2af   : > { %v1755_v7 = vpop.xlane.xlu1 %1754 }
 0x2b0   : > { %4541 = vpow2.f32 %v4294_v36  ;;  %v4299_v41 = vmul.f32 -1.442695, %v1836_v50  ;;  %v1837_v46 = vadd.f32 %v5779_v3, %v1755_v7 }
 0x2b1   : > { %v1746_v56 = vpop.xlane.xlu0 %1745 }
 0x2b2   : > { %4543 = vpow2.f32 %v4299_v41  ;;  %v4300_v18 = vmul.f32 -1.442695, %v1837_v46  ;;  %v1834_v19 = vadd.f32 %v5779_v3, %v1746_v56 }
 0x2b3   : > { %v1749_v14 = vpop.xlane.xlu1 %1748 }
 0x2b4   : > { %v4536_v20 = vpop.eup %4535  ;;  %4545 = vpow2.f32 %v4300_v18  ;;  %v4297_v39 = vmul.f32 -1.442695, %v1834_v19  ;;  %v1835_v23 = vadd.f32 %v5779_v3, %v1749_v14 }
 0x2b5   : > { %v1960_v26 = vadd.f32 1.0, %v4536_v20  ;;  %v1764_v27 = vpop.xlane.xlu0 %1763 }
 0x2b6   : > { %v4538_v33 = vpop.eup %4537  ;;  %4547 = vpow2.f32 %v4297_v39  ;;  %v4298_v40 = vmul.f32 -1.442695, %v1835_v23  ;;  %v1840_v34 = vadd.f32 %v5779_v3, %v1764_v27 }
 0x2b7   : > { %4549 = vrcp.f32 %v1960_v26  ;;  %v1961_v35 = vadd.f32 1.0, %v4538_v33  ;;  %v1767_v36 = vpop.xlane.xlu1 %1766 }
 0x2b8   : > { %v4540_v50 = vpop.eup %4539  ;;  %4551 = vpow2.f32 %v4298_v40  ;;  %v4303_v7 = vmul.f32 -1.442695, %v1840_v34  ;;  %v1841_v41 = vadd.f32 %v5779_v3, %v1767_v36 }
 0x2b9   : > { %4553 = vrcp.f32 %v1961_v35  ;;  %v1958_v46 = vadd.f32 1.0, %v4540_v50  ;;  %v1758_v56 = vpop.xlane.xlu0 %1757 }
 0x2ba   : > { %v4542_v18 = vpop.eup %4541  ;;  %4555 = vpow2.f32 %v4303_v7  ;;  %v4304_v19 = vmul.f32 -1.442695, %v1841_v41  ;;  %v1838_v14 = vadd.f32 %v5779_v3, %v1758_v56 }
 0x2bb   : > { %4557 = vrcp.f32 %v1958_v46  ;;  %v1959_v20 = vadd.f32 1.0, %v4542_v18  ;;  %v1761_v39 = vpop.xlane.xlu1 %1760 }
 0x2bc   : > { %v4544_v23 = vpop.eup %4543  ;;  %4559 = vpow2.f32 %v4304_v19  ;;  %v4301_v26 = vmul.f32 -1.442695, %v1838_v14  ;;  %v1839_v27 = vadd.f32 %v5779_v3, %v1761_v39 }
 0x2bd   : > { %4561 = vrcp.f32 %v1959_v20  ;;  %v1964_v33 = vadd.f32 1.0, %v4544_v23  ;;  %v1776_v40 = vpop.xlane.xlu0 %1775 }
 0x2be   : > { %v4546_v34 = vpop.eup %4545  ;;  %4563 = vpow2.f32 %v4301_v26  ;;  %v4302_v35 = vmul.f32 -1.442695, %v1839_v27  ;;  %v1844_v36 = vadd.f32 %v5779_v3, %v1776_v40 }
 0x2bf   : > { %4565 = vrcp.f32 %v1964_v33  ;;  %v1965_v50 = vadd.f32 1.0, %v4546_v34  ;;  %v1779_v7 = vpop.xlane.xlu1 %1778 }
 0x2c0   : > { %v4548_v41 = vpop.eup %4547  ;;  %4567 = vpow2.f32 %v4302_v35  ;;  %v4307_v46 = vmul.f32 -1.442695, %v1844_v36  ;;  %v1845_v56 = vadd.f32 %v5779_v3, %v1779_v7 }
 0x2c1   : > { %v4550_v18 = vpop.eup %4549  ;;  %4569 = vrcp.f32 %v1965_v50  ;;  %v1962_v19 = vadd.f32 1.0, %v4548_v41  ;;  %v1770_v14 = vpop.xlane.xlu0 %1769 }
 0x2c2   : > { %v4552_v20 = vpop.eup %4551  ;;  %4571 = vpow2.f32 %v4307_v46  ;;  %v4308_v39 = vmul.f32 -1.442695, %v1845_v56  ;;  %v1842_v23 = vadd.f32 %v5779_v3, %v1770_v14  ;;  %v5799_v26 = vmul.f32 %v4550_v18, %v5700_v29 }
 0x2c3   : > { %v4554_v27 = vpop.eup %4553  ;;  %4573 = vrcp.f32 %v1962_v19  ;;  %v1963_v33 = vadd.f32 1.0, %v4552_v20  ;;  %v1773_v40 = vpop.xlane.xlu1 %1772 }
 0x2c4   : > { %v4556_v34 = vpop.eup %4555  ;;  %4575 = vpow2.f32 %v4308_v39  ;;  %v4305_v35 = vmul.f32 -1.442695, %v1842_v23  ;;  %v1843_v36 = vadd.f32 %v5779_v3, %v1773_v40  ;;  %v2306_v50 = vand.u32 2147483647, %v5799_v26 }
 0x2c5   : > { %v4558_v7 = vpop.eup %4557  ;;  %4577 = vrcp.f32 %v1963_v33  ;;  %v1968_v41 = vadd.f32 1.0, %v4556_v34  ;;  %v1788_v46 = vpop.xlane.xlu0 %1787  ;;  %v5808_v23 = vmul.f32 %v4554_v27, %v5708_v37 }
 0x2c6   : > { %v4560_v56 = vpop.eup %4559  ;;  %4579 = vpow2.f32 %v4305_v35  ;;  %v4306_v14 = vmul.f32 -1.442695, %v1843_v36  ;;  %v1848_v29 = vadd.f32 %v5779_v3, %v1788_v46  ;;  %2375 = vperm.xlu1 %4525, %v2306_v50   ;;  %v5805_v18 = vmul.f32 %v4558_v7, %v5706_v16 }
 0x2c7   : > { %v4562_v19 = vpop.eup %4561  ;;  %4581 = vrcp.f32 %v1968_v41  ;;  %v1969_v20 = vadd.f32 1.0, %v4560_v56  ;;  %v1791_v39 = vpop.xlane.xlu1 %1790 }
 0x2c8   : > { %v4564_v40 = vpop.eup %4563  ;;  %4583 = vpow2.f32 %v4306_v14  ;;  %v4311_v33 = vmul.f32 -1.442695, %v1848_v29  ;;  %v1849_v34 = vadd.f32 %v5779_v3, %v1791_v39  ;;  %v2304_v35 = vand.u32 2147483647, %v5805_v18 }
 0x2c9   : > { %v4566_v36 = vpop.eup %4565  ;;  %4585 = vrcp.f32 %v1969_v20  ;;  %v1966_v50 = vadd.f32 1.0, %v4564_v40  ;;  %v1782_v46 = vpop.xlane.xlu0 %1781  ;;  %v5813_v16 = vmul.f32 %v4562_v19, %v5689_v59  ;;  %v2307_v19 = vand.u32 2147483647, %v5808_v23 }
 0x2ca   : > { %v4568_v7 = vpop.eup %4567  ;;  %4587 = vpow2.f32 %v4311_v33  ;;  %v4312_v41 = vmul.f32 -1.442695, %v1849_v34  ;;  %v1846_v37 = vadd.f32 %v5779_v3, %v1782_v46  ;;  %2369 = vperm.xlu0 %4526, %v2304_v35   ;;  %v5818_v39 = vmul.f32 %v4566_v36, %v5716_v53 }
 0x2cb   : > { %v4570_v27 = vpop.eup %4569  ;;  %4589 = vrcp.f32 %v1966_v50  ;;  %v1967_v56 = vadd.f32 1.0, %v4568_v7  ;;  %v1785_v14 = vpop.xlane.xlu1 %1784  ;;  %v2305_v29 = vand.u32 2147483647, %v5813_v16 }
 0x2cc   : > { %v4572_v20 = vpop.eup %4571  ;;  %4591 = vpow2.f32 %v4312_v41  ;;  %v4309_v40 = vmul.f32 -1.442695, %v1846_v37  ;;  %v1847_v59 = vadd.f32 %v5779_v3, %v1785_v14  ;;  %v5823_v50 = vmul.f32 %v4570_v27, %v5718_v55 }
 0x2cd   : > { %v4574_v33 = vpop.eup %4573  ;;  %4593 = vrcp.f32 %v1967_v56  ;;  %v1972_v34 = vadd.f32 1.0, %v4572_v20  ;;  %2372 = vperm.xlu1 %4525, %v2305_v29   ;;  %v1800_v35 = vpop.xlane.xlu0 %1799  ;;  %v2310_v14 = vand.u32 2147483647, %v5818_v39 }
 0x2ce   : > { %v4576_v46 = vpop.eup %4575  ;;  %4595 = vpow2.f32 %v4309_v40  ;;  %v4310_v7 = vmul.f32 -1.442695, %v1847_v59  ;;  %v1852_v53 = vadd.f32 %v5779_v3, %v1800_v35  ;;  %2378 = vperm.xlu0 %4526, %v2307_v19   ;;  %v5828_v56 = vmul.f32 %v4574_v33, %v5710_v44 }
 0x2cf   : > { %v4578_v36 = vpop.eup %4577  ;;  %4597 = vrcp.f32 %v1972_v34  ;;  %v1973_v41 = vadd.f32 1.0, %v4576_v46  ;;  %v1803_v37 = vpop.xlane.xlu1 %1802  ;;  %v2311_v27 = vand.u32 2147483647, %v5823_v50 }
 0x2d0   : > { %v4580_v29 = vpop.eup %4579  ;;  %4599 = vpow2.f32 %v4310_v7  ;;  %v4315_v20 = vmul.f32 -1.442695, %v1852_v53  ;;  %v1853_v55 = vadd.f32 %v5779_v3, %v1803_v37  ;;  %v5833_v34 = vmul.f32 %v4578_v36, %v5712_v45 }
 0x2d1   : > { %v4582_v40 = vpop.eup %4581  ;;  %4601 = vrcp.f32 %v1973_v41  ;;  %v1970_v59 = vadd.f32 1.0, %v4580_v29  ;;  %2387 = vperm.xlu1 %4525, %v2310_v14   ;;  %v1794_v19 = vpop.xlane.xlu0 %1793  ;;  %v2308_v37 = vand.u32 2147483647, %v5828_v56 }
 0x2d2   : > { %v4584_v35 = vpop.eup %4583  ;;  %4603 = vpow2.f32 %v4315_v20  ;;  %v4316_v46 = vmul.f32 -1.442695, %v1853_v55  ;;  %v1850_v44 = vadd.f32 %v5779_v3, %v1794_v19  ;;  %2390 = vperm.xlu0 %4526, %v2311_v27   ;;  %v5838_v41 = vmul.f32 %v4582_v40, %v5724_v42 }
 0x2d3   : > { %v4586_v33 = vpop.eup %4585  ;;  %4605 = vrcp.f32 %v1970_v59  ;;  %v1971_v7 = vadd.f32 1.0, %v4584_v35  ;;  %v1797_v53 = vpop.xlane.xlu1 %1796  ;;  %v2309_v36 = vand.u32 2147483647, %v5833_v34 }
 0x2d4   : > { %v4588_v14 = vpop.eup %4587  ;;  %4607 = vpow2.f32 %v4316_v46  ;;  %v4313_v29 = vmul.f32 -1.442695, %v1850_v44  ;;  %v1851_v45 = vadd.f32 %v5779_v3, %v1797_v53  ;;  %v5843_v59 = vmul.f32 %v4586_v33, %v5726_v43 }
 0x2d5   : > { %v4590_v20 = vpop.eup %4589  ;;  %4609 = vrcp.f32 %v1971_v7  ;;  %v1976_v55 = vadd.f32 1.0, %v4588_v14  ;;  %2381 = vperm.xlu1 %4525, %v2308_v37   ;;  %v1812_v27 = vpop.xlane.xlu0 %1811  ;;  %v2314_v53 = vand.u32 2147483647, %v5838_v41 }
 0x2d6   : > { %v4592_v19 = vpop.eup %4591  ;;  %4611 = vpow2.f32 %v4313_v29  ;;  %v4314_v35 = vmul.f32 -1.442695, %v1851_v45  ;;  %v1856_v42 = vadd.f32 %v5779_v3, %v1812_v27  ;;  %2384 = vperm.xlu0 %4526, %v2309_v36   ;;  %v5848_v7 = vmul.f32 %v4590_v20, %v5720_v25 }
 0x2d7   : > { %v4594_v40 = vpop.eup %4593  ;;  %4613 = vrcp.f32 %v1976_v55  ;;  %v1977_v46 = vadd.f32 1.0, %v4592_v19  ;;  %v1815_v44 = vpop.xlane.xlu1 %1814  ;;  %v2315_v33 = vand.u32 2147483647, %v5843_v59 }
 0x2d8   : > { %v4596_v37 = vpop.eup %4595  ;;  %4615 = vpow2.f32 %v4314_v35  ;;  %v4319_v14 = vmul.f32 -1.442695, %v1856_v42  ;;  %v1857_v43 = vadd.f32 %v5779_v3, %v1815_v44  ;;  %v5853_v55 = vmul.f32 %v4594_v40, %v5722_v31 }
 0x2d9   : > { %v4598_v29 = vpop.eup %4597  ;;  %4617 = vrcp.f32 %v1977_v46  ;;  %v1974_v45 = vadd.f32 1.0, %v4596_v37  ;;  %2399 = vperm.xlu1 %4525, %v2314_v53   ;;  %v1806_v36 = vpop.xlane.xlu0 %1805  ;;  %v2312_v44 = vand.u32 2147483647, %v5848_v7 }
 0x2da   : > { %v4600_v27 = vpop.eup %4599  ;;  %4619 = vpow2.f32 %v4319_v14  ;;  %v4320_v19 = vmul.f32 -1.442695, %v1857_v43  ;;  %v1854_v25 = vadd.f32 %v5779_v3, %v1806_v36  ;;  %2402 = vperm.xlu0 %4526, %v2315_v33   ;;  %v5858_v46 = vmul.f32 %v4598_v29, %v5732_v48 }
 0x2db   : > { %v4602_v20 = vpop.eup %4601  ;;  %4621 = vrcp.f32 %v1974_v45  ;;  %v1975_v35 = vadd.f32 1.0, %v4600_v27  ;;  %v1809_v42 = vpop.xlane.xlu1 %1808  ;;  %v2313_v40 = vand.u32 2147483647, %v5853_v55 }
 0x2dc   : > { %v4604_v53 = vpop.eup %4603  ;;  %4623 = vpow2.f32 %v4320_v19  ;;  %v4317_v37 = vmul.f32 -1.442695, %v1854_v25  ;;  %v1855_v31 = vadd.f32 %v5779_v3, %v1809_v42  ;;  %v5863_v45 = vmul.f32 %v4602_v20, %v5734_v49 }
 0x2dd   : > { %v4606_v14 = vpop.eup %4605  ;;  %4625 = vrcp.f32 %v1975_v35  ;;  %v1980_v43 = vadd.f32 1.0, %v4604_v53  ;;  %2393 = vperm.xlu1 %4525, %v2312_v44   ;;  %v1824_v33 = vpop.xlane.xlu0 %1823  ;;  %v2318_v25 = vand.u32 2147483647, %v5858_v46 }
 0x2de   : > { %v4608_v36 = vpop.eup %4607  ;;  %4627 = vpow2.f32 %v4317_v37  ;;  %v4318_v27 = vmul.f32 -1.442695, %v1855_v31  ;;  %v1860_v48 = vadd.f32 %v5779_v3, %v1824_v33  ;;  %2396 = vperm.xlu0 %4526, %v2313_v40   ;;  %v5868_v42 = vmul.f32 %v4606_v14, %v5728_v51 }
 0x2df   : > { %v4610_v29 = vpop.eup %4609  ;;  %4629 = vrcp.f32 %v1980_v43  ;;  %v1981_v19 = vadd.f32 1.0, %v4608_v36  ;;  %v2319_v49 = vand.u32 2147483647, %v5863_v45 }
 0x2e0   : > { %v4612_v35 = vpop.eup %4611  ;;  %4631 = vpow2.f32 %v4318_v27  ;;  %v4323_v44 = vmul.f32 -1.442695, %v1860_v48  ;;  %v5872_v20 = vmul.f32 %v4610_v29, %v5730_v52  ;;  %v2316_v33 = vand.u32 2147483647, %v5868_v42 }
 0x2e1   : > { %v4614_v53 = vpop.eup %4613  ;;  %4633 = vrcp.f32 %v1981_v19  ;;  %v1978_v37 = vadd.f32 1.0, %v4612_v35  ;;  %2411 = vperm.xlu1 %4525, %v2318_v25   ;;  %v1818_v31 = vpop.xlane.xlu0 %1817 }
 0x2e2   : > { %v4616_v40 = vpop.eup %4615  ;;  %4635 = vpow2.f32 %v4323_v44  ;;  %v1858_v43 = vadd.f32 %v5779_v3, %v1818_v31  ;;  %2414 = vperm.xlu0 %4526, %v2319_v49   ;;  %v5877_v36 = vmul.f32 %v4614_v53, %v5741_v21  ;;  %v2317_v48 = vand.u32 2147483647, %v5872_v20 }
 0x2e3   : > { %v4618_v51 = vpop.eup %4617  ;;  %4637 = vrcp.f32 %v1978_v37  ;;  %v1979_v14 = vadd.f32 1.0, %v4616_v40 }
 0x2e4   : > { %v4620_v52 = vpop.eup %4619  ;;  %v4321_v27 = vmul.f32 -1.442695, %v1858_v43  ;;  %v5881_v29 = vmul.f32 %v4618_v51, %v5743_v24  ;;  %v2322_v21 = vand.u32 2147483647, %v5877_v36 }
 0x2e5   : > { %v4622_v19 = vpop.eup %4621  ;;  %4639 = vrcp.f32 %v1979_v14  ;;  %v1984_v25 = vadd.f32 1.0, %v4620_v52  ;;  %2405 = vperm.xlu1 %4525, %v2316_v33  }
 0x2e6   : > { %v4624_v35 = vpop.eup %4623  ;;  %4641 = vpow2.f32 %v4321_v27  ;;  %2408 = vperm.xlu0 %4526, %v2317_v48   ;;  %v5885_v53 = vmul.f32 %v4622_v19, %v5736_v1  ;;  %v2323_v31 = vand.u32 2147483647, %v5881_v29 }
 0x2e7   : > { %v4626_v44 = vpop.eup %4625  ;;  %4643 = vrcp.f32 %v1984_v25  ;;  %v1985_v49 = vadd.f32 1.0, %v4624_v35 }
 0x2e8   : > { %v4628_v37 = vpop.eup %4627  ;;  %v5889_v24 = vmul.f32 %v4626_v44, %v5738_v6  ;;  %v2320_v52 = vand.u32 2147483647, %v5885_v53 }
 0x2e9   : > { %v4630_v40 = vpop.eup %4629  ;;  %4645 = vrcp.f32 %v1985_v49  ;;  %v1982_v43 = vadd.f32 1.0, %v4628_v37  ;;  %2423 = vperm.xlu1 %4525, %v2322_v21  }
 0x2ea   : > { %v4632_v51 = vpop.eup %4631  ;;  %2426 = vperm.xlu0 %4526, %v2323_v31   ;;  %v5893_v1 = vmul.f32 %v4630_v40, %v5754_v58  ;;  %v2321_v48 = vand.u32 2147483647, %v5889_v24 }
 0x2eb   : > { %v4634_v14 = vpop.eup %4633  ;;  %4647 = vrcp.f32 %v1982_v43  ;;  %v1983_v33 = vadd.f32 1.0, %v4632_v51 }
 0x2ec   : > { %6597 = vst [vmem:[#allocation16_spill] sm:$0xff] %v5893_v1  ;;  %v4636_v27 = vpop.eup %4635  ;;  %v5897_v6 = vmul.f32 %v4634_v14, %v5756_v9  ;;  %v2326_v44 = vand.u32 2147483647, %v5893_v1 }
 0x2ed   : > { %v4638_v19 = vpop.eup %4637  ;;  %4649 = vrcp.f32 %v1983_v33  ;;  %v1988_v25 = vadd.f32 1.0, %v4636_v27  ;;  %2417 = vperm.xlu1 %4525, %v2320_v52   ;;  %v2235_v27 = vpop.permute.xlu0 %2234 }
 0x2ee   : > { %6598 = vst [vmem:[#allocation17_spill] sm:$0xff] %v5897_v6  ;;  %2420 = vperm.xlu0 %4526, %v2321_v48   ;;  %v5901_v49 = vmul.f32 %v4638_v19, %v5748_v47  ;;  %v2327_v21 = vand.u32 2147483647, %v5897_v6 }
 0x2ef   : > { %v4640_v35 = vpop.eup %4639  ;;  %4651 = vrcp.f32 %v1988_v25 }
 0x2f0   : > { %v4642_v58 = vpop.eup %4641  ;;  %v5905_v37 = vmul.f32 %v4640_v35, %v5752_v57  ;;  %v2324_v43 = vand.u32 2147483647, %v5901_v49 }
 0x2f1   : > { %v4644_v9 = vpop.eup %4643  ;;  %v1986_v31 = vadd.f32 1.0, %v4642_v58  ;;  %2435 = vperm.xlu1 %4525, %v2326_v44  }
 0x2f2   : > { %2438 = vperm.xlu0 %4526, %v2327_v21   ;;  %v5909_v51 = vmul.f32 %v4644_v9, %v5773_v10  ;;  %v2325_v47 = vand.u32 2147483647, %v5905_v37  ;;  %v3090_v9 = vrot.slane %v5762_v62, %v5334_v4 }
 0x2f3   : > { %v4646_v40 = vpop.eup %4645  ;;  %4653 = vrcp.f32 %v1986_v31  ;;  %v2239_v31 = vpop.permute.xlu1 %2238 }
 0x2f4   : > { %6599 = vst [vmem:[#allocation18_spill] sm:$0xff] %v5909_v51  ;;  %v5913_v14 = vmul.f32 %v4646_v40, %v5775_v13  ;;  %v2330_v52 = vand.u32 2147483647, %v5909_v51  ;;  %v3101_v40 = vrot.slane %v5762_v62, %v5339_v5 }
 0x2f5   : > { %v4648_v33 = vpop.eup %4647  ;;  %2429 = vperm.xlu1 %4525, %v2324_v43  }
 0x2f6   : > { %6600 = vst [vmem:[#allocation19_spill] sm:$0xff] %v5913_v14  ;;  %2432 = vperm.xlu0 %4526, %v2325_v47   ;;  %v5917_v48 = vmul.f32 %v4648_v33, %v5768_v0  ;;  %v2331_v19 = vand.u32 2147483647, %v5913_v14 }
 0x2f7   : > { %v4650_v57 = vpop.eup %4649 }
 0x2f8   : > { %6601 = vst [vmem:[#allocation20_spill] sm:$0xff] %v5917_v48  ;;  %v5921_v10 = vmul.f32 %v4650_v57, %v5770_v32  ;;  %v2328_v35 = vand.u32 2147483647, %v5917_v48 }
 0x2f9   : > { %v4652_v25 = vpop.eup %4651  ;;  %2447 = vperm.xlu1 %4525, %v2330_v52  }
 0x2fa   : > { %6602 = vst [vmem:[#allocation21_spill] sm:$0xff] %v5921_v10  ;;  %2450 = vperm.xlu0 %4526, %v2331_v19   ;;  %v5923_v13 = vmul.f32 %v4652_v25, %v2235_v27  ;;  %v2329_v44 = vand.u32 2147483647, %v5921_v10  ;;  %v3123_v27 = vrot.slane %v5762_v62, %v5363_v28  ;;  %v3134_v25 = vrot.slane %v5762_v62, %v5370_v8 }
 0x2fc   : > { %6603 = vst [vmem:[#allocation22_spill] sm:$0xff] %v5923_v13  ;;  %v2334_v21 = vand.u32 2147483647, %v5923_v13 }
 0x2fd   : > { %v4654_v58 = vpop.eup %4653  ;;  %2441 = vperm.xlu1 %4525, %v2328_v35   ;;  %v3145_v35 = vrot.slane %v5762_v62, %v5376_v30 }
 0x2fe   : > { %2444 = vperm.xlu0 %4526, %v2329_v44   ;;  %v5929_v0 = vmul.f32 %v4654_v58, %v5777_v15  ;;  %v3112_v15 = vrot.slane %v5762_v62, %v5349_v12 }
 0x300   : > { %6604 = vst [vmem:[#allocation23_spill] sm:$0xff] %v5929_v0  ;;  %v2332_v32 = vand.u32 2147483647, %v5929_v0 }
 0x301   : > { %2459 = vperm.xlu1 %4525, %v2334_v21   ;;  %v5952_v21 = vsel %vm2057_vm11, 1.0, %v4850_v61 }
 0x302   : > { %v3189_v60 = vrot.slane %v5952_v21, %v5339_v5 }
 0x305   : > { %2453 = vperm.xlu1 %4525, %v2332_v32  }
 0x309   : > { %3092 = vbcast.lane.b32.xlu1 %v3090_v9, 256 }
 0x30d   : > { %3096 = vbcast.lane.b32.xlu1 %v3090_v9, 264 }
 0x310   : > { %v1827_v43 = vpop.xlane.xlu1 %1826 }
 0x311   : > { %v1861_v47 = vadd.f32 %v5779_v3, %v1827_v43  ;;  %3103 = vbcast.lane.b32.xlu1 %v3101_v40, 256  ;;  %v3167_v43 = vrot.slane %v5952_v21, %v5065_v11 }
 0x313   : > { %v4324_v33 = vmul.f32 -1.442695, %v1861_v47  ;;  %v3178_v47 = vrot.slane %v5952_v21, %v5334_v4 }
 0x314   : > { %v1821_v57 = vpop.xlane.xlu1 %1820 }
 0x315   : > { %4655 = vpow2.f32 %v4324_v33  ;;  %v1859_v52 = vadd.f32 %v5779_v3, %v1821_v57  ;;  %3114 = vbcast.lane.b32.xlu1 %v3112_v15, 256  ;;  %v3156_v3 = vrot.slane %v5762_v62, %v5393_v38 }
 0x317   : > { %v4322_v19 = vmul.f32 -1.442695, %v1859_v52  ;;  %v3200_v52 = vrot.slane %v5952_v21, %v5349_v12 }
 0x319   : > { %4657 = vpow2.f32 %v4322_v19  ;;  %3125 = vbcast.lane.b32.xlu1 %v3123_v27, 256 }
 0x31d   : > { %3136 = vbcast.lane.b32.xlu1 %v3134_v25, 256 }
 0x31f   : > { %v4656_v44 = vpop.eup %4655 }
 0x320   : > { %v1989_v58 = vadd.f32 1.0, %v4656_v44  ;;  %v5973_v44 = vrot.slane %v5952_v21, %v5370_v8 }
 0x321   : > { %3147 = vbcast.lane.b32.xlu1 %v3145_v35, 256 }
 0x322   : > { %4659 = vrcp.f32 %v1989_v58  ;;  %v5979_v58 = vpop.permute.xlu1 %3081 }
 0x323   : > { %v4658_v32 = vpop.eup %4657 }
 0x324   : > { %v1987_v9 = vadd.f32 1.0, %v4658_v32 }
 0x325   : > { %3158 = vbcast.lane.b32.xlu1 %v3156_v3, 256 }
 0x326   : > { %4661 = vrcp.f32 %v1987_v9 }
 0x329   : > { %3169 = vbcast.lane.b32.xlu1 %v3167_v43, 256 }
 0x32c   : > { %v4660_v33 = vpop.eup %4659 }
 0x32d   : > { %v5958_v62 = vmul.f32 %v4660_v33, %v2239_v31  ;;  %3180 = vbcast.lane.b32.xlu1 %v3178_v47, 256  ;;  %v3211_v31 = vrot.slane %v5952_v21, %v5363_v28 }
 0x32f   : > { %6605 = vst [vmem:[#allocation24_spill] sm:$0xff] %v5958_v62  ;;  %v2335_v22 = vand.u32 2147483647, %v5958_v62 }
 0x330   : > { %v4662_v61 = vpop.eup %4661 }
 0x331   : > { %2462 = vperm.xlu0 %4526, %v2335_v22   ;;  %v5964_v57 = vmul.f32 %v4662_v61, %v5781_v17  ;;  %3191 = vbcast.lane.b32.xlu1 %v3189_v60, 256  ;;  %v5976_v17 = vpop.xlane.xlu0 %2641 }
 0x333   : > { %6606 = vst [vmem:[#allocation25_spill] sm:$0xff] %v5964_v57  ;;  %v2333_v19 = vand.u32 2147483647, %v5964_v57 }
 0x335   : > { %2456 = vperm.xlu0 %4526, %v2333_v19   ;;  %3202 = vbcast.lane.b32.xlu1 %v3200_v52, 256  ;;  %v5981_v32 = vpop.xlane.xlu0 %2644 }
 0x339   : > { %3213 = vbcast.lane.b32.xlu1 %v3211_v31, 256  ;;  %3085 = vbcast.lane.b32.xlu0 %v5766_v2, 264 }
 0x33d   : > { %3224 = vbcast.lane.b32.xlu1 %v5973_v44, 256  ;;  %3107 = vbcast.lane.b32.xlu0 %v3101_v40, 264 }
 0x341   : > { %3118 = vbcast.lane.b32.xlu0 %v3112_v15, 264 }
 0x345   : > { %3129 = vbcast.lane.b32.xlu0 %v3123_v27, 264  ;;  %v2376_v9 = vpop.permute.xlu1 %2375 }
 0x346   : > { %v2478_v27 = vrot.slane %v2376_v9, %v5476_v54 }
 0x349   : > { %v2370_v33 = vpop.permute.xlu0 %2369  ;;  %3140 = vbcast.lane.b32.xlu0 %v3134_v25, 264 }
 0x34a   : > { %v2467_v14 = vrot.slane %v2370_v33, %v5476_v54 }
 0x34c   : > { %v2373_v22 = vpop.permute.xlu1 %2372 }
 0x34d   : > { %v2379_v61 = vpop.permute.xlu0 %2378  ;;  %3151 = vbcast.lane.b32.xlu0 %v3145_v35, 264  ;;  %v2472_v25 = vrot.slane %v2373_v22, %v5482_v63 }
 0x34e   : > { %v2482_v40 = vrot.slane %v2379_v61, %v5482_v63 }
 0x350   : > { %v2388_v19 = vpop.permute.xlu1 %2387 }
 0x351   : > { %v2391_v13 = vpop.permute.xlu0 %2390  ;;  %3162 = vbcast.lane.b32.xlu0 %v3156_v3, 264  ;;  %v2483_v3 = vsel %vm2473_vm12, %v2482_v40, %v2478_v27  ;;  %v2496_v10 = vrot.slane %v2388_v19, %v5476_v54 }
 0x354   : > { %v2382_v2 = vpop.permute.xlu1 %2381 }
 0x355   : > { %v2385_v62 = vpop.permute.xlu0 %2384  ;;  %3173 = vbcast.lane.b32.xlu0 %v3167_v43, 264  ;;  %v2487_v51 = vrot.slane %v2382_v2, %v5476_v54 }
 0x356   : > { %v2491_v57 = vrot.slane %v2385_v62, %v5482_v63  ;;  %v2500_v62 = vrot.slane %v2391_v13, %v5482_v63 }
 0x358   : > { %v2400_v0 = vpop.permute.xlu1 %2399  ;;  %v2492_v43 = vsel %vm2473_vm12, %v2491_v57, %v2487_v51  ;;  %v2501_v51 = vsel %vm2473_vm12, %v2500_v62, %v2496_v10 }
 0x359   : > { %v2403_v15 = vpop.permute.xlu0 %2402  ;;  %3184 = vbcast.lane.b32.xlu0 %v3178_v47, 264  ;;  %v2474_v47 = vsel %vm2473_vm12, %v2472_v25, %v2467_v14  ;;  %v2514_v57 = vrot.slane %v2400_v0, %v5476_v54 }
 0x35a   : > { %v2611_v9 = vsel %vm2610_vm13, %v2483_v3, %v2474_v47 }
 0x35b   : > { %v2613_v33 = vsel %vm2612_vm14, %v2492_v43, %v2611_v9  ;;  %v3233_v9 = vrot.slane %v5952_v21, %v5376_v30 }
 0x35c   : > { %v2394_v35 = vpop.permute.xlu1 %2393  ;;  %v2615_v14 = vsel %vm2614_vm6, %v2501_v51, %v2613_v33 }
 0x35d   : > { %v2397_v48 = vpop.permute.xlu0 %2396  ;;  %3195 = vbcast.lane.b32.xlu0 %v3189_v60, 264  ;;  %v2505_v22 = vrot.slane %v2394_v35, %v5476_v54 }
 0x35e   : > { %v2509_v61 = vrot.slane %v2397_v48, %v5482_v63  ;;  %v2518_v48 = vrot.slane %v2403_v15, %v5482_v63 }
 0x360   : > { %v2412_v2 = vpop.permute.xlu1 %2411  ;;  %v2510_v60 = vsel %vm2473_vm12, %v2509_v61, %v2505_v22  ;;  %v2519_v3 = vsel %vm2473_vm12, %v2518_v48, %v2514_v57  ;;  %v3244_v22 = vrot.slane %v5952_v21, %v5393_v38 }
 0x361   : > { %v2415_v40 = vpop.permute.xlu0 %2414  ;;  %3206 = vbcast.lane.b32.xlu0 %v3200_v52, 264  ;;  %v2617_v27 = vsel %vm2616_vm15, %v2510_v60, %v2615_v14  ;;  %v2532_v10 = vrot.slane %v2412_v2, %v5476_v54 }
 0x362   : > { %v2536_v25 = vrot.slane %v2415_v40, %v5482_v63  ;;  %v2619_v43 = vsel %vm2618_vm2, %v2519_v3, %v2617_v27 }
 0x364   : > { %v2406_v13 = vpop.permute.xlu1 %2405  ;;  %v2537_v0 = vsel %vm2473_vm12, %v2536_v25, %v2532_v10 }
 0x365   : > { %v2409_v19 = vpop.permute.xlu0 %2408  ;;  %3217 = vbcast.lane.b32.xlu0 %v3211_v31, 264  ;;  %v2523_v35 = vrot.slane %v2406_v13, %v5476_v54 }
 0x366   : > { %v2527_v52 = vrot.slane %v2409_v19, %v5482_v63 }
 0x368   : > { %v2528_v15 = vsel %vm2473_vm12, %v2527_v52, %v2523_v35  ;;  %v2424_v62 = vpop.permute.xlu1 %2423 }
 0x369   : > { %v2621_v61 = vsel %vm2620_vm3, %v2528_v15, %v2619_v43  ;;  %v2427_v60 = vpop.permute.xlu0 %2426 }
 0x36a   : > { %v2623_v47 = vsel %vm2622_vm4, %v2537_v0, %v2621_v61  ;;  %v2554_v21 = vrot.slane %v2427_v60, %v5482_v63  ;;  %v2550_v0 = vrot.slane %v2424_v62, %v5476_v54 }
 0x36b   : > { %v2634_v31 = vsel %vm2633_vm5, %v2623_v47, 0.0 }
 0x36c   : > { %2635 = vadd.xlane.f32.xlu1 %v2634_v31  ;;  %v2418_v2 = vpop.permute.xlu1 %2417 }
 0x36d   : > { %v2421_v48 = vpop.permute.xlu0 %2420  ;;  %v2541_v10 = vrot.slane %v2418_v2, %v5476_v54 }
 0x36e   : > { %v2545_v52 = vrot.slane %v2421_v48, %v5482_v63  ;;  %v2555_v48 = vsel %vm2473_vm12, %v2554_v21, %v2550_v0 }
 0x370   : > { %v2436_v33 = vpop.permute.xlu1 %2435  ;;  %v2546_v61 = vsel %vm2473_vm12, %v2545_v52, %v2541_v10 }
 0x371   : > { %v2439_v13 = vpop.permute.xlu0 %2438  ;;  %v2624_v60 = vsel %vm2610_vm13, %v2555_v48, %v2546_v61 }
 0x374   : > { %v2430_v40 = vpop.permute.xlu1 %2429 }
 0x375   : > { %v2433_v27 = vpop.permute.xlu0 %2432  ;;  %v2559_v43 = vrot.slane %v2430_v40, %v5476_v54  ;;  %v2568_v40 = vrot.slane %v2436_v33, %v5476_v54 }
 0x376   : > { %v2563_v3 = vrot.slane %v2433_v27, %v5482_v63  ;;  %v2572_v27 = vrot.slane %v2439_v13, %v5482_v63 }
 0x378   : > { %v2448_v51 = vpop.permute.xlu1 %2447  ;;  %v2564_v47 = vsel %vm2473_vm12, %v2563_v3, %v2559_v43  ;;  %v2573_v3 = vsel %vm2473_vm12, %v2572_v27, %v2568_v40 }
 0x379   : > { %v2451_v19 = vpop.permute.xlu0 %2450  ;;  %v2625_v62 = vsel %vm2612_vm14, %v2564_v47, %v2624_v60  ;;  %v2586_v13 = vrot.slane %v2448_v51, %v5476_v54 }
 0x37a   : > { %v2590_v10 = vrot.slane %v2451_v19, %v5482_v63 }
 0x37c   : > { %v2442_v14 = vpop.permute.xlu1 %2441  ;;  %v2591_v47 = vsel %vm2473_vm12, %v2590_v10, %v2586_v13 }
 0x37d   : > { %3235 = vbcast.lane.b32.xlu1 %v3233_v9, 256  ;;  %v2445_v15 = vpop.permute.xlu0 %2444  ;;  %v2577_v2 = vrot.slane %v2442_v14, %v5476_v54 }
 0x37e   : > { %v2581_v31 = vrot.slane %v2445_v15, %v5482_v63  ;;  %v2626_v15 = vsel %vm2614_vm6, %v2573_v3, %v2625_v62 }
 0x380   : > { %v2460_v57 = vpop.permute.xlu1 %2459  ;;  %v2582_v52 = vsel %vm2473_vm12, %v2581_v31, %v2577_v2 }
 0x381   : > { %3246 = vbcast.lane.b32.xlu1 %v3244_v22, 256  ;;  %v2627_v43 = vsel %vm2616_vm15, %v2582_v52, %v2626_v15  ;;  %v2604_v31 = vrot.slane %v2460_v57, %v5476_v54 }
 0x382   : > { %v2628_v48 = vsel %vm2618_vm2, %v2591_v47, %v2627_v43 }
 0x384   : > { %v2454_v25 = vpop.permute.xlu1 %2453 }
 0x385   : > { %v2595_v0 = vrot.slane %v2454_v25, %v5476_v54 }
 0x388   : > { %v6019_v35 = vpop.permute.xlu1 %3092 }
 0x38c   : > { %v6030_v1 = vpop.permute.xlu1 %3096 }
 0x390   : > { %v6042_v21 = vpop.permute.xlu1 %3103 }
 0x3b0   : > { %v2463_v6 = vpop.permute.xlu0 %2462 }
 0x3b1   : > { %v2608_v14 = vrot.slane %v2463_v6, %v5482_v63  ;;  %v6056_v6 = vpop.permute.xlu1 %3114 }
 0x3b3   : > { %v2609_v27 = vsel %vm2473_vm12, %v2608_v14, %v2604_v31  ;;  %v2963_v31 = vrot.slane %v5976_v17, %v5065_v11 }
 0x3b4   : > { %v2457_v33 = vpop.permute.xlu0 %2456 }
 0x3b5   : > { %v2599_v61 = vrot.slane %v2457_v33, %v5482_v63  ;;  %v6059_v2 = vpop.permute.xlu1 %3125 }
 0x3b7   : > { %v2600_v19 = vsel %vm2473_vm12, %v2599_v61, %v2595_v0 }
 0x3b8   : > { %v2629_v51 = vsel %vm2620_vm3, %v2600_v19, %v2628_v48  ;;  %v3086_v0 = vpop.permute.xlu0 %3085 }
 0x3b9   : > { %v2630_v60 = vsel %vm2622_vm4, %v2609_v27, %v2629_v51  ;;  %v6061_v40 = vpop.permute.xlu1 %3136  ;;  %v2967_v27 = vrot.slane %v5976_v17, %v5334_v4 }
 0x3ba   : > { %v2637_v25 = vsel %vm2633_vm5, %v2630_v60, 0.0 }
 0x3bb   : > { %2638 = vadd.xlane.f32.xlu0 %v2637_v25 }
 0x3bc   : > { %v3108_v47 = vpop.permute.xlu0 %3107 }
 0x3bd   : > { %v6063_v57 = vpop.permute.xlu1 %3147 }
 0x3c1   : > { %v6065_v62 = vpop.permute.xlu1 %3158 }
 0x3c5   : > { %v6068_v52 = vpop.permute.xlu1 %3169 }
 0x3c9   : > { %v6070_v3 = vpop.permute.xlu1 %3180 }
 0x3ca   : > { %6607 = vst [vmem:[#allocation26_spill] sm:$0xff] %v6070_v3 }
 0x3cd   : > { %v6072_v10 = vpop.permute.xlu1 %3191 }
 0x3ce   : > { %6608 = vst [vmem:[#allocation27_spill] sm:$0xff] %v6072_v10 }
 0x3d1   : > { %3228 = vbcast.lane.b32.xlu0 %v5973_v44, 264  ;;  %v6074_v15 = vpop.permute.xlu1 %3202 }
 0x3d2   : > { %6609 = vst [vmem:[#allocation28_spill] sm:$0xff] %v6074_v15  ;;  %v3119_v15 = vpop.permute.xlu0 %3118 }
 0x3d5   : > { %3239 = vbcast.lane.b32.xlu0 %v3233_v9, 264  ;;  %v6076_v13 = vpop.permute.xlu1 %3213 }
 0x3d6   : > { %6610 = vst [vmem:[#allocation29_spill] sm:$0xff] %v6076_v13 }
 0x3d9   : > { %3250 = vbcast.lane.b32.xlu0 %v3244_v22, 264  ;;  %v6078_v43 = vpop.permute.xlu1 %3224 }
 0x3da   : > { %6611 = vst [vmem:[#allocation30_spill] sm:$0xff] %v6078_v43 }
 0x3f9   : > { %v2636_v14 = vpop.xlane.xlu1 %2635 }
 0x3fa   : > { %v2840_v33 = vmax.f32 %v2636_v14, 1e-12 }
 0x3fc   : > { %4663 = vrcp.f32 %v2840_v33 }
 0x406   : > { %v4664_v61 = vpop.eup %4663 }
 0x407   : > { %v2849_v44 = vrot.slane %v4664_v61, %v5065_v11  ;;  %v2853_v9 = vrot.slane %v4664_v61, %v5334_v4  ;;  %v2857_v22 = vrot.slane %v4664_v61, %v5339_v5  ;;  %v2861_v51 = vrot.slane %v4664_v61, %v5349_v12 }
 0x409   : > { %v2926_v19 = vmul.f32 %v2849_v44, %v5805_v18  ;;  %v2927_v48 = vmul.f32 %v2849_v44, %v5813_v16  ;;  %v2928_v60 = vmul.f32 %v2853_v9, %v5799_v26  ;;  %v2929_v25 = vmul.f32 %v2853_v9, %v5808_v23 }
 0x40a   : > { %v2930_v14 = vmul.f32 %v2857_v22, %v5828_v56  ;;  %v2931_v33 = vmul.f32 %v2857_v22, %v5833_v34  ;;  %v2971_v18 = vrot.slane %v5976_v17, %v5339_v5  ;;  %v2932_v23 = vmul.f32 %v2861_v51, %v5818_v39 }
 0x40b   : > { %v3040_v63 = vmul.f32 %v2963_v31, %v2926_v19  ;;  %v3041_v54 = vmul.f32 %v2963_v31, %v2927_v48  ;;  %v3042_v43 = vmul.f32 %v2967_v27, %v2928_v60  ;;  %v3043_v13 = vmul.f32 %v2967_v27, %v2929_v25 }
 0x40c   : > { %v3044_v26 = vmul.f32 %v2971_v18, %v2930_v14  ;;  %v3045_v3 = vmul.f32 %v2971_v18, %v2931_v33  ;;  %v2865_v22 = vrot.slane %v4664_v61, %v5363_v28  ;;  %v2975_v31 = vrot.slane %v5976_v17, %v5349_v12 }
 0x40d   : > { %v3284_v16 = vadd.f32 %v5979_v58, %v3040_v63  ;;  %v3285_v44 = vadd.f32 %v3086_v0, %v3041_v54  ;;  %v3286_v10 = vadd.f32 %v6019_v35, %v3042_v43  ;;  %v3287_v9 = vadd.f32 %v6030_v1, %v3043_v13 }
 0x40e   : > { %v2933_v54 = vmul.f32 %v2861_v51, %v5823_v50  ;;  %v2869_v63 = vrot.slane %v4664_v61, %v5370_v8  ;;  %v3288_v58 = vadd.f32 %v6042_v21, %v3044_v26  ;;  %v3289_v35 = vadd.f32 %v3108_v47, %v3045_v3  ;;  %v3130_v50 = vpop.permute.xlu0 %3129 }
 0x40f   : > { %v6099_v56 = vadd.f32 1e-06, %v3284_v16  ;;  %v6101_v34 = vadd.f32 1e-06, %v3285_v44  ;;  %v6111_v39 = vadd.f32 1e-06, %v3286_v10  ;;  %v3046_v43 = vmul.f32 %v2975_v31, %v2932_v23 }
 0x410   : > { %v6114_v1 = vadd.f32 1e-06, %v3287_v9  ;;  %v3047_v13 = vmul.f32 %v2975_v31, %v2933_v54  ;;  %v2934_v0 = vmul.f32 %v2865_v22, %v5848_v7  ;;  %v2935_v19 = vmul.f32 %v2865_v22, %v5853_v55 }
 0x411   : > { %3381 = vperm.xlu1 %4525, %v6099_v56   ;;  %3384 = vperm.xlu0 %4526, %v6101_v34   ;;  %v2979_v10 = vrot.slane %v5976_v17, %v5363_v28  ;;  %v2873_v48 = vrot.slane %v4664_v61, %v5376_v30  ;;  %v6123_v21 = vadd.f32 1e-06, %v3288_v58  ;;  %v6125_v3 = vadd.f32 1e-06, %v3289_v35 }
 0x412   : > { %v3290_v47 = vadd.f32 %v6056_v6, %v3046_v43  ;;  %v2936_v7 = vmul.f32 %v2869_v63, %v5838_v41  ;;  %v3291_v27 = vadd.f32 %v3119_v15, %v3047_v13  ;;  %v2937_v60 = vmul.f32 %v2869_v63, %v5843_v59  ;;  %v3141_v33 = vpop.permute.xlu0 %3140 }
 0x413   : > { %v3048_v55 = vmul.f32 %v2979_v10, %v2934_v0  ;;  %v3049_v51 = vmul.f32 %v2979_v10, %v2935_v19  ;;  %v2983_v25 = vrot.slane %v5976_v17, %v5370_v8  ;;  %v2877_v14 = vrot.slane %v4664_v61, %v5393_v38 }
 0x414   : > { %v6135_v18 = vadd.f32 1e-06, %v3290_v47  ;;  %v2938_v41 = vmul.f32 %v2873_v48, %v5868_v42  ;;  %v2939_v15 = vmul.f32 %v2873_v48, %v5872_v20  ;;  %v6139_v16 = vadd.f32 1e-06, %v3291_v27 }
 0x415   : > { %3387 = vperm.xlu1 %4525, %v6111_v39   ;;  %3390 = vperm.xlu0 %4526, %v6114_v1   ;;  %v3050_v6 = vmul.f32 %v2983_v25, %v2936_v7  ;;  %v3292_v59 = vadd.f32 %v6059_v2, %v3048_v55  ;;  %v3293_v44 = vadd.f32 %v3130_v50, %v3049_v51 }
 0x416   : > { %v3051_v26 = vmul.f32 %v2983_v25, %v2937_v60  ;;  %v2987_v61 = vrot.slane %v5976_v17, %v5376_v30  ;;  %v2940_v23 = vmul.f32 %v2877_v14, %v5858_v46  ;;  %v2941_v9 = vmul.f32 %v2877_v14, %v5863_v45  ;;  %v3152_v63 = vpop.permute.xlu0 %3151 }
 0x417   : > { %v6148_v20 = vadd.f32 1e-06, %v3292_v59  ;;  %v6150_v31 = vadd.f32 1e-06, %v3293_v44  ;;  %v3294_v2 = vadd.f32 %v6061_v40, %v3050_v6  ;;  %v2991_v58 = vrot.slane %v5976_v17, %v5393_v38 }
 0x418   : > { %v3052_v42 = vmul.f32 %v2987_v61, %v2938_v41  ;;  %v3053_v22 = vmul.f32 %v2987_v61, %v2939_v15  ;;  %v3295_v54 = vadd.f32 %v3141_v33, %v3051_v26  ;;  %v2995_v41 = vrot.slane %v5981_v32, %v5065_v11 }
 0x419   : > { %3393 = vperm.xlu1 %4525, %v6123_v21   ;;  %3396 = vperm.xlu0 %4526, %v6125_v3   ;;  %v3054_v46 = vmul.f32 %v2991_v58, %v2940_v23  ;;  %v3055_v35 = vmul.f32 %v2991_v58, %v2941_v9  ;;  %v6157_v45 = vadd.f32 1e-06, %v3294_v2  ;;  %v2999_v61 = vrot.slane %v5981_v32, %v5334_v4 }
 0x41a   : > { %v6159_v43 = vadd.f32 1e-06, %v3295_v54  ;;  %v3296_v13 = vadd.f32 %v6063_v57, %v3052_v42  ;;  %v3297_v0 = vadd.f32 %v3152_v63, %v3053_v22  ;;  %v3163_v40 = vpop.permute.xlu0 %3162 }
 0x41b   : > { %v3299_v19 = vadd.f32 %v3163_v40, %v3055_v35  ;;  %v3298_v10 = vadd.f32 %v6065_v62, %v3054_v46  ;;  %v6613_v40 = vld [vmem:[#allocation16_spill] sm:$0xff] }
 0x41c   : > { %v6164_v17 = vadd.f32 1e-06, %v3296_v13  ;;  %v6166_v50 = vadd.f32 1e-06, %v3297_v0  ;;  %v6612_v13 = vld [vmem:[#allocation17_spill] sm:$0xff] }
 0x41d   : > { %3399 = vperm.xlu1 %4525, %v6135_v18   ;;  %3402 = vperm.xlu0 %4526, %v6139_v16   ;;  %v6171_v48 = vadd.f32 1e-06, %v3299_v19  ;;  %v6173_v57 = vadd.f32 1e-06, %v3298_v10 }
 0x41e   : > { %v3174_v47 = vpop.permute.xlu0 %3173 }
 0x421   : > { %3405 = vperm.xlu1 %4525, %v6148_v20   ;;  %3408 = vperm.xlu0 %4526, %v6150_v31  }
 0x422   : > { %v3185_v7 = vpop.permute.xlu0 %3184 }
 0x425   : > { %3411 = vperm.xlu1 %4525, %v6157_v45   ;;  %3414 = vperm.xlu0 %4526, %v6159_v43  }
 0x426   : > { %v3196_v27 = vpop.permute.xlu0 %3195 }
 0x429   : > { %3417 = vperm.xlu1 %4525, %v6164_v17   ;;  %3420 = vperm.xlu0 %4526, %v6166_v50  }
 0x42a   : > { %v3207_v55 = vpop.permute.xlu0 %3206 }
 0x42d   : > { %3423 = vperm.xlu1 %4525, %v6173_v57   ;;  %3426 = vperm.xlu0 %4526, %v6171_v48  }
 0x42e   : > { %v6177_v51 = vpop.permute.xlu0 %3217 }
 0x448   : > { %v2639_v60 = vpop.xlane.xlu0 %2638 }
 0x449   : > { %v2841_v62 = vmax.f32 %v2639_v60, 1e-12 }
 0x44b   : > { %4665 = vrcp.f32 %v2841_v62 }
 0x455   : > { %v4666_v25 = vpop.eup %4665 }
 0x456   : > { %v2881_v14 = vrot.slane %v4666_v25, %v5065_v11  ;;  %v2885_v33 = vrot.slane %v4666_v25, %v5334_v4  ;;  %v2889_v23 = vrot.slane %v4666_v25, %v5339_v5  ;;  %v2893_v22 = vrot.slane %v4666_v25, %v5349_v12 }
 0x457   : > { %v2901_v10 = vrot.slane %v4666_v25, %v5370_v8 }
 0x458   : > { %v2943_v6 = vmul.f32 %v2881_v14, %v5889_v24  ;;  %v2942_v15 = vmul.f32 %v2881_v14, %v5885_v53  ;;  %v2945_v26 = vmul.f32 %v2885_v33, %v5881_v29  ;;  %v2944_v54 = vmul.f32 %v2885_v33, %v5877_v36  ;;  %v6615_v14 = vld [vmem:[#allocation21_spill] sm:$0xff] }
 0x459   : > { %v3003_v53 = vrot.slane %v5981_v32, %v5339_v5  ;;  %v2897_v29 = vrot.slane %v4666_v25, %v5363_v28  ;;  %v2947_v46 = vmul.f32 %v2889_v23, %v5905_v37  ;;  %v2946_v35 = vmul.f32 %v2889_v23, %v5901_v49  ;;  %v6614_v37 = vld [vmem:[#allocation26_spill] sm:$0xff] }
 0x45a   : > { %v3057_v59 = vmul.f32 %v2995_v41, %v2943_v6  ;;  %v3056_v44 = vmul.f32 %v2995_v41, %v2942_v15  ;;  %v3059_v24 = vmul.f32 %v2999_v61, %v2945_v26  ;;  %v2949_v0 = vmul.f32 %v2893_v22, %v6612_v13 }
 0x45b   : > { %v3007_v36 = vrot.slane %v5981_v32, %v5349_v12  ;;  %v2948_v19 = vmul.f32 %v2893_v22, %v6613_v40  ;;  %v2951_v33 = vmul.f32 %v2897_v29, %v6615_v14  ;;  %v3011_v41 = vrot.slane %v5981_v32, %v5363_v28 }
 0x45c   : > { %v3301_v9 = vadd.f32 %v3174_v47, %v3057_v59  ;;  %v3300_v42 = vadd.f32 %v6068_v52, %v3056_v44  ;;  %v3303_v58 = vadd.f32 %v3185_v7, %v3059_v24  ;;  %v3058_v52 = vmul.f32 %v2999_v61, %v2944_v54  ;;  %v6616_v59 = vld [vmem:[#allocation27_spill] sm:$0xff]  ;;  %v6617_v61 = vld [vmem:[#allocation20_spill] sm:$0xff] }
 0x45d   : > { %v3061_v47 = vmul.f32 %v3003_v53, %v2947_v46  ;;  %v3060_v7 = vmul.f32 %v3003_v53, %v2946_v35  ;;  %v3063_v62 = vmul.f32 %v3007_v36, %v2949_v0  ;;  %v3062_v26 = vmul.f32 %v3007_v36, %v2948_v19  ;;  %v6619_v46 = vld [vmem:[#allocation18_spill] sm:$0xff]  ;;  %v6621_v19 = vld [vmem:[#allocation25_spill] sm:$0xff] }
 0x45e   : > { %v6191_v2 = vadd.f32 1e-06, %v3301_v9  ;;  %v6197_v63 = vadd.f32 1e-06, %v3300_v42  ;;  %v6208_v60 = vadd.f32 1e-06, %v3303_v58  ;;  %v3302_v49 = vadd.f32 %v6614_v37, %v3058_v52  ;;  %v3229_v58 = vpop.permute.xlu0 %3228 }
 0x45f   : > { %v3305_v6 = vadd.f32 %v3196_v27, %v3061_v47  ;;  %v3304_v44 = vadd.f32 %v6616_v59, %v3060_v7  ;;  %v2950_v23 = vmul.f32 %v2897_v29, %v6617_v61  ;;  %v2905_v9 = vrot.slane %v4666_v25, %v5376_v30  ;;  %v6618_v42 = vld [vmem:[#allocation19_spill] sm:$0xff]  ;;  %v6620_v29 = vld [vmem:[#allocation28_spill] sm:$0xff]  ;;  %v3236_v61 = vpop.permute.xlu1 %3235 }
 0x460   : > { %3432 = vperm.xlu0 %4526, %v6191_v2   ;;  %3429 = vperm.xlu1 %4525, %v6197_v63   ;;  %v6215_v15 = vadd.f32 1e-06, %v3302_v49  ;;  %v2953_v22 = vmul.f32 %v2901_v10, %v6618_v42  ;;  %v3307_v27 = vadd.f32 %v3207_v55, %v3063_v62  ;;  %v3065_v54 = vmul.f32 %v3011_v41, %v2951_v33  ;;  %v6622_v49 = vld [vmem:[#allocation23_spill] sm:$0xff]  ;;  %v6625_v42 = vld [vmem:[#allocation22_spill] sm:$0xff] }
 0x461   : > { %v6222_v24 = vadd.f32 1e-06, %v3305_v6  ;;  %v3015_v53 = vrot.slane %v5981_v32, %v5370_v8  ;;  %v2952_v35 = vmul.f32 %v2901_v10, %v6619_v46  ;;  %v6228_v52 = vadd.f32 1e-06, %v3304_v44  ;;  %v6624_v44 = vld [vmem:[#allocation24_spill] sm:$0xff] }
 0x462   : > { %v3306_v13 = vadd.f32 %v6620_v29, %v3062_v26  ;;  %v3064_v0 = vmul.f32 %v3011_v41, %v2950_v23  ;;  %v2909_v36 = vrot.slane %v4666_v25, %v5393_v38  ;;  %v2955_v47 = vmul.f32 %v2905_v9, %v6621_v19  ;;  %v6623_v25 = vld [vmem:[#allocation29_spill] sm:$0xff]  ;;  %v3240_v6 = vpop.permute.xlu0 %3239 }
 0x463   : > { %v3067_v40 = vmul.f32 %v3015_v53, %v2953_v22  ;;  %v6234_v55 = vadd.f32 1e-06, %v3307_v27  ;;  %v3309_v7 = vadd.f32 %v6177_v51, %v3065_v54  ;;  %v3019_v10 = vrot.slane %v5981_v32, %v5376_v30  ;;  %v6626_v54 = vld [vmem:[#allocation30_spill] sm:$0xff] }
 0x464   : > { %3438 = vperm.xlu0 %4526, %v6208_v60   ;;  %3435 = vperm.xlu1 %4525, %v6215_v15   ;;  %v3066_v37 = vmul.f32 %v3015_v53, %v2952_v35  ;;  %v2954_v62 = vmul.f32 %v2905_v9, %v6622_v49  ;;  %v6241_v14 = vadd.f32 1e-06, %v3306_v13  ;;  %v3308_v33 = vadd.f32 %v6623_v25, %v3064_v0 }
 0x465   : > { %v3311_v41 = vadd.f32 %v3229_v58, %v3067_v40  ;;  %v3069_v59 = vmul.f32 %v3019_v10, %v2955_v47  ;;  %v2957_v26 = vmul.f32 %v2909_v36, %v6624_v44  ;;  %v6246_v51 = vadd.f32 1e-06, %v3309_v7 }
 0x466   : > { %v3023_v23 = vrot.slane %v5981_v32, %v5393_v38  ;;  %v3068_v9 = vmul.f32 %v3019_v10, %v2954_v62  ;;  %v2956_v22 = vmul.f32 %v2909_v36, %v6625_v42  ;;  %v6252_v27 = vadd.f32 1e-06, %v3308_v33  ;;  %v3251_v29 = vpop.permute.xlu0 %3250  ;;  %v3247_v32 = vpop.permute.xlu1 %3246  ;;  %v6630_v42 = vld [vmem:[#allocation15_spill] sm:$0xff] }
 0x467   : > { %v3310_v53 = vadd.f32 %v6626_v54, %v3066_v37  ;;  %v6255_v58 = vadd.f32 1e-06, %v3311_v41  ;;  %v3313_v46 = vadd.f32 %v3240_v6, %v3069_v59 }
 0x468   : > { %3444 = vperm.xlu0 %4526, %v6222_v24   ;;  %3441 = vperm.xlu1 %4525, %v6228_v52   ;;  %v3071_v35 = vmul.f32 %v3023_v23, %v2957_v26  ;;  %v3312_v13 = vadd.f32 %v3236_v61, %v3068_v9  ;;  %v3070_v0 = vmul.f32 %v3023_v23, %v2956_v22  ;;  %v6629_v23 = vld [vmem:[#allocation14_spill] sm:$0xff] }
 0x469   : > { %v6258_v40 = vadd.f32 1e-06, %v3310_v53  ;;  %v6261_v36 = vadd.f32 1e-06, %v3313_v46 }
 0x46a   : > { %v3315_v19 = vadd.f32 %v3251_v29, %v3071_v35  ;;  %v6264_v47 = vadd.f32 1e-06, %v3312_v13  ;;  %v3314_v7 = vadd.f32 %v3247_v32, %v3070_v0 }
 0x46c   : > { %3450 = vperm.xlu0 %4526, %v6234_v55   ;;  %3447 = vperm.xlu1 %4525, %v6241_v14   ;;  %v6267_v10 = vadd.f32 1e-06, %v3315_v19  ;;  %v6270_v37 = vadd.f32 1e-06, %v3314_v7 }
 0x46e   : > { %6627 = vst [vmem:[#allocation17_spill] sm:$0xff] %v6267_v10  ;;  %6628 = vst [vmem:[#allocation16_spill] sm:$0xff] %v6270_v37 }
 0x470   : > { %3456 = vperm.xlu0 %4526, %v6246_v51   ;;  %3453 = vperm.xlu1 %4525, %v6252_v27  }
 0x474   : > { %3462 = vperm.xlu0 %4526, %v6255_v58   ;;  %3459 = vperm.xlu1 %4525, %v6258_v40  }
 0x478   : > { %3468 = vperm.xlu0 %4526, %v6261_v36   ;;  %3465 = vperm.xlu1 %4525, %v6264_v47  }
 0x47c   : > { %3474 = vperm.xlu0 %4526, %v6267_v10   ;;  %3471 = vperm.xlu1 %4525, %v6270_v37  }
 0x490   : > { %v3382_v49 = vpop.permute.xlu1 %3381  ;;  %v3385_v62 = vpop.permute.xlu0 %3384 }
 0x491   : > { %v3479_v29 = vrot.slane %v3382_v49, %v6629_v23  ;;  %v3483_v13 = vrot.slane %v3385_v62, %v6630_v42 }
 0x493   : > { %v3484_v62 = vsel %vm2473_vm12, %v3483_v13, %v3479_v29 }
 0x494   : > { %v3388_v25 = vpop.permute.xlu1 %3387  ;;  %v3391_v33 = vpop.permute.xlu0 %3390 }
 0x495   : > { %v3488_v9 = vrot.slane %v3388_v25, %v6629_v23  ;;  %v3492_v22 = vrot.slane %v3391_v33, %v6630_v42 }
 0x497   : > { %v3493_v25 = vsel %vm2473_vm12, %v3492_v22, %v3488_v9 }
 0x498   : > { %v3394_v6 = vpop.permute.xlu1 %3393  ;;  %v3397_v41 = vpop.permute.xlu0 %3396 }
 0x499   : > { %v3497_v54 = vrot.slane %v3394_v6, %v6629_v23  ;;  %v3501_v53 = vrot.slane %v3397_v41, %v6630_v42 }
 0x49b   : > { %v3502_v41 = vsel %vm2473_vm12, %v3501_v53, %v3497_v54 }
 0x49c   : > { %v3400_v59 = vpop.permute.xlu1 %3399  ;;  %v3403_v44 = vpop.permute.xlu0 %3402 }
 0x49d   : > { %v3506_v0 = vrot.slane %v3400_v59, %v6629_v23  ;;  %v3510_v32 = vrot.slane %v3403_v44, %v6630_v42 }
 0x49f   : > { %v3511_v59 = vsel %vm2473_vm12, %v3510_v32, %v3506_v0 }
 0x4a0   : > { %v3406_v26 = vpop.permute.xlu1 %3405  ;;  %v3409_v61 = vpop.permute.xlu0 %3408 }
 0x4a1   : > { %v3515_v19 = vrot.slane %v3406_v26, %v6629_v23  ;;  %v3519_v7 = vrot.slane %v3409_v61, %v6630_v42  ;;  %v3620_v61 = vsel %vm2610_vm13, %v3493_v25, %v3484_v62 }
 0x4a2   : > { %v3621_v22 = vsel %vm2612_vm14, %v3502_v41, %v3620_v61 }
 0x4a3   : > { %v3520_v9 = vsel %vm2473_vm12, %v3519_v7, %v3515_v19  ;;  %v3622_v54 = vsel %vm2614_vm6, %v3511_v59, %v3621_v22 }
 0x4a4   : > { %v3412_v46 = vpop.permute.xlu1 %3411  ;;  %v3415_v35 = vpop.permute.xlu0 %3414  ;;  %v3623_v13 = vsel %vm2616_vm15, %v3520_v9, %v3622_v54 }
 0x4a5   : > { %v3524_v33 = vrot.slane %v3412_v46, %v6629_v23  ;;  %v3528_v6 = vrot.slane %v3415_v35, %v6630_v42 }
 0x4a7   : > { %v3529_v46 = vsel %vm2473_vm12, %v3528_v6, %v3524_v33 }
 0x4a8   : > { %v3418_v10 = vpop.permute.xlu1 %3417  ;;  %v3421_v49 = vpop.permute.xlu0 %3420  ;;  %v3624_v32 = vsel %vm2618_vm2, %v3529_v46, %v3623_v13 }
 0x4a9   : > { %v3533_v44 = vrot.slane %v3418_v10, %v6629_v23  ;;  %v3537_v26 = vrot.slane %v3421_v49, %v6630_v42 }
 0x4ab   : > { %v3538_v53 = vsel %vm2473_vm12, %v3537_v26, %v3533_v44 }
 0x4ac   : > { %v3424_v35 = vpop.permute.xlu1 %3423  ;;  %v3427_v29 = vpop.permute.xlu0 %3426  ;;  %v3625_v7 = vsel %vm2620_vm3, %v3538_v53, %v3624_v32 }
 0x4ad   : > { %v3542_v10 = vrot.slane %v3424_v35, %v6629_v23  ;;  %v3546_v0 = vrot.slane %v3427_v29, %v6630_v42 }
 0x4af   : > { %v3547_v19 = vsel %vm2473_vm12, %v3546_v0, %v3542_v10 }
 0x4b0   : > { %v3626_v25 = vsel %vm2622_vm4, %v3547_v19, %v3625_v7 }
 0x4b1   : > { %v3636_v33 = vsel %vm2633_vm5, %v3626_v25, 0.0 }
 0x4b2   : > { %3637 = vadd.xlane.f32.xlu1 %v3636_v33 }
 0x4df   : > { %v3433_v6 = vpop.permute.xlu0 %3432  ;;  %v3430_v41 = vpop.permute.xlu1 %3429 }
 0x4e0   : > { %v3551_v10 = vrot.slane %v3430_v41, %v6629_v23  ;;  %v3555_v0 = vrot.slane %v3433_v6, %v6630_v42 }
 0x4e3   : > { %v3439_v49 = vpop.permute.xlu0 %3438  ;;  %v3436_v62 = vpop.permute.xlu1 %3435 }
 0x4e4   : > { %v3560_v54 = vrot.slane %v3436_v62, %v6629_v23  ;;  %v3564_v53 = vrot.slane %v3439_v49, %v6630_v42 }
 0x4e6   : > { %v3565_v49 = vsel %vm2473_vm12, %v3564_v53, %v3560_v54 }
 0x4e7   : > { %v3445_v59 = vpop.permute.xlu0 %3444  ;;  %v3442_v44 = vpop.permute.xlu1 %3441 }
 0x4e8   : > { %v3569_v35 = vrot.slane %v3442_v44, %v6629_v23  ;;  %v3573_v29 = vrot.slane %v3445_v59, %v6630_v42 }
 0x4ea   : > { %v3574_v44 = vsel %vm2473_vm12, %v3573_v29, %v3569_v35 }
 0x4eb   : > { %v3451_v26 = vpop.permute.xlu0 %3450  ;;  %v3448_v61 = vpop.permute.xlu1 %3447 }
 0x4ec   : > { %v3578_v32 = vrot.slane %v3448_v61, %v6629_v23  ;;  %v3582_v19 = vrot.slane %v3451_v26, %v6630_v42  ;;  %v3556_v61 = vsel %vm2473_vm12, %v3555_v0, %v3551_v10 }
 0x4ee   : > { %v3583_v26 = vsel %vm2473_vm12, %v3582_v19, %v3578_v32 }
 0x4ef   : > { %v3457_v9 = vpop.permute.xlu0 %3456  ;;  %v3454_v22 = vpop.permute.xlu1 %3453 }
 0x4f0   : > { %v3587_v7 = vrot.slane %v3454_v22, %v6629_v23  ;;  %v3591_v25 = vrot.slane %v3457_v9, %v6630_v42  ;;  %v3627_v9 = vsel %vm2610_vm13, %v3565_v49, %v3556_v61 }
 0x4f1   : > { %v3628_v53 = vsel %vm2612_vm14, %v3574_v44, %v3627_v9 }
 0x4f2   : > { %v3592_v37 = vsel %vm2473_vm12, %v3591_v25, %v3587_v7  ;;  %v3629_v29 = vsel %vm2614_vm6, %v3583_v26, %v3628_v53 }
 0x4f3   : > { %v3463_v46 = vpop.permute.xlu0 %3462  ;;  %v3460_v13 = vpop.permute.xlu1 %3459  ;;  %v3630_v0 = vsel %vm2616_vm15, %v3592_v37, %v3629_v29 }
 0x4f4   : > { %v3596_v62 = vrot.slane %v3460_v13, %v6629_v23  ;;  %v3600_v59 = vrot.slane %v3463_v46, %v6630_v42 }
 0x4f6   : > { %v3601_v46 = vsel %vm2473_vm12, %v3600_v59, %v3596_v62 }
 0x4f7   : > { %v3469_v33 = vpop.permute.xlu0 %3468  ;;  %v3466_v41 = vpop.permute.xlu1 %3465  ;;  %v3631_v19 = vsel %vm2618_vm2, %v3601_v46, %v3630_v0 }
 0x4f8   : > { %v3609_v6 = vrot.slane %v3469_v33, %v6630_v42  ;;  %v3605_v22 = vrot.slane %v3466_v41, %v6629_v23 }
 0x4fa   : > { %v3610_v13 = vsel %vm2473_vm12, %v3609_v6, %v3605_v22 }
 0x4fb   : > { %v3475_v54 = vpop.permute.xlu0 %3474  ;;  %v3472_v10 = vpop.permute.xlu1 %3471  ;;  %v3632_v25 = vsel %vm2620_vm3, %v3610_v13, %v3631_v19 }
 0x4fc   : > { %v3618_v35 = vrot.slane %v3475_v54, %v6630_v42  ;;  %v3614_v32 = vrot.slane %v3472_v10, %v6629_v23 }
 0x4fe   : > { %v3619_v7 = vsel %vm2473_vm12, %v3618_v35, %v3614_v32 }
 0x4ff   : > { %v3633_v33 = vsel %vm2622_vm4, %v3619_v7, %v3632_v25 }
 0x500   : > { %v3639_v49 = vsel %vm2633_vm5, %v3633_v33, 0.0 }
 0x501   : > { %3640 = vadd.xlane.f32.xlu0 %v3639_v49 }
 0x53f   : > { %v3638_v62 = vpop.xlane.xlu1 %3637 }
 0x540   : > { %v3647_v59 = vrot.slane %v3638_v62, %v5065_v11  ;;  %v3651_v44 = vrot.slane %v3638_v62, %v5334_v4  ;;  %v3655_v37 = vrot.slane %v3638_v62, %v5339_v5  ;;  %v3659_v41 = vrot.slane %v3638_v62, %v5349_v12 }
 0x541   : > { %v3663_v61 = vrot.slane %v3638_v62, %v5363_v28  ;;  %v3667_v54 = vrot.slane %v3638_v62, %v5370_v8  ;;  %v3671_v29 = vrot.slane %v3638_v62, %v5376_v30  ;;  %v3675_v10 = vrot.slane %v3638_v62, %v5393_v38 }
 0x542   : > { %4667 = vrcp.f32 %v3647_v59 }
 0x543   : > { %4669 = vrcp.f32 %v3651_v44 }
 0x544   : > { %4671 = vrcp.f32 %v3655_v37 }
 0x545   : > { %4673 = vrcp.f32 %v3659_v41 }
 0x546   : > { %4675 = vrcp.f32 %v3663_v61  ;;  %v6631_v61 = vld [vmem:[#allocation16_spill] sm:$0xff] }
 0x547   : > { %4677 = vrcp.f32 %v3667_v54 }
 0x548   : > { %4679 = vrcp.f32 %v3671_v29 }
 0x549   : > { %4681 = vrcp.f32 %v3675_v10 }
 0x54c   : > { %v4668_v6 = vpop.eup %4667 }
 0x54d   : > { %v3726_v26 = vmul.f32 %v4668_v6, %v6101_v34  ;;  %v3725_v22 = vmul.f32 %v4668_v6, %v6099_v56  ;;  %v4670_v9 = vpop.eup %4669 }
 0x54e   : > { %v3728_v53 = vmul.f32 %v4670_v9, %v6111_v39  ;;  %v3729_v46 = vmul.f32 %v4670_v9, %v6114_v1  ;;  %v4672_v35 = vpop.eup %4671 }
 0x54f   : > { %3808 = vperm.xlu1 %4525, %v3726_v26   ;;  %3805 = vperm.xlu0 %4526, %v3725_v22   ;;  %v3731_v34 = vmul.f32 %v4672_v35, %v6123_v21  ;;  %v3732_v56 = vmul.f32 %v4672_v35, %v6125_v3  ;;  %v4674_v13 = vpop.eup %4673  ;;  %v6632_v22 = vld [vmem:[#allocation17_spill] sm:$0xff] }
 0x550   : > { %v3734_v39 = vmul.f32 %v4674_v13, %v6135_v18  ;;  %v3735_v1 = vmul.f32 %v4674_v13, %v6139_v16  ;;  %v4676_v0 = vpop.eup %4675 }
 0x551   : > { %v3737_v32 = vmul.f32 %v4676_v0, %v6148_v20  ;;  %v3738_v21 = vmul.f32 %v4676_v0, %v6150_v31  ;;  %v4678_v19 = vpop.eup %4677 }
 0x552   : > { %v3740_v3 = vmul.f32 %v4678_v19, %v6157_v45  ;;  %v3741_v7 = vmul.f32 %v4678_v19, %v6159_v43  ;;  %v4680_v25 = vpop.eup %4679 }
 0x553   : > { %3811 = vperm.xlu1 %4525, %v3728_v53   ;;  %3814 = vperm.xlu0 %4526, %v3729_v46   ;;  %v3743_v18 = vmul.f32 %v4680_v25, %v6164_v17  ;;  %v3744_v16 = vmul.f32 %v4680_v25, %v6166_v50  ;;  %v4682_v33 = vpop.eup %4681 }
 0x554   : > { %v3746_v20 = vmul.f32 %v4682_v33, %v6173_v57  ;;  %v3747_v31 = vmul.f32 %v4682_v33, %v6171_v48 }
 0x557   : > { %3817 = vperm.xlu1 %4525, %v3731_v34   ;;  %3820 = vperm.xlu0 %4526, %v3732_v56  }
 0x55b   : > { %3823 = vperm.xlu1 %4525, %v3734_v39   ;;  %3826 = vperm.xlu0 %4526, %v3735_v1  }
 0x55f   : > { %3829 = vperm.xlu1 %4525, %v3737_v32   ;;  %3832 = vperm.xlu0 %4526, %v3738_v21  }
 0x563   : > { %3835 = vperm.xlu1 %4525, %v3740_v3   ;;  %3838 = vperm.xlu0 %4526, %v3741_v7  }
 0x567   : > { %3841 = vperm.xlu1 %4525, %v3743_v18   ;;  %3844 = vperm.xlu0 %4526, %v3744_v16  }
 0x56b   : > { %3847 = vperm.xlu1 %4525, %v3746_v20   ;;  %3850 = vperm.xlu0 %4526, %v3747_v31  }
 0x58e   : > { %v3641_v49 = vpop.xlane.xlu0 %3640 }
 0x58f   : > { %v3679_v45 = vrot.slane %v3641_v49, %v5065_v11  ;;  %v3683_v43 = vrot.slane %v3641_v49, %v5334_v4  ;;  %v3687_v17 = vrot.slane %v3641_v49, %v5339_v5  ;;  %v3691_v50 = vrot.slane %v3641_v49, %v5349_v12 }
 0x590   : > { %v3695_v57 = vrot.slane %v3641_v49, %v5363_v28  ;;  %v3699_v11 = vrot.slane %v3641_v49, %v5370_v8  ;;  %v3703_v12 = vrot.slane %v3641_v49, %v5376_v30  ;;  %v3707_v8 = vrot.slane %v3641_v49, %v5393_v38 }
 0x591   : > { %4683 = vrcp.f32 %v3679_v45 }
 0x592   : > { %4685 = vrcp.f32 %v3683_v43 }
 0x593   : > { %4687 = vrcp.f32 %v3687_v17 }
 0x594   : > { %4689 = vrcp.f32 %v3691_v50 }
 0x595   : > { %4691 = vrcp.f32 %v3695_v57 }
 0x596   : > { %4693 = vrcp.f32 %v3699_v11 }
 0x597   : > { %4695 = vrcp.f32 %v3703_v12 }
 0x598   : > { %4697 = vrcp.f32 %v3707_v8 }
 0x59b   : > { %v4684_v62 = vpop.eup %4683 }
 0x59c   : > { %v3750_v48 = vmul.f32 %v4684_v62, %v6191_v2  ;;  %v3749_v59 = vmul.f32 %v4684_v62, %v6197_v63  ;;  %v4686_v44 = vpop.eup %4685 }
 0x59d   : > { %v3753_v4 = vmul.f32 %v4686_v44, %v6208_v60  ;;  %v3752_v5 = vmul.f32 %v4686_v44, %v6215_v15  ;;  %v4688_v37 = vpop.eup %4687 }
 0x59e   : > { %3856 = vperm.xlu1 %4525, %v3750_v48   ;;  %3853 = vperm.xlu0 %4526, %v3749_v59   ;;  %v3756_v28 = vmul.f32 %v4688_v37, %v6222_v24  ;;  %v3755_v2 = vmul.f32 %v4688_v37, %v6228_v52  ;;  %v4690_v63 = vpop.eup %4689 }
 0x59f   : > { %v3759_v60 = vmul.f32 %v4690_v63, %v6234_v55  ;;  %v3758_v15 = vmul.f32 %v4690_v63, %v6241_v14  ;;  %v4692_v41 = vpop.eup %4691 }
 0x5a0   : > { %v3762_v30 = vmul.f32 %v4692_v41, %v6246_v51  ;;  %v3761_v24 = vmul.f32 %v4692_v41, %v6252_v27  ;;  %v4694_v6 = vpop.eup %4693 }
 0x5a1   : > { %v3765_v52 = vmul.f32 %v4694_v6, %v6255_v58  ;;  %v3764_v38 = vmul.f32 %v4694_v6, %v6258_v40  ;;  %v4696_v55 = vpop.eup %4695 }
 0x5a2   : > { %3862 = vperm.xlu1 %4525, %v3753_v4   ;;  %3859 = vperm.xlu0 %4526, %v3752_v5   ;;  %v3767_v14 = vmul.f32 %v4696_v55, %v6264_v47  ;;  %v3768_v51 = vmul.f32 %v4696_v55, %v6261_v36  ;;  %v4698_v27 = vpop.eup %4697 }
 0x5a3   : > { %v3770_v26 = vmul.f32 %v4698_v27, %v6631_v61  ;;  %v3771_v9 = vmul.f32 %v4698_v27, %v6632_v22 }
 0x5a6   : > { %3868 = vperm.xlu1 %4525, %v3756_v28   ;;  %3865 = vperm.xlu0 %4526, %v3755_v2  }
 0x5aa   : > { %3874 = vperm.xlu1 %4525, %v3759_v60   ;;  %3871 = vperm.xlu0 %4526, %v3758_v15  }
 0x5ae   : > { %3880 = vperm.xlu1 %4525, %v3762_v30   ;;  %3877 = vperm.xlu0 %4526, %v3761_v24  }
 0x5b2   : > { %3886 = vperm.xlu1 %4525, %v3765_v52   ;;  %3883 = vperm.xlu0 %4526, %v3764_v38  }
 0x5b6   : > { %3889 = vperm.xlu1 %4525, %v3767_v14   ;;  %3892 = vperm.xlu0 %4526, %v3768_v51  }
 0x5ba   : > { %3895 = vperm.xlu1 %4525, %v3770_v26   ;;  %3898 = vperm.xlu0 %4526, %v3771_v9  }
 0x5bb   : > { %4742 = shalt.err (!%p4739_p4)
}
 0x5bc   : > { %s4743_s18 = scalar_lea.hbm %s6392_s9, 256  ;;  %s4747_s16 = scalar_lea.hbm %s6564_s11, 512 }
 0x5bd   : > { %p4744_p7 = scmp.ne.s32.totalorder %s6392_s9, %s4743_s18  ;;  %p4748_p1 = scmp.lt.u32.totalorder %s6392_s9, %s6564_s11 }
 0x5be   : > { %p4749_p3 = scmp.lt.u32.totalorder %s4747_s16, %s4743_s18  ;;  %p4751_p8 = scmp.lt.u32.totalorder %s4743_s18, %s6392_s9 }
 0x5bf   : > { %p4745_p10 = pnand %p4744_p7, %p6633_p11 }
 0x5c0   : > { %p4750_p9 = por %p4749_p3, %p4748_p1 }
 0x5c1   : > { %p4746_p12 = pneg %p4745_p10 }
 0x5c2   : > { %p4752_p0 = por %p4751_p8, %p4750_p9 }
 0x5c4   : > { %p4753_p6 = pnand %p4752_p0, %p4746_p12 }
 0x5c6   : > { %4756 = shalt.err (!%p4753_p6)
}
 0x5c7   : > { %s4852_s0 = smov 128   ;;  %s4853_s28 = smov 8  }
 0x5c8   : > { %4454 = dma.vmem_to_hbm [thread:$0]  (%p6633_p11), %s6395_s30, 256, %s6392_s9, %s4068_s17, %s4852_s0, %s4852_s0, %s4853_s28  }
 0x5c9   : > { %s6456_s26 = scalar_lea.vmem [#allocation6], %s5033_s15  ;;  %s6634_s9 = sshll.u32 %s4835_s22, 8 }
 0x5ca   : > { %s4083_s15 = sshll.u32 %s6456_s26, 4  ;;  %s6496_s18 = scalar_lea.hbm %s6563_s10, %s6634_s9  ;;  %s6498_s15 = int_to_ptr.vmem [resolvable:$true] %s4083_s15 }
 0x5cb   : > { %s4063_s29 = scalar_lea.sflag [#allocation5], %s5030_s25  ;;  %s4757_s27 = scalar_lea.vmem %s6498_s15, 256 }
 0x5cc   : > { %p4758_p13 = scmp.ne.s32.totalorder %s6498_s15, %s4757_s27  ;;  %s4854_s22 = smov [#allocation6]  }
 0x5cd   : > { %s4761_s16 = sshll.u32 %s4854_s22, 4  ;;  %s4762_s16 = int_to_ptr.vmem [resolvable:$false] %s4761_s16 }
 0x5ce   : > { %v3809_v58 = vpop.permute.xlu1 %3808  ;;  %v3806_v40 = vpop.permute.xlu0 %3805  ;;  %p4759_p2 = pnand %p4758_p13, %p6633_p11  ;;  %s4763_s23 = scalar_lea.vmem %s4762_s16, 512 }
 0x5cf   : > { %v3907_v32 = vrot.slane %v3809_v58, %v6630_v42  ;;  %v3903_v21 = vrot.slane %v3806_v40, %v6629_v23  ;;  %p4764_p4 = scmp.lt.s32.totalorder %s6498_s15, %s4762_s16  ;;  %p4765_p7 = scmp.lt.s32.totalorder %s4763_s23, %s4757_s27 }
 0x5d0   : > { %p4760_p5 = pneg %p4759_p2 }
 0x5d1   : > { %v3908_v45 = vsel %vm2473_vm12, %v3907_v32, %v3903_v21  ;;  %p4766_p10 = por %p4765_p7, %p4764_p4 }
 0x5d2   : > { %v3812_v36 = vpop.permute.xlu1 %3811  ;;  %v3815_v47 = vpop.permute.xlu0 %3814 }
 0x5d3   : > { %v3912_v56 = vrot.slane %v3812_v36, %v6629_v23  ;;  %v3916_v13 = vrot.slane %v3815_v47, %v6630_v42  ;;  %p4767_p12 = pnand %p4766_p10, %p4760_p5 }
 0x5d5   : > { %v3917_v18 = vsel %vm2473_vm12, %v3916_v13, %v3912_v56 }
 0x5d6   : > { %v3818_v54 = vpop.permute.xlu1 %3817  ;;  %v3821_v53 = vpop.permute.xlu0 %3820  ;;  %v4044_v62 = vsel %vm2610_vm13, %v3917_v18, %v3908_v45 }
 0x5d7   : > { %v3921_v10 = vrot.slane %v3818_v54, %v6629_v23  ;;  %v3925_v39 = vrot.slane %v3821_v53, %v6630_v42 }
 0x5d9   : > { %v3926_v20 = vsel %vm2473_vm12, %v3925_v39, %v3921_v10 }
 0x5da   : > { %v3824_v46 = vpop.permute.xlu1 %3823  ;;  %v3827_v35 = vpop.permute.xlu0 %3826  ;;  %v4045_v48 = vsel %vm2612_vm14, %v3926_v20, %v4044_v62 }
 0x5db   : > { %v3930_v19 = vrot.slane %v3824_v46, %v6629_v23  ;;  %v3934_v3 = vrot.slane %v3827_v35, %v6630_v42 }
 0x5dd   : > { %v3935_v43 = vsel %vm2473_vm12, %v3934_v3, %v3930_v19 }
 0x5de   : > { %v3830_v29 = vpop.permute.xlu1 %3829  ;;  %v3833_v34 = vpop.permute.xlu0 %3832  ;;  %v4046_v44 = vsel %vm2614_vm6, %v3935_v43, %v4045_v48 }
 0x5df   : > { %v3939_v7 = vrot.slane %v3830_v29, %v6629_v23  ;;  %v3943_v25 = vrot.slane %v3833_v34, %v6630_v42 }
 0x5e1   : > { %v3944_v57 = vsel %vm2473_vm12, %v3943_v25, %v3939_v7 }
 0x5e2   : > { %v3836_v1 = vpop.permute.xlu1 %3835  ;;  %v3839_v0 = vpop.permute.xlu0 %3838  ;;  %v4047_v37 = vsel %vm2616_vm15, %v3944_v57, %v4046_v44 }
 0x5e3   : > { %v3948_v16 = vrot.slane %v3836_v1, %v6629_v23  ;;  %v3952_v33 = vrot.slane %v3839_v0, %v6630_v42 }
 0x5e5   : > { %v3953_v59 = vsel %vm2473_vm12, %v3952_v33, %v3948_v16 }
 0x5e6   : > { %v3842_v31 = vpop.permute.xlu1 %3841  ;;  %v3845_v49 = vpop.permute.xlu0 %3844  ;;  %v4048_v2 = vsel %vm2618_vm2, %v3953_v59, %v4047_v37 }
 0x5e7   : > { %v3957_v17 = vrot.slane %v3842_v31, %v6629_v23  ;;  %v3961_v50 = vrot.slane %v3845_v49, %v6630_v42 }
 0x5e9   : > { %v3962_v11 = vsel %vm2473_vm12, %v3961_v50, %v3957_v17 }
 0x5ea   : > { %v3848_v4 = vpop.permute.xlu1 %3847  ;;  %v3851_v5 = vpop.permute.xlu0 %3850  ;;  %v4049_v63 = vsel %vm2620_vm3, %v3962_v11, %v4048_v2 }
 0x5eb   : > { %v3966_v12 = vrot.slane %v3848_v4, %v6629_v23  ;;  %v3970_v28 = vrot.slane %v3851_v5, %v6630_v42 }
 0x5ed   : > { %v3971_v8 = vsel %vm2473_vm12, %v3970_v28, %v3966_v12 }
 0x5ee   : > { %v4050_v60 = vsel %vm2622_vm4, %v3971_v8, %v4049_v63 }
 0x5ef   : > { %4060 = vst.msk [vmem:[%s6456_s26] sm:$0xff] %vm2633_vm5, %v4050_v60 }
 0x61d   : > { %v3857_v15 = vpop.permute.xlu1 %3856  ;;  %v3854_v41 = vpop.permute.xlu0 %3853 }
 0x61e   : > { %v3979_v40 = vrot.slane %v3857_v15, %v6630_v42  ;;  %v3975_v36 = vrot.slane %v3854_v41, %v6629_v23 }
 0x620   : > { %v3980_v39 = vsel %vm2473_vm12, %v3979_v40, %v3975_v36 }
 0x621   : > { %v3863_v30 = vpop.permute.xlu1 %3862  ;;  %v3860_v24 = vpop.permute.xlu0 %3859 }
 0x622   : > { %v3988_v27 = vrot.slane %v3863_v30, %v6630_v42  ;;  %v3984_v61 = vrot.slane %v3860_v24, %v6629_v23 }
 0x624   : > { %v3989_v35 = vsel %vm2473_vm12, %v3988_v27, %v3984_v61 }
 0x625   : > { %v3869_v6 = vpop.permute.xlu1 %3868  ;;  %v3866_v52 = vpop.permute.xlu0 %3865  ;;  %v4051_v21 = vsel %vm2610_vm13, %v3989_v35, %v3980_v39 }
 0x626   : > { %v3997_v26 = vrot.slane %v3869_v6, %v6630_v42  ;;  %v3993_v22 = vrot.slane %v3866_v52, %v6629_v23 }
 0x628   : > { %v3998_v56 = vsel %vm2473_vm12, %v3997_v26, %v3993_v22 }
 0x629   : > { %v3875_v38 = vpop.permute.xlu1 %3874  ;;  %v3872_v55 = vpop.permute.xlu0 %3871  ;;  %v4052_v3 = vsel %vm2612_vm14, %v3998_v56, %v4051_v21 }
 0x62a   : > { %v4006_v47 = vrot.slane %v3875_v38, %v6630_v42  ;;  %v4002_v54 = vrot.slane %v3872_v55, %v6629_v23 }
 0x62c   : > { %v4007_v1 = vsel %vm2473_vm12, %v4006_v47, %v4002_v54 }
 0x62d   : > { %v3881_v14 = vpop.permute.xlu1 %3880  ;;  %v3878_v51 = vpop.permute.xlu0 %3877  ;;  %v4053_v25 = vsel %vm2614_vm6, %v4007_v1, %v4052_v3 }
 0x62e   : > { %v4015_v53 = vrot.slane %v3881_v14, %v6630_v42  ;;  %v4011_v46 = vrot.slane %v3878_v51, %v6629_v23 }
 0x630   : > { %v4016_v19 = vsel %vm2473_vm12, %v4015_v53, %v4011_v46 }
 0x631   : > { %v3887_v9 = vpop.permute.xlu1 %3886  ;;  %v3884_v58 = vpop.permute.xlu0 %3883  ;;  %v4054_v20 = vsel %vm2616_vm15, %v4016_v19, %v4053_v25 }
 0x632   : > { %v4024_v29 = vrot.slane %v3887_v9, %v6630_v42  ;;  %v4020_v34 = vrot.slane %v3884_v58, %v6629_v23 }
 0x634   : > { %v4025_v7 = vsel %vm2473_vm12, %v4024_v29, %v4020_v34 }
 0x635   : > { %v3890_v13 = vpop.permute.xlu1 %3889  ;;  %v3893_v10 = vpop.permute.xlu0 %3892  ;;  %v4055_v45 = vsel %vm2618_vm2, %v4025_v7, %v4054_v20 }
 0x636   : > { %v4029_v0 = vrot.slane %v3890_v13, %v6629_v23  ;;  %v4033_v32 = vrot.slane %v3893_v10, %v6630_v42 }
 0x638   : > { %v4034_v18 = vsel %vm2473_vm12, %v4033_v32, %v4029_v0 }
 0x639   : > { %v3896_v16 = vpop.permute.xlu1 %3895  ;;  %v3899_v33 = vpop.permute.xlu0 %3898  ;;  %v4056_v43 = vsel %vm2620_vm3, %v4034_v18, %v4055_v45 }
 0x63a   : > { %v4038_v31 = vrot.slane %v3896_v16, %v6629_v23  ;;  %v4042_v49 = vrot.slane %v3899_v33, %v6630_v42 }
 0x63c   : > { %v4043_v17 = vsel %vm2473_vm12, %v4042_v49, %v4038_v31 }
 0x63d   : > { %v4057_v23 = vsel %vm2622_vm4, %v4043_v17, %v4056_v43 }
 0x63e   : > { %4061 = vst.msk [vmem:[%s6456_s26 + $0x8] sm:$0xff] %vm2633_vm5, %v4057_v23 }
 0x63f   : > { %4770 = shalt.err (!%p4767_p12)
}
 0x640   : > { %s4771_s26 = scalar_lea.hbm %s6496_s18, 256  ;;  %s4775_s17 = scalar_lea.hbm %s6563_s10, 512 }
 0x641   : > { %p4772_p1 = scmp.ne.s32.totalorder %s6496_s18, %s4771_s26  ;;  %p4776_p8 = scmp.lt.u32.totalorder %s6496_s18, %s6563_s10 }
 0x642   : > { %p4777_p0 = scmp.lt.u32.totalorder %s4775_s17, %s4771_s26  ;;  %p4779_p13 = scmp.lt.u32.totalorder %s4771_s26, %s6496_s18 }
 0x643   : > { %p4773_p3 = pnand %p4772_p1, %p6633_p11 }
 0x644   : > { %p4778_p6 = por %p4777_p0, %p4776_p8 }
 0x645   : > { %p4774_p9 = pneg %p4773_p3 }
 0x646   : > { %p4780_p2 = por %p4779_p13, %p4778_p6 }
 0x648   : > { %p4781_p5 = pnand %p4780_p2, %p4774_p9 }
 0x64a   : > { %4784 = shalt.err (!%p4781_p5)
}
 0x64b   : > { %4453 = dma.vmem_to_hbm [thread:$0]  (%p6633_p11), %s6498_s15, 256, %s6496_s18, %s4063_s29, %s4852_s0, %s4852_s0, %s4853_s28  }
 0x64c PF: > { %s4116_s27 = sand.u32 1, %s4823_s19   ;;  %p6635_p4 = scmp.ne.s32.totalorder %s6591_s14, 0 }
 0x64d   : > { %p6636_p7 = scmp.ge.s32.totalorder %s4843_s24, 2  ;;  %s4117_s23 = scalar_lea.sflag [#allocation5], %s4116_s27 }
 0x64f   : > { %p4462_p10 = pnand %p6636_p7, %p6635_p4 }
 0x651   : > { %4814 = dma.done.wait (!%p4462_p10), %s4117_s23, 256  }
 0x652   : > { %4816 = vsyncadd (!%p4462_p10), %s4117_s23, 4294967040  ;;  %s4126_s12 = scalar_lea.sflag [#allocation8], %s4116_s27 }
 0x653   : > { %4818 = dma.done.wait (!%p4462_p10), %s4126_s12, 256  }
 0x654   : > { %4820 = vsyncadd (!%p4462_p10), %s4126_s12, 4294967040  ;;  %s32_s24 = sadd.s32 1, %s4843_s24   ;;  %s6637_s22 = sld [smem:[#allocation12_spill]] }
 0x655   : > { %p29_p12 = scmp.ge.s32.totalorder %s32_s24, 4   ;;  %s6638_s23 = sld [smem:[#allocation13_spill]] }
 0x656   : > { %s6639_s19 = smov %s4827_s20  ;;  %s6640_s20 = smov %s4831_s21 }
 0x657   : > { %s6641_s21 = smov %s4974_s13  ;;  %31 = sbr.rel (!%p29_p12) target bundleno = 11 (0xb), region = 126 }
 0x65e   :  { %4131 = vsyncpa [#allocation4], 1 }
 0x65f   :  { %4133 = vsyncpa [#allocation4 + $0x1], 1 }
 0x660   :  { %4134 = vsyncpa [#allocation5], 1 }
 0x661   :  { %4136 = vsyncpa [#allocation5 + $0x1], 1 }
 0x662   :  { %4137 = vsyncpa [#allocation8], 1 }
 0x663   :  { %4139 = vsyncpa [#allocation8 + $0x1], 1 }

</bundles_post_ra>
